<compile_context>
chip_gen: v7x
topology: tpu7x:2x2x1
jax: 0.10.0
libtpu: 0.0.40
codegen_flags: <defaults>
</compile_context>

<pallas_src>
import jax
import jax.numpy as jnp
from jax import lax
from jax.experimental import pallas as pl
from jax.experimental.pallas import tpu as pltpu
import numpy as np


def _make_kernel(cin, shifts, tout):
    """Kernel: build the patch slab in VMEM, one matmul, fused activations."""

    def kernel(w_ref, x_ref, sb_ref, o_ref, p_ref):
        # x_ref : (1, Cin, WIN)   flattened (and zero-padded) input of one sample
        # w_ref : (Cout, K)       scaled weights, (kd,kh,kw,ci)-ordered columns
        # sb_ref: (Cout, 2)       [scaled conv bias | multiplicative bias]
        # o_ref : (1, Cout, T)    lane-dense output slab (full-grid flat columns)
        # p_ref : (K, T)          VMEM scratch patch matrix
        for t, s in enumerate(shifts):          # 27 static lane-shifted copies
            p_ref[pl.ds(t * cin, cin), :] = x_ref[0, :, pl.ds(s, tout)]
        acc = jnp.dot(w_ref[...], p_ref[...], preferred_element_type=jnp.float32)
        acc = acc + sb_ref[:, 0:1]              # scaled conv bias
        y = jnp.tanh(acc) * sb_ref[:, 1:2]      # scaling already folded into w/cb
        o_ref[0] = jax.nn.sigmoid(y).astype(o_ref.dtype)

    return kernel


def model_forward(x, conv_w, conv_b, scaling_factor, bias):
    """Forward pass matching the PyTorch Model.

    x:                    (N, Cin, D, H, W)        float32 (NCDHW, like PyTorch)
    conv_w:               (Cout, Cin, KD, KH, KW)
    conv_b:               (Cout,)
    scaling_factor, bias: (Cout, 1, 1, 1)
    returns:              (N, Cout, D_out, H_out, W_out)
    """
    N, Cin, D, H, W = x.shape
    Cout, _, KD, KH, KW = conv_w.shape
    Do, Ho, Wo = D - KD + 1, H - KH + 1, W - KW + 1

    DHW = D * H * W
    K = KD * KH * KW * Cin

    # Per-tap shift on the flattened (d, h, w) axis.
    shifts = tuple(kd * H * W + kh * W + kw
                   for kd in range(KD) for kh in range(KH) for kw in range(KW))
    s_max = shifts[-1]

    T = ((DHW + 127) // 128) * 128          # lane-dense output columns per sample
    WIN = ((T + s_max + 127) // 128) * 128  # input columns needed per sample

    # ---- host glue: reshape + pad only (no im2col) ----
    x_flat = x.reshape(N, Cin, DHW).astype(jnp.float32)
    x_pad = jnp.pad(x_flat, ((0, 0), (0, 0), (0, WIN - DHW)))

    # Weights in (kd, kh, kw, ci) column order; fold scaling into w and conv_b.
    s_col = scaling_factor.reshape(Cout, 1).astype(jnp.float32)
    w_t = jnp.transpose(conv_w, (0, 2, 3, 4, 1)).reshape(Cout, K).astype(jnp.float32)
    w_t = w_t * s_col
    sb = jnp.concatenate(
        [conv_b.reshape(Cout, 1).astype(jnp.float32) * s_col,   # scaled conv bias
         bias.reshape(Cout, 1).astype(jnp.float32)],            # multiplicative bias
        axis=1)                                                  # (Cout, 2)

    kernel = _make_kernel(Cin, shifts, T)

    out_t = pl.pallas_call(
        kernel,
        out_shape=jax.ShapeDtypeStruct((N, Cout, T), jnp.float32),
        grid=(N,),
        in_specs=[
            pl.BlockSpec((Cout, K), lambda n: (0, 0)),       # scaled weights
            pl.BlockSpec((1, Cin, WIN), lambda n: (n, 0, 0)),  # one sample's flat x
            pl.BlockSpec((Cout, 2), lambda n: (0, 0)),       # merged biases
        ],
        out_specs=pl.BlockSpec((1, Cout, T), lambda n: (n, 0, 0)),
        scratch_shapes=[pltpu.VMEM((K, T), jnp.float32)],
        compiler_params=pltpu.CompilerParams(
            dimension_semantics=("parallel",)),
    )(w_t, x_pad, sb)

    # Keep only valid conv positions: slice + reshape (no transpose needed,
    # output is already N-major / channel-second).
    out = out_t[:, :, :DHW].reshape(N, Cout, D, H, W)
    return out[:, :, :Do, :Ho, :Wo]


def reference_forward(x, conv_w, conv_b, scaling_factor, bias):
    y = lax.conv_general_dilated(
        x, conv_w, window_strides=(1, 1, 1), padding="VALID",
        dimension_numbers=("NCDHW", "OIDHW", "NCDHW"))
    y = y + conv_b.reshape(1, -1, 1, 1, 1)
    y = y * scaling_factor[None]
    y = jnp.tanh(y)
    y = y * bias[None]
    return jax.nn.sigmoid(y)


if __name__ == "__main__":
    key = jax.random.PRNGKey(0)
    k1, k2, k3, k4, k5 = jax.random.split(key, 5)

    N, Cin, Cout, ks = 2, 3, 16, 3
    D = H = W = 10  # small spatial size -> output (2, 16, 8, 8, 8)

    x = jax.random.normal(k1, (N, Cin, D, H, W), jnp.float32)
    conv_w = jax.random.normal(k2, (Cout, Cin, ks, ks, ks), jnp.float32) * 0.1
    conv_b = jax.random.normal(k3, (Cout,), jnp.float32) * 0.1
    scaling_factor = jax.random.normal(k4, (Cout, 1, 1, 1), jnp.float32)
    bias = jax.random.normal(k5, (Cout, 1, 1, 1), jnp.float32)

    out = jax.jit(model_forward)(x, conv_w, conv_b, scaling_factor, bias)
    out = jax.block_until_ready(out)

    ref = reference_forward(x, conv_w, conv_b, scaling_factor, bias)
    assert out.shape == ref.shape, (out.shape, ref.shape)
    np.testing.assert_allclose(np.asarray(out), np.asarray(ref),
                               rtol=1e-5, atol=1e-5)
    print("KERNEL_OK")
</pallas_src>

<mosaic_0001>
module attributes {stable_mosaic.version = 11 : i64} {
  func.func @kernel(%arg0: i32, %arg1: memref<16x81xf32, #tpu.memory_space<vmem>>, %arg2: memref<1x3x1280xf32, #tpu.memory_space<vmem>>, %arg3: memref<16x2xf32, #tpu.memory_space<vmem>>, %arg4: memref<1x16x1024xf32, #tpu.memory_space<vmem>>, %arg5: memref<81x1024xf32, #tpu.memory_space<vmem>>) attributes {dimension_semantics = [#tpu.dimension_semantics<parallel>], iteration_bounds = array<i64: 2>, scalar_prefetch = 0 : i64, scratch_operands = 1 : i64, tpu.core_type = #tpu.core_type<tc>, window_params = [{pipeline_mode = #tpu.pipeline_mode<synchronous>, transform_indices = @transform_0, window_bounds = array<i64: 16, 81>}, {transform_indices = @transform_1, window_bounds = array<i64: 1, 3, 1280>}, {pipeline_mode = #tpu.pipeline_mode<synchronous>, transform_indices = @transform_2, window_bounds = array<i64: 16, 2>}, {transform_indices = @transform_3, window_bounds = array<i64: 1, 16, 1024>}]} {
    %c0 = arith.constant 0 : index
    %c0_0 = arith.constant 0 : index
    %c0_1 = arith.constant 0 : index
    %0 = vector.load %arg2[%c0, %c0_0, %c0_1] : memref<1x3x1280xf32, #tpu.memory_space<vmem>>, vector<1x3x1024xf32>
    %1 = vector.shape_cast %0 : vector<1x3x1024xf32> to vector<3x1024xf32>
    %c0_2 = arith.constant 0 : index
    %c0_3 = arith.constant 0 : index
    %2 = vector.load %arg5[%c0_2, %c0_3] : memref<81x1024xf32, #tpu.memory_space<vmem>>, vector<3x1024xf32>
    tpu.vector_store %arg5[%c0_2, %c0_3], %1 {strides = array<i32>} : memref<81x1024xf32, #tpu.memory_space<vmem>>, vector<3x1024xf32>,
    %c0_4 = arith.constant 0 : index
    %c0_5 = arith.constant 0 : index
    %c1 = arith.constant 1 : index
    %3 = vector.load %arg2[%c0_4, %c0_5, %c1] : memref<1x3x1280xf32, #tpu.memory_space<vmem>>, vector<1x3x1024xf32>
    %4 = vector.shape_cast %3 : vector<1x3x1024xf32> to vector<3x1024xf32>
    %c3 = arith.constant 3 : index
    %c0_6 = arith.constant 0 : index
    %5 = vector.load %arg5[%c3, %c0_6] : memref<81x1024xf32, #tpu.memory_space<vmem>>, vector<3x1024xf32>
    tpu.vector_store %arg5[%c3, %c0_6], %4 {strides = array<i32>} : memref<81x1024xf32, #tpu.memory_space<vmem>>, vector<3x1024xf32>,
    %c0_7 = arith.constant 0 : index
    %c0_8 = arith.constant 0 : index
    %c2 = arith.constant 2 : index
    %6 = vector.load %arg2[%c0_7, %c0_8, %c2] : memref<1x3x1280xf32, #tpu.memory_space<vmem>>, vector<1x3x1024xf32>
    %7 = vector.shape_cast %6 : vector<1x3x1024xf32> to vector<3x1024xf32>
    %c6 = arith.constant 6 : index
    %c0_9 = arith.constant 0 : index
    %8 = vector.load %arg5[%c6, %c0_9] : memref<81x1024xf32, #tpu.memory_space<vmem>>, vector<3x1024xf32>
    tpu.vector_store %arg5[%c6, %c0_9], %7 {strides = array<i32>} : memref<81x1024xf32, #tpu.memory_space<vmem>>, vector<3x1024xf32>,
    %c0_10 = arith.constant 0 : index
    %c0_11 = arith.constant 0 : index
    %c10 = arith.constant 10 : index
    %9 = vector.load %arg2[%c0_10, %c0_11, %c10] : memref<1x3x1280xf32, #tpu.memory_space<vmem>>, vector<1x3x1024xf32>
    %10 = vector.shape_cast %9 : vector<1x3x1024xf32> to vector<3x1024xf32>
    %c9 = arith.constant 9 : index
    %c0_12 = arith.constant 0 : index
    %11 = vector.load %arg5[%c9, %c0_12] : memref<81x1024xf32, #tpu.memory_space<vmem>>, vector<3x1024xf32>
    tpu.vector_store %arg5[%c9, %c0_12], %10 {strides = array<i32>} : memref<81x1024xf32, #tpu.memory_space<vmem>>, vector<3x1024xf32>,
    %c0_13 = arith.constant 0 : index
    %c0_14 = arith.constant 0 : index
    %c11 = arith.constant 11 : index
    %12 = vector.load %arg2[%c0_13, %c0_14, %c11] : memref<1x3x1280xf32, #tpu.memory_space<vmem>>, vector<1x3x1024xf32>
    %13 = vector.shape_cast %12 : vector<1x3x1024xf32> to vector<3x1024xf32>
    %c12 = arith.constant 12 : index
    %c0_15 = arith.constant 0 : index
    %14 = vector.load %arg5[%c12, %c0_15] : memref<81x1024xf32, #tpu.memory_space<vmem>>, vector<3x1024xf32>
    tpu.vector_store %arg5[%c12, %c0_15], %13 {strides = array<i32>} : memref<81x1024xf32, #tpu.memory_space<vmem>>, vector<3x1024xf32>,
    %c0_16 = arith.constant 0 : index
    %c0_17 = arith.constant 0 : index
    %c12_18 = arith.constant 12 : index
    %15 = vector.load %arg2[%c0_16, %c0_17, %c12_18] : memref<1x3x1280xf32, #tpu.memory_space<vmem>>, vector<1x3x1024xf32>
    %16 = vector.shape_cast %15 : vector<1x3x1024xf32> to vector<3x1024xf32>
    %c15 = arith.constant 15 : index
    %c0_19 = arith.constant 0 : index
    %17 = vector.load %arg5[%c15, %c0_19] : memref<81x1024xf32, #tpu.memory_space<vmem>>, vector<3x1024xf32>
    tpu.vector_store %arg5[%c15, %c0_19], %16 {strides = array<i32>} : memref<81x1024xf32, #tpu.memory_space<vmem>>, vector<3x1024xf32>,
    %c0_20 = arith.constant 0 : index
    %c0_21 = arith.constant 0 : index
    %c20 = arith.constant 20 : index
    %18 = vector.load %arg2[%c0_20, %c0_21, %c20] : memref<1x3x1280xf32, #tpu.memory_space<vmem>>, vector<1x3x1024xf32>
    %19 = vector.shape_cast %18 : vector<1x3x1024xf32> to vector<3x1024xf32>
    %c18 = arith.constant 18 : index
    %c0_22 = arith.constant 0 : index
    %20 = vector.load %arg5[%c18, %c0_22] : memref<81x1024xf32, #tpu.memory_space<vmem>>, vector<3x1024xf32>
    tpu.vector_store %arg5[%c18, %c0_22], %19 {strides = array<i32>} : memref<81x1024xf32, #tpu.memory_space<vmem>>, vector<3x1024xf32>,
    %c0_23 = arith.constant 0 : index
    %c0_24 = arith.constant 0 : index
    %c21 = arith.constant 21 : index
    %21 = vector.load %arg2[%c0_23, %c0_24, %c21] : memref<1x3x1280xf32, #tpu.memory_space<vmem>>, vector<1x3x1024xf32>
    %22 = vector.shape_cast %21 : vector<1x3x1024xf32> to vector<3x1024xf32>
    %c21_25 = arith.constant 21 : index
    %c0_26 = arith.constant 0 : index
    %23 = vector.load %arg5[%c21_25, %c0_26] : memref<81x1024xf32, #tpu.memory_space<vmem>>, vector<3x1024xf32>
    tpu.vector_store %arg5[%c21_25, %c0_26], %22 {strides = array<i32>} : memref<81x1024xf32, #tpu.memory_space<vmem>>, vector<3x1024xf32>,
    %c0_27 = arith.constant 0 : index
    %c0_28 = arith.constant 0 : index
    %c22 = arith.constant 22 : index
    %24 = vector.load %arg2[%c0_27, %c0_28, %c22] : memref<1x3x1280xf32, #tpu.memory_space<vmem>>, vector<1x3x1024xf32>
    %25 = vector.shape_cast %24 : vector<1x3x1024xf32> to vector<3x1024xf32>
    %c24 = arith.constant 24 : index
    %c0_29 = arith.constant 0 : index
    %26 = vector.load %arg5[%c24, %c0_29] : memref<81x1024xf32, #tpu.memory_space<vmem>>, vector<3x1024xf32>
    tpu.vector_store %arg5[%c24, %c0_29], %25 {strides = array<i32>} : memref<81x1024xf32, #tpu.memory_space<vmem>>, vector<3x1024xf32>,
    %c0_30 = arith.constant 0 : index
    %c0_31 = arith.constant 0 : index
    %c100 = arith.constant 100 : index
    %27 = vector.load %arg2[%c0_30, %c0_31, %c100] : memref<1x3x1280xf32, #tpu.memory_space<vmem>>, vector<1x3x1024xf32>
    %28 = vector.shape_cast %27 : vector<1x3x1024xf32> to vector<3x1024xf32>
    %c27 = arith.constant 27 : index
    %c0_32 = arith.constant 0 : index
    %29 = vector.load %arg5[%c27, %c0_32] : memref<81x1024xf32, #tpu.memory_space<vmem>>, vector<3x1024xf32>
    tpu.vector_store %arg5[%c27, %c0_32], %28 {strides = array<i32>} : memref<81x1024xf32, #tpu.memory_space<vmem>>, vector<3x1024xf32>,
    %c0_33 = arith.constant 0 : index
    %c0_34 = arith.constant 0 : index
    %c101 = arith.constant 101 : index
    %30 = vector.load %arg2[%c0_33, %c0_34, %c101] : memref<1x3x1280xf32, #tpu.memory_space<vmem>>, vector<1x3x1024xf32>
    %31 = vector.shape_cast %30 : vector<1x3x1024xf32> to vector<3x1024xf32>
    %c30 = arith.constant 30 : index
    %c0_35 = arith.constant 0 : index
    %32 = vector.load %arg5[%c30, %c0_35] : memref<81x1024xf32, #tpu.memory_space<vmem>>, vector<3x1024xf32>
    tpu.vector_store %arg5[%c30, %c0_35], %31 {strides = array<i32>} : memref<81x1024xf32, #tpu.memory_space<vmem>>, vector<3x1024xf32>,
    %c0_36 = arith.constant 0 : index
    %c0_37 = arith.constant 0 : index
    %c102 = arith.constant 102 : index
    %33 = vector.load %arg2[%c0_36, %c0_37, %c102] : memref<1x3x1280xf32, #tpu.memory_space<vmem>>, vector<1x3x1024xf32>
    %34 = vector.shape_cast %33 : vector<1x3x1024xf32> to vector<3x1024xf32>
    %c33 = arith.constant 33 : index
    %c0_38 = arith.constant 0 : index
    %35 = vector.load %arg5[%c33, %c0_38] : memref<81x1024xf32, #tpu.memory_space<vmem>>, vector<3x1024xf32>
    tpu.vector_store %arg5[%c33, %c0_38], %34 {strides = array<i32>} : memref<81x1024xf32, #tpu.memory_space<vmem>>, vector<3x1024xf32>,
    %c0_39 = arith.constant 0 : index
    %c0_40 = arith.constant 0 : index
    %c110 = arith.constant 110 : index
    %36 = vector.load %arg2[%c0_39, %c0_40, %c110] : memref<1x3x1280xf32, #tpu.memory_space<vmem>>, vector<1x3x1024xf32>
    %37 = vector.shape_cast %36 : vector<1x3x1024xf32> to vector<3x1024xf32>
    %c36 = arith.constant 36 : index
    %c0_41 = arith.constant 0 : index
    %38 = vector.load %arg5[%c36, %c0_41] : memref<81x1024xf32, #tpu.memory_space<vmem>>, vector<3x1024xf32>
    tpu.vector_store %arg5[%c36, %c0_41], %37 {strides = array<i32>} : memref<81x1024xf32, #tpu.memory_space<vmem>>, vector<3x1024xf32>,
    %c0_42 = arith.constant 0 : index
    %c0_43 = arith.constant 0 : index
    %c111 = arith.constant 111 : index
    %39 = vector.load %arg2[%c0_42, %c0_43, %c111] : memref<1x3x1280xf32, #tpu.memory_space<vmem>>, vector<1x3x1024xf32>
    %40 = vector.shape_cast %39 : vector<1x3x1024xf32> to vector<3x1024xf32>
    %c39 = arith.constant 39 : index
    %c0_44 = arith.constant 0 : index
    %41 = vector.load %arg5[%c39, %c0_44] : memref<81x1024xf32, #tpu.memory_space<vmem>>, vector<3x1024xf32>
    tpu.vector_store %arg5[%c39, %c0_44], %40 {strides = array<i32>} : memref<81x1024xf32, #tpu.memory_space<vmem>>, vector<3x1024xf32>,
    %c0_45 = arith.constant 0 : index
    %c0_46 = arith.constant 0 : index
    %c112 = arith.constant 112 : index
    %42 = vector.load %arg2[%c0_45, %c0_46, %c112] : memref<1x3x1280xf32, #tpu.memory_space<vmem>>, vector<1x3x1024xf32>
    %43 = vector.shape_cast %42 : vector<1x3x1024xf32> to vector<3x1024xf32>
    %c42 = arith.constant 42 : index
    %c0_47 = arith.constant 0 : index
    %44 = vector.load %arg5[%c42, %c0_47] : memref<81x1024xf32, #tpu.memory_space<vmem>>, vector<3x1024xf32>
    tpu.vector_store %arg5[%c42, %c0_47], %43 {strides = array<i32>} : memref<81x1024xf32, #tpu.memory_space<vmem>>, vector<3x1024xf32>,
    %c0_48 = arith.constant 0 : index
    %c0_49 = arith.constant 0 : index
    %c120 = arith.constant 120 : index
    %45 = vector.load %arg2[%c0_48, %c0_49, %c120] : memref<1x3x1280xf32, #tpu.memory_space<vmem>>, vector<1x3x1024xf32>
    %46 = vector.shape_cast %45 : vector<1x3x1024xf32> to vector<3x1024xf32>
    %c45 = arith.constant 45 : index
    %c0_50 = arith.constant 0 : index
    %47 = vector.load %arg5[%c45, %c0_50] : memref<81x1024xf32, #tpu.memory_space<vmem>>, vector<3x1024xf32>
    tpu.vector_store %arg5[%c45, %c0_50], %46 {strides = array<i32>} : memref<81x1024xf32, #tpu.memory_space<vmem>>, vector<3x1024xf32>,
    %c0_51 = arith.constant 0 : index
    %c0_52 = arith.constant 0 : index
    %c121 = arith.constant 121 : index
    %48 = vector.load %arg2[%c0_51, %c0_52, %c121] : memref<1x3x1280xf32, #tpu.memory_space<vmem>>, vector<1x3x1024xf32>
    %49 = vector.shape_cast %48 : vector<1x3x1024xf32> to vector<3x1024xf32>
    %c48 = arith.constant 48 : index
    %c0_53 = arith.constant 0 : index
    %50 = vector.load %arg5[%c48, %c0_53] : memref<81x1024xf32, #tpu.memory_space<vmem>>, vector<3x1024xf32>
    tpu.vector_store %arg5[%c48, %c0_53], %49 {strides = array<i32>} : memref<81x1024xf32, #tpu.memory_space<vmem>>, vector<3x1024xf32>,
    %c0_54 = arith.constant 0 : index
    %c0_55 = arith.constant 0 : index
    %c122 = arith.constant 122 : index
    %51 = vector.load %arg2[%c0_54, %c0_55, %c122] : memref<1x3x1280xf32, #tpu.memory_space<vmem>>, vector<1x3x1024xf32>
    %52 = vector.shape_cast %51 : vector<1x3x1024xf32> to vector<3x1024xf32>
    %c51 = arith.constant 51 : index
    %c0_56 = arith.constant 0 : index
    %53 = vector.load %arg5[%c51, %c0_56] : memref<81x1024xf32, #tpu.memory_space<vmem>>, vector<3x1024xf32>
    tpu.vector_store %arg5[%c51, %c0_56], %52 {strides = array<i32>} : memref<81x1024xf32, #tpu.memory_space<vmem>>, vector<3x1024xf32>,
    %c0_57 = arith.constant 0 : index
    %c0_58 = arith.constant 0 : index
    %c200 = arith.constant 200 : index
    %54 = vector.load %arg2[%c0_57, %c0_58, %c200] : memref<1x3x1280xf32, #tpu.memory_space<vmem>>, vector<1x3x1024xf32>
    %55 = vector.shape_cast %54 : vector<1x3x1024xf32> to vector<3x1024xf32>
    %c54 = arith.constant 54 : index
    %c0_59 = arith.constant 0 : index
    %56 = vector.load %arg5[%c54, %c0_59] : memref<81x1024xf32, #tpu.memory_space<vmem>>, vector<3x1024xf32>
    tpu.vector_store %arg5[%c54, %c0_59], %55 {strides = array<i32>} : memref<81x1024xf32, #tpu.memory_space<vmem>>, vector<3x1024xf32>,
    %c0_60 = arith.constant 0 : index
    %c0_61 = arith.constant 0 : index
    %c201 = arith.constant 201 : index
    %57 = vector.load %arg2[%c0_60, %c0_61, %c201] : memref<1x3x1280xf32, #tpu.memory_space<vmem>>, vector<1x3x1024xf32>
    %58 = vector.shape_cast %57 : vector<1x3x1024xf32> to vector<3x1024xf32>
    %c57 = arith.constant 57 : index
    %c0_62 = arith.constant 0 : index
    %59 = vector.load %arg5[%c57, %c0_62] : memref<81x1024xf32, #tpu.memory_space<vmem>>, vector<3x1024xf32>
    tpu.vector_store %arg5[%c57, %c0_62], %58 {strides = array<i32>} : memref<81x1024xf32, #tpu.memory_space<vmem>>, vector<3x1024xf32>,
    %c0_63 = arith.constant 0 : index
    %c0_64 = arith.constant 0 : index
    %c202 = arith.constant 202 : index
    %60 = vector.load %arg2[%c0_63, %c0_64, %c202] : memref<1x3x1280xf32, #tpu.memory_space<vmem>>, vector<1x3x1024xf32>
    %61 = vector.shape_cast %60 : vector<1x3x1024xf32> to vector<3x1024xf32>
    %c60 = arith.constant 60 : index
    %c0_65 = arith.constant 0 : index
    %62 = vector.load %arg5[%c60, %c0_65] : memref<81x1024xf32, #tpu.memory_space<vmem>>, vector<3x1024xf32>
    tpu.vector_store %arg5[%c60, %c0_65], %61 {strides = array<i32>} : memref<81x1024xf32, #tpu.memory_space<vmem>>, vector<3x1024xf32>,
    %c0_66 = arith.constant 0 : index
    %c0_67 = arith.constant 0 : index
    %c210 = arith.constant 210 : index
    %63 = vector.load %arg2[%c0_66, %c0_67, %c210] : memref<1x3x1280xf32, #tpu.memory_space<vmem>>, vector<1x3x1024xf32>
    %64 = vector.shape_cast %63 : vector<1x3x1024xf32> to vector<3x1024xf32>
    %c63 = arith.constant 63 : index
    %c0_68 = arith.constant 0 : index
    %65 = vector.load %arg5[%c63, %c0_68] : memref<81x1024xf32, #tpu.memory_space<vmem>>, vector<3x1024xf32>
    tpu.vector_store %arg5[%c63, %c0_68], %64 {strides = array<i32>} : memref<81x1024xf32, #tpu.memory_space<vmem>>, vector<3x1024xf32>,
    %c0_69 = arith.constant 0 : index
    %c0_70 = arith.constant 0 : index
    %c211 = arith.constant 211 : index
    %66 = vector.load %arg2[%c0_69, %c0_70, %c211] : memref<1x3x1280xf32, #tpu.memory_space<vmem>>, vector<1x3x1024xf32>
    %67 = vector.shape_cast %66 : vector<1x3x1024xf32> to vector<3x1024xf32>
    %c66 = arith.constant 66 : index
    %c0_71 = arith.constant 0 : index
    %68 = vector.load %arg5[%c66, %c0_71] : memref<81x1024xf32, #tpu.memory_space<vmem>>, vector<3x1024xf32>
    tpu.vector_store %arg5[%c66, %c0_71], %67 {strides = array<i32>} : memref<81x1024xf32, #tpu.memory_space<vmem>>, vector<3x1024xf32>,
    %c0_72 = arith.constant 0 : index
    %c0_73 = arith.constant 0 : index
    %c212 = arith.constant 212 : index
    %69 = vector.load %arg2[%c0_72, %c0_73, %c212] : memref<1x3x1280xf32, #tpu.memory_space<vmem>>, vector<1x3x1024xf32>
    %70 = vector.shape_cast %69 : vector<1x3x1024xf32> to vector<3x1024xf32>
    %c69 = arith.constant 69 : index
    %c0_74 = arith.constant 0 : index
    %71 = vector.load %arg5[%c69, %c0_74] : memref<81x1024xf32, #tpu.memory_space<vmem>>, vector<3x1024xf32>
    tpu.vector_store %arg5[%c69, %c0_74], %70 {strides = array<i32>} : memref<81x1024xf32, #tpu.memory_space<vmem>>, vector<3x1024xf32>,
    %c0_75 = arith.constant 0 : index
    %c0_76 = arith.constant 0 : index
    %c220 = arith.constant 220 : index
    %72 = vector.load %arg2[%c0_75, %c0_76, %c220] : memref<1x3x1280xf32, #tpu.memory_space<vmem>>, vector<1x3x1024xf32>
    %73 = vector.shape_cast %72 : vector<1x3x1024xf32> to vector<3x1024xf32>
    %c72 = arith.constant 72 : index
    %c0_77 = arith.constant 0 : index
    %74 = vector.load %arg5[%c72, %c0_77] : memref<81x1024xf32, #tpu.memory_space<vmem>>, vector<3x1024xf32>
    tpu.vector_store %arg5[%c72, %c0_77], %73 {strides = array<i32>} : memref<81x1024xf32, #tpu.memory_space<vmem>>, vector<3x1024xf32>,
    %c0_78 = arith.constant 0 : index
    %c0_79 = arith.constant 0 : index
    %c221 = arith.constant 221 : index
    %75 = vector.load %arg2[%c0_78, %c0_79, %c221] : memref<1x3x1280xf32, #tpu.memory_space<vmem>>, vector<1x3x1024xf32>
    %76 = vector.shape_cast %75 : vector<1x3x1024xf32> to vector<3x1024xf32>
    %c75 = arith.constant 75 : index
    %c0_80 = arith.constant 0 : index
    %77 = vector.load %arg5[%c75, %c0_80] : memref<81x1024xf32, #tpu.memory_space<vmem>>, vector<3x1024xf32>
    tpu.vector_store %arg5[%c75, %c0_80], %76 {strides = array<i32>} : memref<81x1024xf32, #tpu.memory_space<vmem>>, vector<3x1024xf32>,
    %c0_81 = arith.constant 0 : index
    %c0_82 = arith.constant 0 : index
    %c222 = arith.constant 222 : index
    %78 = vector.load %arg2[%c0_81, %c0_82, %c222] : memref<1x3x1280xf32, #tpu.memory_space<vmem>>, vector<1x3x1024xf32>
    %79 = vector.shape_cast %78 : vector<1x3x1024xf32> to vector<3x1024xf32>
    %c78 = arith.constant 78 : index
    %c0_83 = arith.constant 0 : index
    %80 = vector.load %arg5[%c78, %c0_83] : memref<81x1024xf32, #tpu.memory_space<vmem>>, vector<3x1024xf32>
    tpu.vector_store %arg5[%c78, %c0_83], %79 {strides = array<i32>} : memref<81x1024xf32, #tpu.memory_space<vmem>>, vector<3x1024xf32>,
    %c0_84 = arith.constant 0 : index
    %c0_85 = arith.constant 0 : index
    %81 = vector.load %arg1[%c0_84, %c0_85] : memref<16x81xf32, #tpu.memory_space<vmem>>, vector<16x81xf32>
    %c0_86 = arith.constant 0 : index
    %c0_87 = arith.constant 0 : index
    %82 = vector.load %arg5[%c0_86, %c0_87] : memref<81x1024xf32, #tpu.memory_space<vmem>>, vector<81x1024xf32>
    %cst = arith.constant dense<0.000000e+00> : vector<16x1024xf32>
    %83 = tpu.matmul %81, %82, %cst {dimension_numbers = #tpu.dot_dimension_numbers<[1], [0], [0], [1], [0, 0, 1, 1], [], []>} : vector<16x81xf32>, vector<81x1024xf32>, vector<16x1024xf32> -> vector<16x1024xf32>
    %c0_88 = arith.constant 0 : index
    %c0_89 = arith.constant 0 : index
    %84 = vector.load %arg3[%c0_88, %c0_89] : memref<16x2xf32, #tpu.memory_space<vmem>>, vector<16x1xf32>
    %85 = vector.broadcast %84 : vector<16x1xf32> to vector<16x1024xf32>
    %86 = arith.addf %83, %85 : vector<16x1024xf32>
    %87 = math.tanh %86 : vector<16x1024xf32>
    %c0_90 = arith.constant 0 : index
    %c1_91 = arith.constant 1 : index
    %88 = vector.load %arg3[%c0_90, %c1_91] : memref<16x2xf32, #tpu.memory_space<vmem>>, vector<16x1xf32>
    %89 = vector.broadcast %88 : vector<16x1xf32> to vector<16x1024xf32>
    %90 = arith.mulf %87, %89 : vector<16x1024xf32>
    %91 = arith.negf %90 : vector<16x1024xf32>
    %92 = math.exp %91 : vector<16x1024xf32>
    %cst_92 = arith.constant 1.000000e+00 : f32
    %93 = vector.broadcast %cst_92 : f32 to vector<16x1024xf32>
    %94 = arith.addf %93, %92 : vector<16x1024xf32>
    %95 = arith.divf %93, %94 : vector<16x1024xf32>
    %c0_93 = arith.constant 0 : index
    %c0_94 = arith.constant 0 : index
    %c0_95 = arith.constant 0 : index
    %96 = vector.load %arg4[%c0_93, %c0_94, %c0_95] : memref<1x16x1024xf32, #tpu.memory_space<vmem>>, vector<1x16x1024xf32>
    %97 = vector.shape_cast %96 : vector<1x16x1024xf32> to vector<16x1024xf32>
    %98 = vector.shape_cast %95 : vector<16x1024xf32> to vector<1x16x1024xf32>
    tpu.vector_store %arg4[%c0_93, %c0_94, %c0_95], %98 {strides = array<i32>} : memref<1x16x1024xf32, #tpu.memory_space<vmem>>, vector<1x16x1024xf32>,
    return
  }
  func.func @transform_0(%arg0: i32) -> (i32, i32) {
    %c0_i32 = arith.constant 0 : i32
    %c0_i32_0 = arith.constant 0 : i32
    %c0_i32_1 = arith.constant 0 : i32
    return %c0_i32, %c0_i32_0 : i32, i32
  }
  func.func @transform_1(%arg0: i32) -> (i32, i32, i32) {
    %c0_i32 = arith.constant 0 : i32
    %c0_i32_0 = arith.constant 0 : i32
    %c0_i32_1 = arith.constant 0 : i32
    return %arg0, %c0_i32, %c0_i32_0 : i32, i32, i32
  }
  func.func @transform_2(%arg0: i32) -> (i32, i32) {
    %c0_i32 = arith.constant 0 : i32
    %c0_i32_0 = arith.constant 0 : i32
    %c0_i32_1 = arith.constant 0 : i32
    return %c0_i32, %c0_i32_0 : i32, i32
  }
  func.func @transform_3(%arg0: i32) -> (i32, i32, i32) {
    %c0_i32 = arith.constant 0 : i32
    %c0_i32_0 = arith.constant 0 : i32
    %c0_i32_1 = arith.constant 0 : i32
    return %arg0, %c0_i32, %c0_i32_0 : i32, i32, i32
  }
}

</mosaic_0001>

<bundles_post_ra>
// kernel: model_forward.1
= control target key start
LH: loop header
LB: loop body
LE: loop exit
PB: predicated region body
PF: predicated region fallthrough
CT: control target
= control target key end

     0   :  { %s3014_s12 = smov 0   ;;  %s3929_s0 = inlined_call_operand.vmem [shape: f32[16,81], index: 0, kind: input, shape index: {}]   ;;  %s3930_s1 = inlined_call_operand.vmem [shape: f32[2,3,1280], index: 1, kind: input, shape index: {}]   ;;  %s3931_s2 = inlined_call_operand.vmem [shape: f32[16,2], index: 2, kind: input, shape index: {}]   ;;  %s3932_s3 = inlined_call_operand.vmem [shape: f32[2,16,1024], index: 3, kind: output, shape index: {}]  }
   0x1 LB: > { %s2565_s13 = sadd.s32 4294967295, %s2963_s12   ;;  %p2569_p0 = scmp.ge.s32.totalorder %s2963_s12, 1  ;;  %s2963_s12 = sphi %s3014_s12, %s13_s12  }
   0x2   : > { %p137_p1 = scmp.lt.s32.totalorder %s2963_s12, 3 }
   0x4   : > { %p138_p2 = pnand %p2569_p0, %p137_p1 }
   0x5   : > { %p161_p3 = scmp.lt.s32.totalorder (!%p138_p2), %s2565_s13, 1  ;;  %s2965_s18 = smov (!%p138_p2), 127   ;;  %vm236_vm0 = vcmask (!%p138_p2), 1039360   ;;  %vm302_vm1 = vcmask (!%p138_p2), 1031168   ;;  %vm376_vm2 = vcmask (!%p138_p2), 965632   ;;  %vm434_vm3 = vcmask (!%p138_p2), 957440  }
   0x6   : > { %141 = sbr.rel (%p138_p2) target bundleno = 875 (0x36b), region = 32  ;;  %s2966_s19 = smov (!%p138_p2), 126   ;;  %vm500_vm4 = vcmask (!%p138_p2), 949248   ;;  %vm574_vm5 = vcmask (!%p138_p2), 883712   ;;  %vm640_vm6 = vcmask (!%p138_p2), 875520   ;;  %vm697_vm7 = vcmask (!%p138_p2), 867328  }
   0x7   : > { %s2967_s20 = smov (!%p138_p2), 118   ;;  %s2968_s21 = smov (!%p138_p2), 117   ;;  %vm763_vm8 = vcmask (!%p138_p2), 228352   ;;  %vm829_vm9 = vcmask (!%p138_p2), 220160   ;;  %vm903_vm10 = vcmask (!%p138_p2), 211968   ;;  %vm961_vm11 = vcmask (!%p138_p2), 146432  }
   0x8   : > { %s2969_s22 = smov (!%p138_p2), 116   ;;  %s2970_s23 = smov (!%p138_p2), 108   ;;  %vm1027_vm12 = vcmask (!%p138_p2), 138240   ;;  %vm1101_vm13 = vcmask (!%p138_p2), 130048   ;;  %vm1167_vm14 = vcmask (!%p138_p2), 64512   ;;  %vm1224_vm15 = vcmask (!%p138_p2), 56320  }
   0x9   : > { %s2971_s24 = smov (!%p138_p2), 107   ;;  %s2972_s25 = smov (!%p138_p2), 106  }
   0xa   : > { %s2973_s26 = smov (!%p138_p2), 28   ;;  %s2974_s27 = smov (!%p138_p2), 27  }
   0xb   : > { %s2975_s28 = smov (!%p138_p2), 26   ;;  %s2976_s29 = smov (!%p138_p2), 18  }
   0xc   : > { %s2977_s30 = smov (!%p138_p2), 17   ;;  %s2978_s4 = smov (!%p138_p2), 16  }
   0xd   : > { %s3964_s13 = smov (!%p161_p3, %s2565_s13), 1  ;;  %s2979_s5 = smov 8  }
   0xe   : > { %s2688_s14 = smul.u32 40, %s3964_s13  ;;  %s2980_s6 = smov 7  }
   0xf   : > { %s2981_s7 = smov 6   ;;  %s2982_s8 = smov 56  }
  0x10   : > { %s3028_s17 = scalar_lea.vmem %s3930_s1, %s2688_s14  ;;  %s2983_s9 = smov 55  }
  0x11   : > { %v196_v0 = vld [vmem:[%s3028_s17 + $0x8] sm:$0x77]  ;;  %v195_v1 = vld [vmem:[%s3028_s17] sm:$0x77]  ;;  %v197_v2 = vld [vmem:[%s3028_s17 + $0x10] sm:$0x77] }
  0x12   : > { %v211_v3 = vrot.slane %v196_v0, 5  ;;  %v206_v4 = vcombine.high %v196_v0, %v196_v0  ;;  %v209_v5 = vrot.slane %v195_v1, 5  ;;  %v213_v7 = vrot.slane %v197_v2, 5  ;;  %v198_v9 = vld [vmem:[%s3028_s17 + $0x18] sm:$0x77]  ;;  %s2984_s10 = smov 54  }
  0x13   : > { %v207_v8 = vcombine.high %v197_v2, %v197_v2  ;;  %v205_v10 = vcombine.high %v195_v1, %v195_v1  ;;  %v215_v12 = vrot.slane %v198_v9, 5  ;;  %v208_v13 = vcombine.high %v198_v9, %v198_v9  ;;  %v261_v16 = vld [vmem:[%s3028_s17] sm:$0x77]  ;;  %v262_v21 = vld [vmem:[%s3028_s17 + $0x8] sm:$0x77]  ;;  %s2985_s11 = smov 46  }
  0x14   : > { %222 = vrot.lane.b32.xlu1 %v211_v3, %s2965_s18  ;;  %218 = vrot.lane.b32.xlu0 %v209_v5, %s2965_s18  ;;  %v212_v6 = vrot.slane %v206_v4, 5  ;;  %v199_v17 = vld [vmem:[%s3028_s17 + $0x20] sm:$0x7]  ;;  %v275_v18 = vrot.slane %v261_v16, 2  ;;  %v271_v20 = vcombine.high %v261_v16, %v261_v16  ;;  %v277_v22 = vrot.slane %v262_v21, 2  ;;  %s2986_s14 = smov 45  }
  0x15   : > { %v214_v11 = vrot.slane %v207_v8, 5  ;;  %v216_v14 = vrot.slane %v208_v13, 5  ;;  %v210_v15 = vrot.slane %v205_v10, 5  ;;  %v217_v19 = vrot.slane %v199_v17, 5  ;;  %v263_v25 = vld [vmem:[%s3028_s17 + $0x10] sm:$0x77] }
  0x16   : > { %v276_v23 = vrot.slane %v271_v20, 2  ;;  %v272_v24 = vcombine.high %v262_v21, %v262_v21  ;;  %v279_v26 = vrot.slane %v263_v25, 2  ;;  %v273_v28 = vcombine.high %v263_v25, %v263_v25  ;;  %v264_v29 = vld [vmem:[%s3028_s17 + $0x18] sm:$0x77]  ;;  %v265_v33 = vld [vmem:[%s3028_s17 + $0x20] sm:$0x7] }
  0x17   : > { %v281_v30 = vrot.slane %v264_v29, 2  ;;  %v274_v32 = vcombine.high %v264_v29, %v264_v29  ;;  %v335_v34 = vld [vmem:[%s3028_s17] sm:$0x77]  ;;  %v172_v37 = vld [vmem:[%s3028_s17 + $0x8] sm:$0x77]  ;;  %v283_v39 = vrot.slane %v265_v33, 2 }
  0x18   : > { %224 = vrot.lane.b32.xlu1 %v212_v6, %s2965_s18  ;;  %226 = vrot.lane.b32.xlu0 %v213_v7, %s2965_s18  ;;  %v278_v27 = vrot.slane %v272_v24, 2  ;;  %v280_v31 = vrot.slane %v273_v28, 2  ;;  %v171_v35 = vld [vmem:[%s3028_s17] sm:$0x77]  ;;  %v180_v38 = vcombine.high %v172_v37, %v172_v37  ;;  %189 = vst [vmem:[#allocation2 + $0x10] sm:$0x7] %v172_v37  ;;  %v345_v41 = vcombine.high %v335_v34, %v335_v34 }
  0x19   : > { %v179_v36 = vcombine.high %v171_v35, %v171_v35  ;;  %187 = vst [vmem:[#allocation2] sm:$0x7] %v171_v35  ;;  %v282_v40 = vrot.slane %v274_v32, 2  ;;  %v174_v42 = vld [vmem:[%s3028_s17 + $0x18] sm:$0x77]  ;;  %v349_v48 = vrot.slane %v335_v34, 7 }
  0x1a   : > { %v336_v43 = vld [vmem:[%s3028_s17 + $0x8] sm:$0x77]  ;;  %190 = vst [vmem:[#allocation2 + $0x18] sm:$0x7] %v180_v38  ;;  %v182_v44 = vcombine.high %v174_v42, %v174_v42  ;;  %193 = vst [vmem:[#allocation2 + $0x30] sm:$0x7] %v174_v42 }
  0x1b   : > { %188 = vst [vmem:[#allocation2 + $0x8] sm:$0x7] %v179_v36  ;;  %v173_v45 = vld [vmem:[%s3028_s17 + $0x10] sm:$0x77]  ;;  %v350_v47 = vrot.slane %v345_v41, 7  ;;  %v346_v49 = vcombine.high %v336_v43, %v336_v43  ;;  %v351_v52 = vrot.slane %v336_v43, 7 }
  0x1c   : > { %228 = vrot.lane.b32.xlu1 %v214_v11, %s2965_s18  ;;  %230 = vrot.lane.b32.xlu0 %v215_v12, %s2965_s18  ;;  %v181_v46 = vcombine.high %v173_v45, %v173_v45  ;;  %191 = vst [vmem:[#allocation2 + $0x20] sm:$0x7] %v173_v45  ;;  %194 = vst [vmem:[#allocation2 + $0x38] sm:$0x7] %v182_v44  ;;  %v337_v50 = vld [vmem:[%s3028_s17 + $0x10] sm:$0x77] }
  0x1d   : > { %v352_v51 = vrot.slane %v346_v49, 7  ;;  %v347_v53 = vcombine.high %v337_v50, %v337_v50  ;;  %v338_v54 = vld [vmem:[%s3028_s17 + $0x18] sm:$0x77]  ;;  %v353_v56 = vrot.slane %v337_v50, 7  ;;  %v401_v60 = vld [vmem:[%s3028_s17] sm:$0x77] }
  0x1e   : > { %192 = vst [vmem:[#allocation2 + $0x28] sm:$0x7] %v181_v46  ;;  %v348_v57 = vcombine.high %v338_v54, %v338_v54  ;;  %v355_v59 = vrot.slane %v338_v54, 7  ;;  %v339_v61 = vld [vmem:[%s3028_s17 + $0x20] sm:$0x7]  ;;  %v411_v62 = vcombine.low %v401_v60, %v401_v60  ;;  %s2987_s15 = smov 44  }
  0x1f   : > { %v354_v55 = vrot.slane %v347_v53, 7  ;;  %v357_v63 = vrot.slane %v339_v61, 7  ;;  %v402_v0 = vld [vmem:[%s3028_s17 + $0x8] sm:$0x77]  ;;  %v403_v2 = vld [vmem:[%s3028_s17 + $0x10] sm:$0x77] }
  0x20   : > { %232 = vrot.lane.b32.xlu1 %v216_v14, %s2965_s18  ;;  %220 = vrot.lane.b32.xlu0 %v210_v15, %s2965_s18  ;;  %v356_v58 = vrot.slane %v348_v57, 7  ;;  %v412_v1 = vcombine.low %v402_v0, %v402_v0  ;;  %v413_v3 = vcombine.low %v403_v2, %v403_v2  ;;  %v404_v4 = vld [vmem:[%s3028_s17 + $0x18] sm:$0x77]  ;;  %v459_v6 = vld [vmem:[%s3028_s17] sm:$0x77]  ;;  %s2988_s16 = smov 36  }
  0x21   : > { %v414_v5 = vcombine.low %v404_v4, %v404_v4  ;;  %v2746_v7 = vld [vmem:[%s3028_s17 + $0x20] ss:$0 sps:$4 sm:$0x77]   ;;  %v469_v8 = vcombine.high %v459_v6, %v459_v6  ;;  %v460_v9 = vld [vmem:[%s3028_s17 + $0x8] sm:$0x77]  ;;  %v473_v11 = vrot.slane %v459_v6, 1 }
  0x22   : > { %v470_v12 = vcombine.high %v460_v9, %v460_v9  ;;  %v461_v13 = vld [vmem:[%s3028_s17 + $0x10] sm:$0x77]  ;;  %v475_v15 = vrot.slane %v460_v9, 1  ;;  %v462_v17 = vld [vmem:[%s3028_s17 + $0x18] sm:$0x77] }
  0x23   : > { %v474_v10 = vrot.slane %v469_v8, 1  ;;  %v471_v16 = vcombine.high %v461_v13, %v461_v13  ;;  %v472_v20 = vcombine.high %v462_v17, %v462_v17  ;;  %v463_v24 = vld [vmem:[%s3028_s17 + $0x20] sm:$0x7]  ;;  %v534_v28 = vld [vmem:[%s3028_s17 + $0x8] sm:$0x77] }
  0x24   : > { %284 = vrot.lane.b32.xlu1 %v275_v18, %s2966_s19  ;;  %234 = vrot.lane.b32.xlu0 %v217_v19, %s2965_s18  ;;  %v476_v14 = vrot.slane %v470_v12, 1  ;;  %v477_v19 = vrot.slane %v461_v13, 1  ;;  %v549_v29 = vrot.slane %v534_v28, 6  ;;  %v535_v32 = vld [vmem:[%s3028_s17 + $0x10] sm:$0x77]  ;;  %s2989_s18 = smov 35  }
  0x25   : > { %v478_v18 = vrot.slane %v471_v16, 1  ;;  %v480_v21 = vrot.slane %v472_v20, 1  ;;  %v551_v33 = vrot.slane %v535_v32, 6  ;;  %v545_v35 = vcombine.high %v535_v32, %v535_v32  ;;  %v536_v36 = vld [vmem:[%s3028_s17 + $0x18] sm:$0x77] }
  0x26   : > { %v553_v37 = vrot.slane %v536_v36, 6  ;;  %v599_v41 = vld [vmem:[%s3028_s17] sm:$0x77]  ;;  %v600_v45 = vld [vmem:[%s3028_s17 + $0x8] sm:$0x77] }
  0x27   : > { %v552_v38 = vrot.slane %v545_v35, 6  ;;  %v609_v44 = vcombine.high %v599_v41, %v599_v41  ;;  %v615_v50 = vrot.slane %v600_v45, 3  ;;  %v723_v61 = vld [vmem:[%s3028_s17 + $0x8] sm:$0x77]  ;;  %v724_v13 = vld [vmem:[%s3028_s17 + $0x10] sm:$0x77] }
  0x28   : > { %288 = vrot.lane.b32.xlu1 %v277_v22, %s2966_s19  ;;  %286 = vrot.lane.b32.xlu0 %v276_v23, %s2966_s19  ;;  %v479_v22 = vrot.slane %v462_v17, 1  ;;  %v533_v23 = vld [vmem:[%s3028_s17] sm:$0x77] }
  0x29   : > { %v547_v25 = vrot.slane %v533_v23, 6  ;;  %v614_v46 = vrot.slane %v609_v44, 3 }
  0x2c   : > { %292 = vrot.lane.b32.xlu1 %v279_v26, %s2966_s19  ;;  %290 = vrot.lane.b32.xlu0 %v278_v27, %s2966_s19  ;;  %v481_v26 = vrot.slane %v463_v24, 1  ;;  %v543_v27 = vcombine.high %v533_v23, %v533_v23 }
  0x30   : > { %296 = vrot.lane.b32.xlu1 %v281_v30, %s2966_s19  ;;  %294 = vrot.lane.b32.xlu0 %v280_v31, %s2966_s19  ;;  %v548_v30 = vrot.slane %v543_v27, 6  ;;  %v544_v31 = vcombine.high %v534_v28, %v534_v28  ;;  %v790_v28 = vld [vmem:[%s3028_s17 + $0x10] sm:$0x77] }
  0x32   : > { %v550_v34 = vrot.slane %v544_v31, 6 }
  0x34   : > { %300 = vrot.lane.b32.xlu1 %v283_v39, %s2966_s19  ;;  %298 = vrot.lane.b32.xlu0 %v282_v40, %s2966_s19  ;;  %v546_v39 = vcombine.high %v536_v36, %v536_v36  ;;  %v537_v40 = vld [vmem:[%s3028_s17 + $0x20] sm:$0x7]  ;;  %s2990_s19 = smov 34  }
  0x35   : > { %v555_v42 = vrot.slane %v537_v40, 6 }
  0x36   : > { %v554_v43 = vrot.slane %v546_v39, 6 }
  0x38   : > { %360 = vrot.lane.b32.xlu1 %v350_v47, %s2967_s20  ;;  %358 = vrot.lane.b32.xlu0 %v349_v48, %s2967_s20  ;;  %v613_v47 = vrot.slane %v599_v41, 3  ;;  %v610_v48 = vcombine.high %v600_v45, %v600_v45 }
  0x3a   : > { %v616_v49 = vrot.slane %v610_v48, 3 }
  0x3c   : > { %364 = vrot.lane.b32.xlu1 %v352_v51, %s2967_s20  ;;  %362 = vrot.lane.b32.xlu0 %v351_v52, %s2967_s20  ;;  %v3078_v51 = vld [vmem:[%s3028_s17] sm:$0x77]  ;;  %v601_v52 = vld [vmem:[%s3028_s17 + $0x10] sm:$0x77] }
  0x3d   : > { %v675_v53 = vcombine.high %v3078_v51, %v3078_v51  ;;  %v617_v54 = vrot.slane %v601_v52, 3 }
  0x40   : > { %368 = vrot.lane.b32.xlu1 %v354_v55, %s2967_s20  ;;  %366 = vrot.lane.b32.xlu0 %v353_v56, %s2967_s20  ;;  %v666_v55 = vld [vmem:[%s3028_s17 + $0x8] sm:$0x77]  ;;  %v3087_v56 = vld [vmem:[%s3028_s17] sm:$0x77] }
  0x41   : > { %v736_v40 = vrot.slane %v3087_v56, 5 }
  0x44   : > { %372 = vrot.lane.b32.xlu1 %v356_v58, %s2967_s20  ;;  %370 = vrot.lane.b32.xlu0 %v355_v59, %s2967_s20  ;;  %v676_v59 = vcombine.high %v666_v55, %v666_v55 }
  0x48   : > { %416 = vrot.lane.b32.xlu1 %v411_v62, %s2968_s21  ;;  %374 = vrot.lane.b32.xlu0 %v357_v63, %s2967_s20 }
  0x4c   : > { %420 = vrot.lane.b32.xlu1 %v412_v1, %s2968_s21  ;;  %418 = vrot.lane.b32.xlu0 %v401_v60, %s2968_s21  ;;  %v732_v60 = vcombine.high %v3087_v56, %v3087_v56 }
  0x50   : > { %424 = vrot.lane.b32.xlu1 %v413_v3, %s2968_s21  ;;  %422 = vrot.lane.b32.xlu0 %v402_v0, %s2968_s21  ;;  %v733_v3 = vcombine.high %v723_v61, %v723_v61 }
  0x54   : > { %428 = vrot.lane.b32.xlu1 %v414_v5, %s2968_s21  ;;  %426 = vrot.lane.b32.xlu0 %v403_v2, %s2968_s21  ;;  %v737_v2 = vrot.slane %v732_v60, 5  ;;  %v3100_v5 = vld [vmem:[%s3028_s17] sm:$0x77] }
  0x55   : > { %v798_v12 = vcombine.high %v3100_v5, %v3100_v5  ;;  %v802_v39 = vrot.slane %v3100_v5, 2 }
  0x57   : > { %v803_v20 = vrot.slane %v798_v12, 2 }
  0x58   : > { %432 = vrot.lane.b32.xlu1 %v2746_v7, %s2968_s21  ;;  %430 = vrot.lane.b32.xlu0 %v404_v4, %s2968_s21  ;;  %v667_v4 = vld [vmem:[%s3028_s17 + $0x10] sm:$0x77] }
  0x5c   : > { %484 = vrot.lane.b32.xlu1 %v474_v10, %s2969_s22  ;;  %482 = vrot.lane.b32.xlu0 %v473_v11, %s2969_s22  ;;  %v739_v10 = vrot.slane %v733_v3, 5  ;;  %v738_v11 = vrot.slane %v723_v61, 5 }
  0x60   : > { %488 = vrot.lane.b32.xlu1 %v476_v14, %s2969_s22  ;;  %486 = vrot.lane.b32.xlu0 %v475_v15, %s2969_s22  ;;  %v789_v14 = vld [vmem:[%s3028_s17 + $0x8] sm:$0x77] }
  0x61   : > { %v804_v27 = vrot.slane %v789_v14, 2 }
  0x64   : > { %492 = vrot.lane.b32.xlu1 %v478_v18, %s2969_s22  ;;  %490 = vrot.lane.b32.xlu0 %v477_v19, %s2969_s22 }
  0x68   : > { %496 = vrot.lane.b32.xlu1 %v480_v21, %s2969_s22  ;;  %494 = vrot.lane.b32.xlu0 %v479_v22, %s2969_s22  ;;  %v740_v21 = vrot.slane %v724_v13, 5  ;;  %v799_v22 = vcombine.high %v789_v14, %v789_v14 }
  0x6c   : > { %556 = vrot.lane.b32.xlu1 %v547_v25, %s2970_s23  ;;  %498 = vrot.lane.b32.xlu0 %v481_v26, %s2969_s22  ;;  %v805_v26 = vrot.slane %v799_v22, 2 }
  0x70   : > { %560 = vrot.lane.b32.xlu1 %v549_v29, %s2970_s23  ;;  %558 = vrot.lane.b32.xlu0 %v548_v30, %s2970_s23 }
  0x74   : > { %564 = vrot.lane.b32.xlu1 %v551_v33, %s2970_s23  ;;  %562 = vrot.lane.b32.xlu0 %v550_v34, %s2970_s23  ;;  %v806_v33 = vrot.slane %v790_v28, 2  ;;  %v3124_v34 = vld [vmem:[%s3028_s17] sm:$0x77] }
  0x75   : > { %v872_v41 = vcombine.high %v3124_v34, %v3124_v34 }
  0x77   : > { %v877_v48 = vrot.slane %v872_v41, 7  ;;  %v1127_v41 = vld [vmem:[%s3028_s17 + $0x8] sm:$0x77] }
  0x78   : > { %568 = vrot.lane.b32.xlu1 %v553_v37, %s2970_s23  ;;  %566 = vrot.lane.b32.xlu0 %v552_v38, %s2970_s23 }
  0x7c   : > { %572 = vrot.lane.b32.xlu1 %v555_v42, %s2970_s23  ;;  %570 = vrot.lane.b32.xlu0 %v554_v43, %s2970_s23  ;;  %v863_v42 = vld [vmem:[%s3028_s17 + $0x8] sm:$0x77] }
  0x80   : > { %624 = vrot.lane.b32.xlu1 %v614_v46, %s2971_s24  ;;  %622 = vrot.lane.b32.xlu0 %v613_v47, %s2971_s24  ;;  %v878_v47 = vrot.slane %v863_v42, 7 }
  0x84   : > { %628 = vrot.lane.b32.xlu1 %v616_v49, %s2971_s24  ;;  %626 = vrot.lane.b32.xlu0 %v615_v50, %s2971_s24  ;;  %v873_v49 = vcombine.high %v863_v42, %v863_v42  ;;  %v864_v50 = vld [vmem:[%s3028_s17 + $0x10] sm:$0x77] }
  0x86   : > { %v223_v57 = vpop.permute.xlu1 %222  ;;  %v219_v58 = vpop.permute.xlu0 %218  ;;  %v879_v56 = vrot.slane %v873_v49, 7  ;;  %v1128_v49 = vld [vmem:[%s3028_s17 + $0x10] sm:$0x77] }
  0x88   : > { %681 = vrot.lane.b32.xlu1 %v675_v53, %s2972_s25  ;;  %630 = vrot.lane.b32.xlu0 %v617_v54, %s2971_s24 }
  0x8a   : > { %v225_v62 = vpop.permute.xlu1 %224  ;;  %v227_v63 = vpop.permute.xlu0 %226 }
  0x8b   : > { %v239_v0 = vsel %vm236_vm0, %v223_v57, %v225_v62  ;;  %v240_v1 = vsel %vm236_vm0, %v225_v62, %v227_v63  ;;  %v3150_v62 = vld [vmem:[%s3028_s17] sm:$0x77] }
  0x8c   : > { %255 = vst [vmem:[#allocation2 + $0x10] sm:$0x38] %v239_v0  ;;  %256 = vst [vmem:[#allocation2 + $0x18] sm:$0x38] %v240_v1  ;;  %685 = vrot.lane.b32.xlu1 %v676_v59, %s2972_s25  ;;  %683 = vrot.lane.b32.xlu0 %v666_v55, %s2972_s25  ;;  %v880_v55 = vrot.slane %v864_v50, 7 }
  0x8d   : > { %v3154_v0 = vld [vmem:[%s3028_s17] sm:$0x77] }
  0x8e   : > { %v229_v6 = vpop.permute.xlu1 %228  ;;  %v231_v7 = vpop.permute.xlu0 %230 }
  0x8f   : > { %v241_v8 = vsel %vm236_vm0, %v227_v63, %v229_v6  ;;  %v242_v9 = vsel %vm236_vm0, %v229_v6, %v231_v7  ;;  %v930_v63 = vld [vmem:[%s3028_s17 + $0x10] sm:$0x77]  ;;  %v996_v6 = vcombine.high %v3154_v0, %v3154_v0 }
  0x90   : > { %257 = vst [vmem:[#allocation2 + $0x20] sm:$0x38] %v241_v8  ;;  %258 = vst [vmem:[#allocation2 + $0x28] sm:$0x38] %v242_v9  ;;  %747 = vrot.lane.b32.xlu1 %v737_v2, %s2973_s26  ;;  %687 = vrot.lane.b32.xlu0 %v667_v4, %s2972_s25  ;;  %v940_v5 = vcombine.low %v930_v63, %v930_v63 }
  0x91   : > { %v1001_v13 = vrot.slane %v996_v6, 1 }
  0x92   : > { %v233_v15 = vpop.permute.xlu1 %232  ;;  %v221_v16 = vpop.permute.xlu0 %220 }
  0x93   : > { %v243_v17 = vsel %vm236_vm0, %v231_v7, %v233_v15  ;;  %v237_v18 = vsel %vm236_vm0, %v219_v58, %v221_v16  ;;  %v238_v19 = vsel %vm236_vm0, %v221_v16, %v223_v57  ;;  %v929_v57 = vld [vmem:[%s3028_s17 + $0x8] sm:$0x77]  ;;  %v3170_v16 = vld [vmem:[%s3028_s17] sm:$0x77] }
  0x94   : > { %259 = vst [vmem:[#allocation2 + $0x30] sm:$0x38] %v243_v17  ;;  %253 = vst [vmem:[#allocation2] sm:$0x38] %v237_v18  ;;  %751 = vrot.lane.b32.xlu1 %v739_v10, %s2973_s26  ;;  %749 = vrot.lane.b32.xlu0 %v738_v11, %s2973_s26  ;;  %v939_v61 = vcombine.low %v929_v57, %v929_v57  ;;  %v987_v7 = vld [vmem:[%s3028_s17 + $0x8] sm:$0x77] }
  0x95   : > { %254 = vst [vmem:[#allocation2 + $0x8] sm:$0x38] %v238_v19  ;;  %v1002_v12 = vrot.slane %v987_v7, 1  ;;  %v997_v14 = vcombine.high %v987_v7, %v987_v7 }
  0x96   : > { %v285_v23 = vpop.permute.xlu1 %284  ;;  %v235_v24 = vpop.permute.xlu0 %234 }
  0x97   : > { %v244_v25 = vsel %vm236_vm0, %v233_v15, %v235_v24  ;;  %v988_v15 = vld [vmem:[%s3028_s17 + $0x10] sm:$0x77]  ;;  %v1003_v22 = vrot.slane %v997_v14, 1  ;;  %v1061_v24 = vld [vmem:[%s3028_s17 + $0x8] sm:$0x77]  ;;  %vm1290_vm0 = vcmask 48128  }
  0x98   : > { %260 = vst [vmem:[#allocation2 + $0x38] sm:$0x38] %v244_v25  ;;  %813 = vrot.lane.b32.xlu1 %v803_v20, %s2974_s27  ;;  %753 = vrot.lane.b32.xlu0 %v740_v21, %s2973_s26  ;;  %v1004_v21 = vrot.slane %v988_v15, 1  ;;  %v1076_v28 = vrot.slane %v1061_v24, 6 }
  0x9a   : > { %v289_v29 = vpop.permute.xlu1 %288  ;;  %v287_v30 = vpop.permute.xlu0 %286 }
  0x9b   : > { %v303_v31 = vsel %vm302_vm1, %v285_v23, %v287_v30  ;;  %v304_v32 = vsel %vm302_vm1, %v287_v30, %v289_v29  ;;  %v1070_v23 = vcombine.high %v3170_v16, %v3170_v16  ;;  %v1071_v30 = vcombine.high %v1061_v24, %v1061_v24 }
  0x9c   : > { %319 = vst [vmem:[#allocation2 + $0x40] ss:$-60 sps:$4 sm:$0xc1] %v303_v31   ;;  %320 = vst [vmem:[#allocation2 + $0x48] ss:$-60 sps:$4 sm:$0xc1] %v304_v32   ;;  %817 = vrot.lane.b32.xlu1 %v805_v26, %s2974_s27  ;;  %815 = vrot.lane.b32.xlu0 %v804_v27, %s2974_s27 }
  0x9d   : > { %v1062_v31 = vld [vmem:[%s3028_s17 + $0x10] sm:$0x77]  ;;  %v3184_v32 = vld [vmem:[%s3028_s17] sm:$0x77] }
  0x9e   : > { %v293_v35 = vpop.permute.xlu1 %292  ;;  %v291_v36 = vpop.permute.xlu0 %290 }
  0x9f   : > { %v305_v37 = vsel %vm302_vm1, %v289_v29, %v291_v36  ;;  %v306_v38 = vsel %vm302_vm1, %v291_v36, %v293_v35  ;;  %v1075_v29 = vrot.slane %v1070_v23, 6 }
  0xa0   : > { %321 = vst [vmem:[#allocation2 + $0x50] ss:$-60 sps:$4 sm:$0xc1] %v305_v37   ;;  %322 = vst [vmem:[#allocation2 + $0x58] ss:$-60 sps:$4 sm:$0xc1] %v306_v38   ;;  %679 = vrot.lane.b32.xlu1 %v3078_v51, %s2972_s25  ;;  %819 = vrot.lane.b32.xlu0 %v806_v33, %s2974_s27 }
  0xa1   : > { %v1078_v38 = vrot.slane %v1062_v31, 6  ;;  %v3241_v31 = vld [vmem:[%s3028_s17 + $0x4] sm:$0x77] }
  0xa2   : > { %v297_v43 = vpop.permute.xlu1 %296  ;;  %v295_v44 = vpop.permute.xlu0 %294 }
  0xa3   : > { %v307_v45 = vsel %vm302_vm1, %v293_v35, %v295_v44  ;;  %v308_v46 = vsel %vm302_vm1, %v295_v44, %v297_v43  ;;  %v1919_v23 = vld [vmem:[#allocation2 + $0x8] sm:$0xff] }
  0xa4   : > { %323 = vst [vmem:[#allocation2 + $0x60] ss:$-60 sps:$4 sm:$0xc1] %v307_v45   ;;  %324 = vst [vmem:[#allocation2 + $0x68] ss:$-60 sps:$4 sm:$0xc1] %v308_v46   ;;  %811 = vrot.lane.b32.xlu1 %v802_v39, %s2974_s27  ;;  %745 = vrot.lane.b32.xlu0 %v736_v40, %s2973_s26  ;;  %v1136_v40 = vcombine.high %v3184_v32, %v3184_v32 }
  0xa5   : > { %v1077_v39 = vrot.slane %v1071_v30, 6  ;;  %v1142_v46 = vrot.slane %v1127_v41, 3  ;;  %v1194_v30 = vld [vmem:[%s3028_s17 + $0x10] sm:$0x77] }
  0xa6   : > { %v301_v51 = vpop.permute.xlu1 %300  ;;  %v299_v52 = vpop.permute.xlu0 %298 }
  0xa7   : > { %v309_v53 = vsel %vm302_vm1, %v297_v43, %v299_v52  ;;  %v310_v54 = vsel %vm302_vm1, %v299_v52, %v301_v51  ;;  %vm3936_vm1 = vcmask 457728  }
  0xa8   : > { %325 = vst [vmem:[#allocation2 + $0x70] ss:$-60 sps:$4 sm:$0xc1] %v309_v53   ;;  %326 = vst [vmem:[#allocation2 + $0x78] ss:$-60 sps:$4 sm:$0xc1] %v310_v54   ;;  %889 = vrot.lane.b32.xlu1 %v878_v47, %s2975_s28  ;;  %887 = vrot.lane.b32.xlu0 %v877_v48, %s2975_s28  ;;  %v1137_v48 = vcombine.high %v1127_v41, %v1127_v41 }
  0xa9   : > { %v1141_v47 = vrot.slane %v1136_v40, 3  ;;  %v1144_v54 = vrot.slane %v1128_v49, 3  ;;  %v1920_v40 = vld [vmem:[#allocation2 + $0x10] sm:$0xff] }
  0xaa   : > { %v361_v58 = vpop.permute.xlu1 %360  ;;  %v359_v59 = vpop.permute.xlu0 %358 }
  0xab   : > { %v377_v60 = vsel %vm376_vm2, %v359_v59, %v361_v58 }
  0xac   : > { %393 = vst [vmem:[#allocation2 + $0x40] sm:$0xe] %v377_v60  ;;  %893 = vrot.lane.b32.xlu1 %v880_v55, %s2975_s28  ;;  %891 = vrot.lane.b32.xlu0 %v879_v56, %s2975_s28  ;;  %v1143_v55 = vrot.slane %v1137_v48, 3  ;;  %v938_v60 = vcombine.low %v3150_v62, %v3150_v62 }
  0xae   : > { %v365_v1 = vpop.permute.xlu1 %364  ;;  %v363_v2 = vpop.permute.xlu0 %362 }
  0xaf   : > { %v378_v3 = vsel %vm376_vm2, %v361_v58, %v363_v2  ;;  %v379_v4 = vsel %vm376_vm2, %v363_v2, %v365_v1 }
  0xb0   : > { %394 = vst [vmem:[#allocation2 + $0x48] sm:$0xe] %v378_v3  ;;  %395 = vst [vmem:[#allocation2 + $0x50] sm:$0xe] %v379_v4  ;;  %947 = vrot.lane.b32.xlu1 %v939_v61, %s2976_s29  ;;  %945 = vrot.lane.b32.xlu0 %v3150_v62, %s2976_s29  ;;  %v876_v61 = vrot.slane %v3124_v34, 7  ;;  %v1074_v62 = vrot.slane %v3170_v16, 6 }
  0xb1   : > { %v1000_v3 = vrot.slane %v3154_v0, 1  ;;  %v3215_v4 = vld [vmem:[%s3028_s17] sm:$0x77] }
  0xb2   : > { %v369_v8 = vpop.permute.xlu1 %368  ;;  %v367_v9 = vpop.permute.xlu0 %366  ;;  %v1202_v0 = vcombine.high %v3215_v4, %v3215_v4 }
  0xb3   : > { %v380_v10 = vsel %vm376_vm2, %v365_v1, %v367_v9  ;;  %v381_v11 = vsel %vm376_vm2, %v367_v9, %v369_v8  ;;  %v1193_v9 = vld [vmem:[%s3028_s17 + $0x8] sm:$0x77] }
  0xb4   : > { %396 = vst [vmem:[#allocation2 + $0x58] sm:$0xe] %v380_v10  ;;  %397 = vst [vmem:[#allocation2 + $0x60] sm:$0xe] %v381_v11  ;;  %951 = vrot.lane.b32.xlu1 %v940_v5, %s2976_s29  ;;  %949 = vrot.lane.b32.xlu0 %v929_v57, %s2976_s29  ;;  %v3226_v10 = vld [vmem:[%s3028_s17] sm:$0x77]  ;;  %v1203_v15 = vcombine.high %v1193_v9, %v1193_v9 }
  0xb5   : > { %v1259_v16 = vcombine.high %v3226_v10, %v3226_v10 }
  0xb6   : > { %v373_v17 = vpop.permute.xlu1 %372  ;;  %v371_v18 = vpop.permute.xlu0 %370 }
  0xb7   : > { %v382_v19 = vsel %vm376_vm2, %v369_v8, %v371_v18  ;;  %v383_v20 = vsel %vm376_vm2, %v371_v18, %v373_v17  ;;  %v1140_v8 = vrot.slane %v3184_v32, 3 }
  0xb8   : > { %398 = vst [vmem:[#allocation2 + $0x68] sm:$0xe] %v382_v19  ;;  %399 = vst [vmem:[#allocation2 + $0x70] sm:$0xe] %v383_v20  ;;  %1013 = vrot.lane.b32.xlu1 %v1002_v12, %s2977_s30  ;;  %1011 = vrot.lane.b32.xlu0 %v1001_v13, %s2977_s30 }
  0xba   : > { %v417_v25 = vpop.permute.xlu1 %416  ;;  %v375_v26 = vpop.permute.xlu0 %374 }
  0xbb   : > { %v384_v27 = vsel %vm376_vm2, %v373_v17, %v375_v26  ;;  %v1250_v17 = vld [vmem:[%s3028_s17 + $0x8] sm:$0x77]  ;;  %v1918_v26 = vld [vmem:[#allocation2] sm:$0xff]  ;;  %vm3935_vm2 = vcmask 449536  }
  0xbc   : > { %400 = vst [vmem:[#allocation2 + $0x78] sm:$0xe] %v384_v27  ;;  %1017 = vrot.lane.b32.xlu1 %v1004_v21, %s2977_s30  ;;  %1015 = vrot.lane.b32.xlu0 %v1003_v22, %s2977_s30  ;;  %v1264_v27 = vrot.slane %v1259_v16, 5 }
  0xbe   : > { %v421_v33 = vpop.permute.xlu1 %420  ;;  %v419_v35 = vpop.permute.xlu0 %418 }
  0xbf   : > { %v435_v36 = vsel %vm434_vm3, %v417_v25, %v419_v35  ;;  %v436_v37 = vsel %vm434_vm3, %v419_v35, %v421_v33 }
  0xc0   : > { %451 = vst [vmem:[#allocation2 + $0x40] sm:$0x70] %v435_v36  ;;  %452 = vst [vmem:[#allocation2 + $0x48] sm:$0x70] %v436_v37  ;;  %1087 = vrot.lane.b32.xlu1 %v1076_v28, %s2978_s4  ;;  %1085 = vrot.lane.b32.xlu0 %v1075_v29, %s2978_s4  ;;  %v1260_v28 = vcombine.high %v1250_v17, %v1250_v17  ;;  %v1921_v37 = vld [vmem:[#allocation2 + $0x18] sm:$0xff] }
  0xc2   : > { %v425_v42 = vpop.permute.xlu1 %424  ;;  %v423_v43 = vpop.permute.xlu0 %422  ;;  %v1266_v41 = vrot.slane %v1260_v28, 5  ;;  %v1457_v28 = vld [vmem:[%s3028_s17 + $0x14] sm:$0x77] }
  0xc3   : > { %v437_v44 = vsel %vm434_vm3, %v421_v33, %v423_v43  ;;  %v438_v45 = vsel %vm434_vm3, %v423_v43, %v425_v42  ;;  %v1325_v43 = vcombine.high %v3241_v31, %v3241_v31 }
  0xc4   : > { %453 = vst [vmem:[#allocation2 + $0x50] sm:$0x70] %v437_v44  ;;  %454 = vst [vmem:[#allocation2 + $0x58] sm:$0x70] %v438_v45  ;;  %1091 = vrot.lane.b32.xlu1 %v1078_v38, %s2978_s4  ;;  %1089 = vrot.lane.b32.xlu0 %v1077_v39, %s2978_s4  ;;  %v1251_v45 = vld [vmem:[%s3028_s17 + $0x10] sm:$0x77] }
  0xc6   : > { %v429_v50 = vpop.permute.xlu1 %428  ;;  %v427_v51 = vpop.permute.xlu0 %426 }
  0xc7   : > { %v439_v52 = vsel %vm434_vm3, %v425_v42, %v427_v51  ;;  %v440_v53 = vsel %vm434_vm3, %v427_v51, %v429_v50  ;;  %v1265_v42 = vrot.slane %v1250_v17, 5  ;;  %v1330_v51 = vrot.slane %v1325_v43, 2 }
  0xc8   : > { %455 = vst [vmem:[#allocation2 + $0x60] sm:$0x70] %v439_v52  ;;  %456 = vst [vmem:[#allocation2 + $0x68] sm:$0x70] %v440_v53  ;;  %1153 = vrot.lane.b32.xlu1 %v1142_v46, %s2979_s5  ;;  %1151 = vrot.lane.b32.xlu0 %v1141_v47, %s2979_s5  ;;  %v1316_v46 = vld [vmem:[%s3028_s17 + $0xc] sm:$0x77] }
  0xc9   : > { %v1267_v52 = vrot.slane %v1251_v45, 5  ;;  %v1326_v53 = vcombine.high %v1316_v46, %v1316_v46 }
  0xca   : > { %v433_v56 = vpop.permute.xlu1 %432  ;;  %v431_v57 = vpop.permute.xlu0 %430 }
  0xcb   : > { %v441_v58 = vsel %vm434_vm3, %v429_v50, %v431_v57  ;;  %v442_v59 = vsel %vm434_vm3, %v431_v57, %v433_v56  ;;  %vm3934_vm3 = vcmask 441344  }
  0xcc   : > { %457 = vst [vmem:[#allocation2 + $0x70] sm:$0x70] %v441_v58  ;;  %458 = vst [vmem:[#allocation2 + $0x78] sm:$0x70] %v442_v59  ;;  %1157 = vrot.lane.b32.xlu1 %v1144_v54, %s2979_s5  ;;  %1155 = vrot.lane.b32.xlu0 %v1143_v55, %s2979_s5  ;;  %v3255_v54 = vld [vmem:[%s3028_s17 + $0x4] sm:$0x77] }
  0xcd   : > { %v1332_v59 = vrot.slane %v1326_v53, 2  ;;  %v1329_v53 = vrot.slane %v3241_v31, 2  ;;  %v1588_v31 = vld [vmem:[%s3028_s17 + $0xc] sm:$0x77] }
  0xce   : > { %v485_v63 = vpop.permute.xlu1 %484  ;;  %v483_v1 = vpop.permute.xlu0 %482 }
  0xcf   : > { %v501_v2 = vsel %vm500_vm4, %v483_v1, %v485_v63  ;;  %v1390_v1 = vld [vmem:[%s3028_s17 + $0xc] sm:$0x77] }
  0xd0   : > { %517 = vst [vmem:[#allocation2 + $0x80] ss:$-60 sps:$4 sm:$0x83] %v501_v2   ;;  %943 = vrot.lane.b32.xlu1 %v938_v60, %s2976_s29  ;;  %885 = vrot.lane.b32.xlu0 %v876_v61, %s2975_s28  ;;  %v1331_v60 = vrot.slane %v1316_v46, 2  ;;  %v1399_v61 = vcombine.high %v3255_v54, %v3255_v54 }
  0xd2   : > { %v489_v5 = vpop.permute.xlu1 %488  ;;  %v487_v6 = vpop.permute.xlu0 %486 }
  0xd3   : > { %v502_v34 = vsel %vm500_vm4, %v485_v63, %v487_v6  ;;  %v503_v7 = vsel %vm500_vm4, %v487_v6, %v489_v5  ;;  %v1317_v63 = vld [vmem:[%s3028_s17 + $0x14] sm:$0x77]  ;;  %v1404_v6 = vrot.slane %v1399_v61, 7 }
  0xd4   : > { %518 = vst [vmem:[#allocation2 + $0x88] ss:$-60 sps:$4 sm:$0x83] %v502_v34   ;;  %519 = vst [vmem:[#allocation2 + $0x90] ss:$-60 sps:$4 sm:$0x83] %v503_v7   ;;  %1083 = vrot.lane.b32.xlu1 %v1074_v62, %s2978_s4  ;;  %1009 = vrot.lane.b32.xlu0 %v1000_v3, %s2977_s30  ;;  %v1400_v7 = vcombine.high %v1390_v1, %v1390_v1 }
  0xd5   : > { %v1333_v34 = vrot.slane %v1317_v63, 2 }
  0xd6   : > { %v493_v11 = vpop.permute.xlu1 %492  ;;  %v491_v12 = vpop.permute.xlu0 %490 }
  0xd7   : > { %v504_v13 = vsel %vm500_vm4, %v489_v5, %v491_v12  ;;  %v505_v14 = vsel %vm500_vm4, %v491_v12, %v493_v11  ;;  %v1926_v20 = vld [vmem:[#allocation2 + $0x40] sm:$0xff]  ;;  %v1406_v12 = vrot.slane %v1400_v7, 7 }
  0xd8   : > { %520 = vst [vmem:[#allocation2 + $0x98] ss:$-60 sps:$4 sm:$0x83] %v504_v13   ;;  %521 = vst [vmem:[#allocation2 + $0xa0] ss:$-60 sps:$4 sm:$0x83] %v505_v14   ;;  %1208 = vrot.lane.b32.xlu1 %v1202_v0, %s2980_s6  ;;  %1149 = vrot.lane.b32.xlu0 %v1140_v8, %s2979_s5  ;;  %v2610_v29 = vpack.c.bf16 %v1926_v20, %v1918_v26 }
  0xd9   : > { %v1405_v13 = vrot.slane %v1390_v1, 7  ;;  %v1391_v14 = vld [vmem:[%s3028_s17 + $0x14] sm:$0x77]  ;;  %v1456_v20 = vld [vmem:[%s3028_s17 + $0xc] sm:$0x77] }
  0xda   : > { %v497_v18 = vpop.permute.xlu1 %496  ;;  %v495_v19 = vpop.permute.xlu0 %494  ;;  %v1466_v26 = vcombine.low %v1456_v20, %v1456_v20 }
  0xdb   : > { %v506_v21 = vsel %vm500_vm4, %v493_v11, %v495_v19  ;;  %v507_v22 = vsel %vm500_vm4, %v495_v19, %v497_v18  ;;  %v1927_v24 = vld [vmem:[#allocation2 + $0x48] sm:$0xff]  ;;  %v1928_v35 = vld [vmem:[#allocation2 + $0x50] sm:$0xff]  ;;  %v1407_v19 = vrot.slane %v1391_v14, 7 }
  0xdc   : > { %522 = vst [vmem:[#allocation2 + $0xa8] ss:$-60 sps:$4 sm:$0x83] %v506_v21   ;;  %523 = vst [vmem:[#allocation2 + $0xb0] ss:$-60 sps:$4 sm:$0x83] %v507_v22   ;;  %1212 = vrot.lane.b32.xlu1 %v1203_v15, %s2980_s6  ;;  %1210 = vrot.lane.b32.xlu0 %v1193_v9, %s2980_s6  ;;  %v2608_v25 = vpack.c.bf16 %v1927_v24, %v1919_v23  ;;  %v2630_v44 = vpack.c.bf16 %v1928_v35, %v1920_v40 }
  0xdd   : > { %v3282_v21 = vld [vmem:[%s3028_s17 + $0x4] sm:$0x77] }
  0xde   : > { %v557_v32 = vpop.permute.xlu1 %556  ;;  %v499_v33 = vpop.permute.xlu0 %498  ;;  %2609 = vmatprep.subr.bf16.mxu0 %v2608_v25 }
  0xdf   : > { %v508_v36 = vsel %vm500_vm4, %v497_v18, %v499_v33  ;;  %2611 = vmatpush1.bf16.msra.mxu0 %v2610_v29  ;;  %v1929_v38 = vld [vmem:[#allocation2 + $0x58] sm:$0xff]  ;;  %v3278_v18 = vld [vmem:[%s3028_s17 + $0x4] sm:$0x77]  ;;  %v1514_v29 = vld [vmem:[%s3028_s17 + $0xc] sm:$0x77]  ;;  %vm3933_vm4 = vcmask 375808  }
  0xe0   : > { %524 = vst [vmem:[#allocation2 + $0xb8] ss:$-60 sps:$4 sm:$0x83] %v508_v36   ;;  %1274 = vrot.lane.b32.xlu1 %v1264_v27, %s2981_s7  ;;  %1214 = vrot.lane.b32.xlu0 %v1194_v30, %s2980_s6  ;;  %v2628_v39 = vpack.c.bf16 %v1929_v38, %v1921_v37  ;;  %v1523_v27 = vcombine.high %v3282_v21, %v3282_v21  ;;  %v1529_v43 = vrot.slane %v1514_v29, 1 }
  0xe1   : > { %v1467_v36 = vcombine.low %v1457_v28, %v1457_v28  ;;  %v1524_v37 = vcombine.high %v1514_v29, %v1514_v29 }
  0xe2   : > { %v561_v47 = vpop.permute.xlu1 %560  ;;  %v559_v48 = vpop.permute.xlu0 %558  ;;  %2629 = vmatprep.subr.bf16.mxu1 %v2628_v39  ;;  %v1528_v35 = vrot.slane %v1523_v27, 1 }
  0xe3   : > { %v575_v49 = vsel %vm574_vm5, %v557_v32, %v559_v48  ;;  %v576_v50 = vsel %vm574_vm5, %v559_v48, %v561_v47  ;;  %2631 = vmatpush1.bf16.msra.mxu1 %v2630_v44  ;;  %v1515_v44 = vld [vmem:[%s3028_s17 + $0x14] sm:$0x77] }
  0xe4   : > { %591 = vst [vmem:[#allocation2 + $0x80] sm:$0x1c] %v575_v49  ;;  %592 = vst [vmem:[#allocation2 + $0x88] sm:$0x1c] %v576_v50  ;;  %1278 = vrot.lane.b32.xlu1 %v1266_v41, %s2981_s7  ;;  %1276 = vrot.lane.b32.xlu0 %v1265_v42, %s2981_s7  ;;  %v1530_v42 = vrot.slane %v1524_v37, 1  ;;  %v1531_v48 = vrot.slane %v1515_v44, 1 }
  0xe6   : > { %v565_v55 = vpop.permute.xlu1 %564  ;;  %v563_v56 = vpop.permute.xlu0 %562 }
  0xe7   : > { %v577_v57 = vsel %vm574_vm5, %v561_v47, %v563_v56  ;;  %v578_v58 = vsel %vm574_vm5, %v563_v56, %v565_v55  ;;  %v3321_v56 = vld [vmem:[%s3028_s17 + $0x4] sm:$0x77] }
  0xe8   : > { %593 = vst [vmem:[#allocation2 + $0x90] sm:$0x1c] %v577_v57  ;;  %594 = vst [vmem:[#allocation2 + $0x98] sm:$0x1c] %v578_v58  ;;  %1340 = vrot.lane.b32.xlu1 %v1330_v51, %s2982_s8  ;;  %1280 = vrot.lane.b32.xlu0 %v1267_v52, %s2981_s7 }
  0xea   : > { %v569_v2 = vpop.permute.xlu1 %568  ;;  %v567_v62 = vpop.permute.xlu0 %566 }
  0xeb   : > { %v579_v3 = vsel %vm574_vm5, %v565_v55, %v567_v62  ;;  %v580_v5 = vsel %vm574_vm5, %v567_v62, %v569_v2  ;;  %v1263_v55 = vrot.slane %v3226_v10, 5  ;;  %v1597_v10 = vcombine.high %v3321_v56, %v3321_v56 }
  0xec   : > { %595 = vst [vmem:[#allocation2 + $0xa0] sm:$0x1c] %v579_v3  ;;  %596 = vst [vmem:[#allocation2 + $0xa8] sm:$0x1c] %v580_v5  ;;  %1344 = vrot.lane.b32.xlu1 %v1332_v59, %s2982_s8  ;;  %1342 = vrot.lane.b32.xlu0 %v1331_v60, %s2982_s8  ;;  %v1465_v60 = vcombine.low %v3278_v18, %v3278_v18  ;;  %v1598_v3 = vcombine.high %v1588_v31, %v1588_v31  ;;  %v3341_v5 = vld [vmem:[%s3028_s17 + $0x4] sm:$0x77] }
  0xed   : > { %v1602_v62 = vrot.slane %v1597_v10, 6 }
  0xee   : > { %v573_v8 = vpop.permute.xlu1 %572  ;;  %v571_v0 = vpop.permute.xlu0 %570 }
  0xef   : > { %v581_v9 = vsel %vm574_vm5, %v569_v2, %v571_v0  ;;  %v582_v11 = vsel %vm574_vm5, %v571_v0, %v573_v8  ;;  %v1604_v0 = vrot.slane %v1598_v3, 6  ;;  %vm1628_vm5 = vcmask 367616  }
  0xf0   : > { %597 = vst [vmem:[#allocation2 + $0xb0] sm:$0x1c] %v581_v9  ;;  %598 = vst [vmem:[#allocation2 + $0xb8] sm:$0x1c] %v582_v11  ;;  %1414 = vrot.lane.b32.xlu1 %v1404_v6, %s2983_s9  ;;  %1346 = vrot.lane.b32.xlu0 %v1333_v34, %s2982_s8  ;;  %v1603_v9 = vrot.slane %v1588_v31, 6  ;;  %v1663_v11 = vcombine.high %v3341_v5, %v3341_v5 }
  0xf2   : > { %v625_v15 = vpop.permute.xlu1 %624  ;;  %v623_v16 = vpop.permute.xlu0 %622 }
  0xf3   : > { %v641_v17 = vsel %vm640_vm6, %v623_v16, %v625_v15 }
  0xf4   : > { %657 = vst [vmem:[#allocation2 + $0x80] sm:$0xe0] %v641_v17  ;;  %1418 = vrot.lane.b32.xlu1 %v1406_v12, %s2983_s9  ;;  %1416 = vrot.lane.b32.xlu0 %v1405_v13, %s2983_s9  ;;  %v1589_v12 = vld [vmem:[%s3028_s17 + $0x14] sm:$0x77]  ;;  %v1654_v13 = vld [vmem:[%s3028_s17 + $0xc] sm:$0x77] }
  0xf6   : > { %v629_v22 = vpop.permute.xlu1 %628  ;;  %v627_v23 = vpop.permute.xlu0 %626 }
  0xf7   : > { %v642_v24 = vsel %vm640_vm6, %v625_v15, %v627_v23  ;;  %v643_v25 = vsel %vm640_vm6, %v627_v23, %v629_v22  ;;  %v1664_v23 = vcombine.high %v1654_v13, %v1654_v13 }
  0xf8   : > { %658 = vst [vmem:[#allocation2 + $0x88] sm:$0xe0] %v642_v24  ;;  %659 = vst [vmem:[#allocation2 + $0x90] sm:$0xe0] %v643_v25  ;;  %1472 = vrot.lane.b32.xlu1 %v3278_v18, %s2984_s10  ;;  %1420 = vrot.lane.b32.xlu0 %v1407_v19, %s2983_s9 }
  0xfa   : > { %v3293_v30 = vpop.permute.xlu1 %681  ;;  %v3295_v32 = vpop.permute.xlu0 %630 }
  0xfb   : > { %v644_v33 = vsel %vm640_vm6, %v629_v22, %v3295_v32  ;;  %v1605_v22 = vrot.slane %v1589_v12, 6  ;;  %v1934_v44 = vld [vmem:[#allocation2 + $0x80] sm:$0xff] }
  0xfc   : > { %660 = vst [vmem:[#allocation2 + $0x98] sm:$0xe0] %v644_v33  ;;  %1476 = vrot.lane.b32.xlu1 %v1456_v20, %s2984_s10  ;;  %1474 = vrot.lane.b32.xlu0 %v1466_v26, %s2984_s10 }
  0xfe   : > { %v686_v38 = vpop.permute.xlu1 %685  ;;  %v684_v39 = vpop.permute.xlu0 %683 }
  0xff   : > { %v699_v40 = vsel %vm697_vm7, %v3293_v30, %v684_v39  ;;  %v700_v41 = vsel %vm697_vm7, %v684_v39, %v686_v38  ;;  %v1935_v18 = vld [vmem:[#allocation2 + $0x88] sm:$0xff]  ;;  %v1936_v33 = vld [vmem:[#allocation2 + $0x90] sm:$0xff] }
 0x100   : > { %715 = vst [vmem:[#allocation2 + $0xc8] sm:$0x7] %v699_v40  ;;  %716 = vst [vmem:[#allocation2 + $0xd0] sm:$0x7] %v700_v41  ;;  %1538 = vrot.lane.b32.xlu1 %v1528_v35, %s2985_s11  ;;  %1478 = vrot.lane.b32.xlu0 %v1467_v36, %s2984_s10  ;;  %v1670_v35 = vrot.slane %v1664_v23, 3  ;;  %v1669_v36 = vrot.slane %v1654_v13, 3 }
 0x101   : > { %v1655_v39 = vld [vmem:[%s3028_s17 + $0x14] sm:$0x77] }
 0x102   : > { %v748_v45 = vpop.permute.xlu1 %747  ;;  %v3307_v46 = vpop.permute.xlu0 %687 }
 0x103   : > { %v701_v47 = vsel %vm697_vm7, %v686_v38, %v3307_v46  ;;  %v1937_v28 = vld [vmem:[#allocation2 + $0x98] sm:$0xff]  ;;  %v3366_v38 = vld [vmem:[%s3028_s17 + $0x4] sm:$0x77] }
 0x104   : > { %717 = vst [vmem:[#allocation2 + $0xd8] sm:$0x7] %v701_v47  ;;  %1542 = vrot.lane.b32.xlu1 %v1530_v42, %s2985_s11  ;;  %1540 = vrot.lane.b32.xlu0 %v1529_v43, %s2985_s11 }
 0x106   : > { %v752_v49 = vpop.permute.xlu1 %751  ;;  %v750_v50 = vpop.permute.xlu0 %749 }
 0x107   : > { %v765_v51 = vsel %vm763_vm8, %v748_v45, %v750_v50  ;;  %v766_v52 = vsel %vm763_vm8, %v750_v50, %v752_v49  ;;  %v1720_v50 = vld [vmem:[%s3028_s17 + $0xc] sm:$0x77] }
 0x108   : > { %781 = vst [vmem:[#allocation2 + $0xc8] sm:$0x38] %v765_v51  ;;  %782 = vst [vmem:[#allocation2 + $0xd0] sm:$0x38] %v766_v52  ;;  %1206 = vrot.lane.b32.xlu1 %v3215_v4, %s2980_s6  ;;  %1544 = vrot.lane.b32.xlu0 %v1531_v48, %s2985_s11  ;;  %v1403_v4 = vrot.slane %v3255_v54, 7  ;;  %v1527_v54 = vrot.slane %v3282_v21, 1  ;;  %v1729_v48 = vcombine.high %v3366_v38, %v3366_v38 }
 0x109   : > { %v1668_v21 = vrot.slane %v1663_v11, 3  ;;  %v3380_v51 = vld [vmem:[%s3028_s17 + $0x4] sm:$0x77]  ;;  %v1843_v11 = vld [vmem:[%s3028_s17 + $0xc] sm:$0x77] }
 0x10a   : > { %v814_v57 = vpop.permute.xlu1 %813  ;;  %v3323_v58 = vpop.permute.xlu0 %753  ;;  %v1858_v23 = vrot.slane %v1843_v11, 2 }
 0x10b   : > { %v767_v59 = vsel %vm763_vm8, %v752_v49, %v3323_v58  ;;  %v1671_v49 = vrot.slane %v1655_v39, 3  ;;  %v1667_v39 = vrot.slane %v3341_v5, 3  ;;  %v1790_v5 = vrot.slane %v3380_v51, 5 }
 0x10c   : > { %783 = vst [vmem:[#allocation2 + $0xd8] sm:$0x38] %v767_v59  ;;  %1338 = vrot.lane.b32.xlu1 %v1329_v53, %s2982_s8  ;;  %1272 = vrot.lane.b32.xlu0 %v1263_v55, %s2981_s7  ;;  %v1786_v59 = vcombine.high %v3380_v51, %v3380_v51 }
 0x10e   : > { %v818_v61 = vpop.permute.xlu1 %817  ;;  %v816_v63 = vpop.permute.xlu0 %815 }
 0x10f   : > { %v831_v1 = vsel %vm829_vm9, %v814_v57, %v816_v63  ;;  %v832_v2 = vsel %vm829_vm9, %v816_v63, %v818_v61  ;;  %v1791_v63 = vrot.slane %v1786_v59, 5 }
 0x110   : > { %847 = vst [vmem:[#allocation2 + $0x108] ss:$-60 sps:$4 sm:$0xc1] %v831_v1   ;;  %848 = vst [vmem:[#allocation2 + $0x110] ss:$-60 sps:$4 sm:$0xc1] %v832_v2   ;;  %1470 = vrot.lane.b32.xlu1 %v1465_v60, %s2984_s10  ;;  %1412 = vrot.lane.b32.xlu0 %v1403_v4, %s2983_s9 }
 0x111   : > { %v1777_v60 = vld [vmem:[%s3028_s17 + $0xc] sm:$0x77]  ;;  %v1721_v2 = vld [vmem:[%s3028_s17 + $0x14] sm:$0x77] }
 0x112   : > { %v680_v6 = vpop.permute.xlu1 %679  ;;  %v3343_v34 = vpop.permute.xlu0 %819  ;;  %v1787_v1 = vcombine.high %v1777_v60, %v1777_v60 }
 0x113   : > { %v698_v7 = vsel %vm697_vm7, %v680_v6, %v3293_v30  ;;  %v833_v8 = vsel %vm829_vm9, %v818_v61, %v3343_v34 }
 0x114   : > { %714 = vst [vmem:[#allocation2 + $0xc0] sm:$0x7] %v698_v7  ;;  %849 = vst [vmem:[#allocation2 + $0x118] ss:$-60 sps:$4 sm:$0xc1] %v833_v8   ;;  %1612 = vrot.lane.b32.xlu1 %v1602_v62, %s2986_s14  ;;  %1536 = vrot.lane.b32.xlu0 %v1527_v54, %s2985_s11  ;;  %v1793_v7 = vrot.slane %v1787_v1, 5 }
 0x115   : > { %v3400_v62 = vld [vmem:[%s3028_s17 + $0x4] sm:$0x77]  ;;  %v1792_v8 = vrot.slane %v1777_v60, 5 }
 0x116   : > { %v812_v14 = vpop.permute.xlu1 %811  ;;  %v746_v15 = vpop.permute.xlu0 %745 }
 0x117   : > { %v830_v16 = vsel %vm829_vm9, %v812_v14, %v814_v57  ;;  %v764_v17 = vsel %vm763_vm8, %v746_v15, %v748_v45  ;;  %v1943_v19 = vld [vmem:[#allocation2 + $0xc8] sm:$0xff]  ;;  %v1944_v26 = vld [vmem:[#allocation2 + $0xd0] sm:$0xff]  ;;  %v1730_v57 = vcombine.high %v1720_v50, %v1720_v50 }
 0x118   : > { %846 = vst [vmem:[#allocation2 + $0x100] ss:$-60 sps:$4 sm:$0xc1] %v830_v16   ;;  %780 = vst [vmem:[#allocation2 + $0xc0] sm:$0x38] %v764_v17  ;;  %1616 = vrot.lane.b32.xlu1 %v1604_v0, %s2986_s14  ;;  %1614 = vrot.lane.b32.xlu0 %v1603_v9, %s2986_s14  ;;  %v2612_v20 = vpack.c.bf16 %v1943_v19, %v1935_v18  ;;  %v2634_v37 = vpack.c.bf16 %v1944_v26, %v1936_v33 }
 0x119   : > { %v1852_v0 = vcombine.high %v3400_v62, %v3400_v62  ;;  %v1778_v9 = vld [vmem:[%s3028_s17 + $0x14] sm:$0x77]  ;;  %v1853_v18 = vcombine.high %v1843_v11, %v1843_v11 }
 0x11a   : > { %v890_v24 = vpop.permute.xlu1 %889  ;;  %v3359_v25 = vpop.permute.xlu0 %887  ;;  %2613 = vmatprep.subr.bf16.mxu0 %v2612_v20  ;;  %v1794_v17 = vrot.slane %v1778_v9, 5 }
 0x11b   : > { %v905_v27 = vsel %vm903_vm10, %v3359_v25, %v890_v24  ;;  %v1945_v29 = vld [vmem:[#allocation2 + $0xd8] sm:$0xff]  ;;  %v1857_v16 = vrot.slane %v1852_v0, 2 }
 0x11c   : > { %921 = vst [vmem:[#allocation2 + $0x108] sm:$0xe] %v905_v27  ;;  %1678 = vrot.lane.b32.xlu1 %v1668_v21, %s2987_s15  ;;  %1618 = vrot.lane.b32.xlu0 %v1605_v22, %s2986_s14  ;;  %v2632_v30 = vpack.c.bf16 %v1945_v29, %v1937_v28  ;;  %v1859_v22 = vrot.slane %v1853_v18, 2 }
 0x11e   : > { %v3369_v40 = vpop.permute.xlu1 %893  ;;  %v892_v41 = vpop.permute.xlu0 %891  ;;  %2633 = vmatprep.subr.bf16.mxu1 %v2632_v30  ;;  %v1601_v30 = vrot.slane %v3321_v56, 6 }
 0x11f   : > { %v906_v42 = vsel %vm903_vm10, %v890_v24, %v892_v41  ;;  %v907_v43 = vsel %vm903_vm10, %v892_v41, %v3369_v40  ;;  %2635 = vmatpush1.bf16.msra.mxu1 %v2634_v37  ;;  %v1942_v45 = vld [vmem:[#allocation2 + $0xc0] sm:$0xff]  ;;  %v1844_v24 = vld [vmem:[%s3028_s17 + $0x14] sm:$0x77] }
 0x120   : > { %922 = vst [vmem:[#allocation2 + $0x110] sm:$0xe] %v906_v42  ;;  %923 = vst [vmem:[#allocation2 + $0x118] sm:$0xe] %v907_v43  ;;  %1682 = vrot.lane.b32.xlu1 %v1670_v35, %s2987_s15  ;;  %1680 = vrot.lane.b32.xlu0 %v1669_v36, %s2987_s15  ;;  %v2614_v47 = vpack.c.bf16 %v1942_v45, %v1934_v44  ;;  %v1860_v33 = vrot.slane %v1844_v24, 2 }
 0x121   : > { %v2937_v44 = vld [vmem:[%s3028_s17 + $0x10] sm:$0x77]  ;;  %v669_v24 = vld [vmem:[%s3028_s17 + $0x20] sm:$0x7] }
 0x122   : > { %v948_v52 = vpop.permute.xlu1 %947  ;;  %v3382_v53 = vpop.permute.xlu0 %945  ;;  %2615 = vmatpush1.bf16.msra.mxu0 %v2614_v47  ;;  %v611_v45 = vcombine.high %v2937_v44, %v2937_v44  ;;  %v1856_v47 = vrot.slane %v3400_v62, 2 }
 0x123   : > { %v963_v55 = vsel %vm961_vm11, %v3382_v53, %v948_v52 }
 0x124   : > { %979 = vst [vmem:[#allocation2 + $0x108] sm:$0x70] %v963_v55  ;;  %1735 = vrot.lane.b32.xlu1 %v1729_v48, %s2988_s16  ;;  %1684 = vrot.lane.b32.xlu0 %v1671_v49, %s2987_s15  ;;  %v602_v48 = vld [vmem:[%s3028_s17 + $0x18] sm:$0x77]  ;;  %v2991_v49 = vmov 0.0   ;;  %v618_v60 = vrot.slane %v611_v45, 3 }
 0x125   : > { %2191 = vmatprep.mubr.f32.mxu1 %v2991_v49  ;;  %2114 = vmatprep.mubr.f32.mxu0 %v2991_v49 }
 0x126   : > { %v3391_v4 = vpop.permute.xlu1 %951  ;;  %v950_v10 = vpop.permute.xlu0 %949 }
 0x127   : > { %v964_v31 = vsel %vm961_vm11, %v948_v52, %v950_v10  ;;  %v965_v61 = vsel %vm961_vm11, %v950_v10, %v3391_v4  ;;  %v619_v10 = vrot.slane %v602_v48, 3 }
 0x128   : > { %980 = vst [vmem:[#allocation2 + $0x110] sm:$0x70] %v964_v31  ;;  %981 = vst [vmem:[#allocation2 + $0x118] sm:$0x70] %v965_v61  ;;  %1739 = vrot.lane.b32.xlu1 %v1730_v57, %s2988_s16  ;;  %1737 = vrot.lane.b32.xlu0 %v1720_v50, %s2988_s16  ;;  %v612_v31 = vcombine.high %v602_v48, %v602_v48  ;;  %v603_v61 = vld [vmem:[%s3028_s17 + $0x20] sm:$0x7] }
 0x129   : > { %v621_v0 = vrot.slane %v603_v61, 3 }
 0x12a   : > { %v1014_v54 = vpop.permute.xlu1 %1013  ;;  %v3402_v3 = vpop.permute.xlu0 %1011  ;;  %v620_v9 = vrot.slane %v612_v31, 3  ;;  %v792_v31 = vld [vmem:[%s3028_s17 + $0x20] sm:$0x7] }
 0x12b   : > { %v1029_v6 = vsel %vm1027_vm12, %v3402_v3, %v1014_v54 }
 0x12c   : > { %1045 = vst [vmem:[#allocation2 + $0x148] ss:$-60 sps:$4 sm:$0x83] %v1029_v6   ;;  %1801 = vrot.lane.b32.xlu1 %v1791_v63, %s2989_s18  ;;  %1741 = vrot.lane.b32.xlu0 %v1721_v2, %s2988_s16 }
 0x12e   : > { %v3412_v12 = vpop.permute.xlu1 %1017  ;;  %v1016_v13 = vpop.permute.xlu0 %1015 }
 0x12f   : > { %v1030_v14 = vsel %vm1027_vm12, %v1014_v54, %v1016_v13  ;;  %v1031_v15 = vsel %vm1027_vm12, %v1016_v13, %v3412_v12 }
 0x130   : > { %1046 = vst [vmem:[#allocation2 + $0x150] ss:$-60 sps:$4 sm:$0x83] %v1030_v14   ;;  %1047 = vst [vmem:[#allocation2 + $0x158] ss:$-60 sps:$4 sm:$0x83] %v1031_v15   ;;  %1805 = vrot.lane.b32.xlu1 %v1793_v7, %s2989_s18  ;;  %1803 = vrot.lane.b32.xlu0 %v1792_v8, %s2989_s18 }
 0x131   : > { %v2938_v14 = vld [vmem:[%s3028_s17 + $0x10] sm:$0x77] }
 0x132   : > { %v1088_v19 = vpop.permute.xlu1 %1087  ;;  %v3419_v20 = vpop.permute.xlu0 %1085  ;;  %v677_v15 = vcombine.high %v2938_v14, %v2938_v14  ;;  %v866_v14 = vld [vmem:[%s3028_s17 + $0x20] sm:$0x7] }
 0x133   : > { %v1103_v21 = vsel %vm1101_vm13, %v3419_v20, %v1088_v19  ;;  %v1951_v57 = vld [vmem:[#allocation2 + $0x108] sm:$0xff] }
 0x134   : > { %1119 = vst [vmem:[#allocation2 + $0x148] sm:$0x1c] %v1103_v21  ;;  %1867 = vrot.lane.b32.xlu1 %v1857_v16, %s2990_s19  ;;  %1807 = vrot.lane.b32.xlu0 %v1794_v17, %s2989_s18  ;;  %v668_v16 = vld [vmem:[%s3028_s17 + $0x18] sm:$0x77] }
 0x136   : > { %v3426_v26 = vpop.permute.xlu1 %1091  ;;  %v1090_v27 = vpop.permute.xlu0 %1089 }
 0x137   : > { %v1104_v28 = vsel %vm1101_vm13, %v1088_v19, %v1090_v27  ;;  %v1105_v29 = vsel %vm1101_vm13, %v1090_v27, %v3426_v26  ;;  %v1952_v54 = vld [vmem:[#allocation2 + $0x110] sm:$0xff]  ;;  %v725_v27 = vld [vmem:[%s3028_s17 + $0x18] sm:$0x77] }
 0x138   : > { %1120 = vst [vmem:[#allocation2 + $0x150] sm:$0x1c] %v1104_v28  ;;  %1121 = vst [vmem:[#allocation2 + $0x158] sm:$0x1c] %v1105_v29  ;;  %1871 = vrot.lane.b32.xlu1 %v1859_v22, %s2990_s19  ;;  %1869 = vrot.lane.b32.xlu0 %v1858_v23, %s2990_s19  ;;  %v2939_v19 = vld [vmem:[%s3028_s17 + $0x10] sm:$0x77]  ;;  %v678_v23 = vcombine.high %v668_v16, %v668_v16 }
 0x13a   : > { %v1154_v35 = vpop.permute.xlu1 %1153  ;;  %v1152_v36 = vpop.permute.xlu0 %1151 }
 0x13b   : > { %v1169_v37 = vsel %vm1167_vm14, %v1152_v36, %v1154_v35 }
 0x13c   : > { %1185 = vst [vmem:[#allocation2 + $0x148] sm:$0xe0] %v1169_v37  ;;  %1610 = vrot.lane.b32.xlu1 %v1601_v30, %s2986_s14  ;;  %1873 = vrot.lane.b32.xlu0 %v1860_v33, %s2990_s19 }
 0x13e   : > { %v3438_v41 = vpop.permute.xlu1 %1157  ;;  %v1156_v42 = vpop.permute.xlu0 %1155 }
 0x13f   : > { %v1170_v43 = vsel %vm1167_vm14, %v1154_v35, %v1156_v42  ;;  %v1171_v56 = vsel %vm1167_vm14, %v1156_v42, %v3438_v41  ;;  %v735_v42 = vcombine.high %v725_v27, %v725_v27 }
 0x140   : > { %1186 = vst [vmem:[#allocation2 + $0x150] sm:$0xe0] %v1170_v43  ;;  %1187 = vst [vmem:[#allocation2 + $0x158] sm:$0xe0] %v1171_v56  ;;  %1733 = vrot.lane.b32.xlu1 %v3366_v38, %s2988_s16  ;;  %1676 = vrot.lane.b32.xlu0 %v1667_v39, %s2987_s15  ;;  %v742_v39 = vrot.slane %v725_v27, 5 }
 0x141   : > { %v726_v43 = vld [vmem:[%s3028_s17 + $0x20] sm:$0x7] }
 0x142   : > { %v944_v50 = vpop.permute.xlu1 %943  ;;  %v886_v52 = vpop.permute.xlu0 %885 }
 0x143   : > { %v962_v55 = vsel %vm961_vm11, %v944_v50, %v3382_v53  ;;  %v904_v38 = vsel %vm903_vm10, %v886_v52, %v3359_v25  ;;  %v1959_v59 = vld [vmem:[#allocation2 + $0x148] sm:$0xff]  ;;  %v1953_v53 = vld [vmem:[#allocation2 + $0x118] sm:$0xff]  ;;  %v744_v50 = vrot.slane %v726_v43, 5  ;;  %v743_v52 = vrot.slane %v735_v42, 5  ;;  %v2943_v42 = vld [vmem:[%s3028_s17 + $0x10] sm:$0x77] }
 0x144   : > { %978 = vst [vmem:[#allocation2 + $0x100] sm:$0x70] %v962_v55  ;;  %920 = vst [vmem:[#allocation2 + $0x100] sm:$0xe] %v904_v38  ;;  %1865 = vrot.lane.b32.xlu1 %v1856_v47, %s2990_s19  ;;  %1799 = vrot.lane.b32.xlu0 %v1790_v5, %s2989_s18  ;;  %v2616_v51 = vpack.c.bf16 %v1959_v59, %v1951_v57  ;;  %v2940_v5 = vld [vmem:[%s3028_s17 + $0x10] sm:$0x77] }
 0x145   : > { %v800_v48 = vcombine.high %v2940_v5, %v2940_v5  ;;  %v791_v55 = vld [vmem:[%s3028_s17 + $0x18] sm:$0x77]  ;;  %v2815_v43 = vld [vmem:[%s3028_s17 + $0x20] ss:$0 sps:$4 sm:$0x77]  }
 0x146   : > { %v1084_v63 = vpop.permute.xlu1 %1083  ;;  %v1010_v1 = vpop.permute.xlu0 %1009  ;;  %2617 = vmatprep.subr.bf16.mxu0 %v2616_v51  ;;  %v808_v51 = vrot.slane %v791_v55, 2 }
 0x147   : > { %v1102_v25 = vsel %vm1101_vm13, %v1084_v63, %v3419_v20  ;;  %v1028_v2 = vsel %vm1027_vm12, %v1010_v1, %v3402_v3  ;;  %v1961_v62 = vld [vmem:[#allocation2 + $0x158] sm:$0xff]  ;;  %v1960_v6 = vld [vmem:[#allocation2 + $0x150] sm:$0xff]  ;;  %v734_v20 = vcombine.high %v2939_v19, %v2939_v19  ;;  %v884_v19 = vrot.slane %v866_v14, 7 }
 0x148   : > { %1118 = vst [vmem:[#allocation2 + $0x140] sm:$0x1c] %v1102_v25  ;;  %1044 = vst [vmem:[#allocation2 + $0x140] ss:$-60 sps:$4 sm:$0x83] %v1028_v2   ;;  %634 = vrot.lane.b32.xlu1 %v619_v10, %s2971_s24  ;;  %632 = vrot.lane.b32.xlu0 %v618_v60, %s2971_s24  ;;  %v2636_v7 = vpack.c.bf16 %v1961_v62, %v1953_v53  ;;  %v2638_v8 = vpack.c.bf16 %v1960_v6, %v1952_v54  ;;  %v807_v60 = vrot.slane %v800_v48, 2 }
 0x149   : > { %v741_v30 = vrot.slane %v734_v20, 5  ;;  %v801_v10 = vcombine.high %v791_v55, %v791_v55  ;;  %v2941_v25 = vld [vmem:[%s3028_s17 + $0x10] sm:$0x77]  ;;  %v810_v62 = vrot.slane %v792_v31, 2  ;;  %v865_v6 = vld [vmem:[%s3028_s17 + $0x18] sm:$0x77] }
 0x14a   : > { %v3465_v11 = vpop.permute.xlu1 %1208  ;;  %v1150_v13 = vpop.permute.xlu0 %1149  ;;  %2637 = vmatprep.subr.bf16.mxu1 %v2636_v7  ;;  %v874_v2 = vcombine.high %v2941_v25, %v2941_v25 }
 0x14b   : > { %v1168_v3 = vsel %vm1167_vm14, %v1150_v13, %v1152_v36  ;;  %2639 = vmatpush1.bf16.msra.mxu1 %v2638_v8  ;;  %v809_v54 = vrot.slane %v801_v10, 2  ;;  %v882_v13 = vrot.slane %v865_v6, 7  ;;  %v2944_v10 = vld [vmem:[%s3028_s17 + $0x10] sm:$0x77] }
 0x14c   : > { %1184 = vst [vmem:[#allocation2 + $0x140] sm:$0xe0] %v1168_v3  ;;  %638 = vrot.lane.b32.xlu1 %v621_v0, %s2971_s24  ;;  %636 = vrot.lane.b32.xlu0 %v620_v9, %s2971_s24  ;;  %v881_v9 = vrot.slane %v874_v2, 7  ;;  %v875_v3 = vcombine.high %v865_v6, %v865_v6  ;;  %v1072_v31 = vcombine.high %v2944_v10, %v2944_v10  ;;  %v2946_v10 = vld [vmem:[%s3028_s17 + $0x10] sm:$0x77] }
 0x14e   : > { %v1213_v17 = vpop.permute.xlu1 %1212  ;;  %v1211_v18 = vpop.permute.xlu0 %1210  ;;  %v883_v20 = vrot.slane %v875_v3, 7 }
 0x14f   : > { %v1226_v21 = vsel %vm1224_vm15, %v3465_v11, %v1211_v18  ;;  %v1227_v22 = vsel %vm1224_vm15, %v1211_v18, %v1213_v17  ;;  %v1950_v35 = vld [vmem:[#allocation2 + $0x100] sm:$0xff] }
 0x150   : > { %1242 = vst [vmem:[#allocation2 + $0x188] sm:$0x7] %v1226_v21  ;;  %1243 = vst [vmem:[#allocation2 + $0x190] sm:$0x7] %v1227_v22  ;;  %691 = vrot.lane.b32.xlu1 %v668_v16, %s2972_s25  ;;  %689 = vrot.lane.b32.xlu0 %v677_v15, %s2972_s25  ;;  %v931_v21 = vld [vmem:[%s3028_s17 + $0x18] sm:$0x77] }
 0x151   : > { %v941_v27 = vcombine.low %v931_v21, %v931_v21 }
 0x152   : > { %v3480_v28 = vpop.permute.xlu1 %1274  ;;  %v3482_v29 = vpop.permute.xlu0 %1214 }
 0x153   : > { %v1228_v33 = vsel %vm1224_vm15, %v1213_v17, %v3482_v29  ;;  %v1958_v36 = vld [vmem:[#allocation2 + $0x140] sm:$0xff] }
 0x154   : > { %1244 = vst [vmem:[#allocation2 + $0x198] sm:$0x7] %v1228_v33  ;;  %695 = vrot.lane.b32.xlu1 %v669_v24, %s2972_s25  ;;  %693 = vrot.lane.b32.xlu0 %v678_v23, %s2972_s25  ;;  %v2618_v37 = vpack.c.bf16 %v1958_v36, %v1950_v35 }
 0x156   : > { %v1279_v56 = vpop.permute.xlu1 %1278  ;;  %v1277_v44 = vpop.permute.xlu0 %1276  ;;  %2619 = vmatpush1.bf16.msra.mxu0 %v2618_v37  ;;  %v2942_v37 = vld [vmem:[%s3028_s17 + $0x10] sm:$0x77] }
 0x157   : > { %v1292_v45 = vsel %vm1290_vm0, %v3480_v28, %v1277_v44  ;;  %v1293_v47 = vsel %vm1290_vm0, %v1277_v44, %v1279_v56 }
 0x158   : > { %1308 = vst [vmem:[#allocation2 + $0x188] sm:$0x38] %v1292_v45  ;;  %1309 = vst [vmem:[#allocation2 + $0x190] sm:$0x38] %v1293_v47  ;;  %757 = vrot.lane.b32.xlu1 %v742_v39, %s2973_s26  ;;  %755 = vrot.lane.b32.xlu0 %v741_v30, %s2973_s26  ;;  %v998_v39 = vcombine.high %v2942_v37, %v2942_v37 }
 0x15a   : > { %v3496_v38 = vpop.permute.xlu1 %1340  ;;  %v3498_v57 = vpop.permute.xlu0 %1280  ;;  %v1005_v5 = vrot.slane %v998_v39, 1 }
 0x15b   : > { %v1294_v59 = vsel %vm1290_vm0, %v1279_v56, %v3498_v57  ;;  %v989_v56 = vld [vmem:[%s3028_s17 + $0x18] sm:$0x77] }
 0x15c   : > { %1310 = vst [vmem:[#allocation2 + $0x198] sm:$0x38] %v1294_v59  ;;  %761 = vrot.lane.b32.xlu1 %v744_v50, %s2973_s26  ;;  %759 = vrot.lane.b32.xlu0 %v743_v52, %s2973_s26  ;;  %v1006_v48 = vrot.slane %v989_v56, 1  ;;  %v999_v50 = vcombine.high %v989_v56, %v989_v56  ;;  %v990_v52 = vld [vmem:[%s3028_s17 + $0x20] sm:$0x7] }
 0x15e   : > { %v1345_v61 = vpop.permute.xlu1 %1344  ;;  %v1343_v63 = vpop.permute.xlu0 %1342 }
 0x15f   : > { %v1358_v1 = vsel %vm3936_vm1, %v3496_v38, %v1343_v63  ;;  %v1359_v53 = vsel %vm3936_vm1, %v1343_v63, %v1345_v61  ;;  %v1007_v63 = vrot.slane %v999_v50, 1 }
 0x160   : > { %1374 = vst [vmem:[#allocation2 + $0x1c8] ss:$-60 sps:$4 sm:$0xc1] %v1358_v1   ;;  %1375 = vst [vmem:[#allocation2 + $0x1d0] ss:$-60 sps:$4 sm:$0xc1] %v1359_v53   ;;  %823 = vrot.lane.b32.xlu1 %v808_v51, %s2974_s27  ;;  %821 = vrot.lane.b32.xlu0 %v807_v60, %s2974_s27 }
 0x161   : > { %v1063_v1 = vld [vmem:[%s3028_s17 + $0x18] sm:$0x77] }
 0x162   : > { %v3512_v7 = vpop.permute.xlu1 %1414  ;;  %v3514_v8 = vpop.permute.xlu0 %1346  ;;  %v1080_v6 = vrot.slane %v1063_v1, 6 }
 0x163   : > { %v1360_v0 = vsel %vm3936_vm1, %v1345_v61, %v3514_v8  ;;  %v1008_v61 = vrot.slane %v990_v52, 1 }
 0x164   : > { %1376 = vst [vmem:[#allocation2 + $0x1d8] ss:$-60 sps:$4 sm:$0xc1] %v1360_v0   ;;  %827 = vrot.lane.b32.xlu1 %v810_v62, %s2974_s27  ;;  %825 = vrot.lane.b32.xlu0 %v809_v54, %s2974_s27  ;;  %v1079_v54 = vrot.slane %v1072_v31, 6  ;;  %v1073_v0 = vcombine.high %v1063_v1, %v1063_v1  ;;  %v1204_v31 = vcombine.high %v2946_v10, %v2946_v10  ;;  %s2607_s27 = sshll.u32 %s3964_s13, 7 }
 0x166   : > { %v1419_v15 = vpop.permute.xlu1 %1418  ;;  %v1417_v16 = vpop.permute.xlu0 %1416 }
 0x167   : > { %v1432_v17 = vsel %vm3935_vm2, %v3512_v7, %v1417_v16  ;;  %v1433_v18 = vsel %vm3935_vm2, %v1417_v16, %v1419_v15 }
 0x168   : > { %1448 = vst [vmem:[#allocation2 + $0x1c8] sm:$0xe] %v1432_v17  ;;  %1449 = vst [vmem:[#allocation2 + $0x1d0] sm:$0xe] %v1433_v18  ;;  %897 = vrot.lane.b32.xlu1 %v882_v13, %s2975_s28  ;;  %895 = vrot.lane.b32.xlu0 %v881_v9, %s2975_s28  ;;  %v1064_v9 = vld [vmem:[%s3028_s17 + $0x20] sm:$0x7] }
 0x169   : > { %v2945_v17 = vld [vmem:[%s3028_s17 + $0x10] sm:$0x77] }
 0x16a   : > { %v3527_v22 = vpop.permute.xlu1 %1472  ;;  %v3529_v23 = vpop.permute.xlu0 %1420  ;;  %v1138_v18 = vcombine.high %v2945_v17, %v2945_v17 }
 0x16b   : > { %v1434_v24 = vsel %vm3935_vm2, %v1419_v15, %v3529_v23  ;;  %v1967_v15 = vld [vmem:[#allocation2 + $0x188] sm:$0xff] }
 0x16c   : > { %1450 = vst [vmem:[#allocation2 + $0x1d8] sm:$0xe] %v1434_v24  ;;  %901 = vrot.lane.b32.xlu1 %v884_v19, %s2975_s28  ;;  %899 = vrot.lane.b32.xlu0 %v883_v20, %s2975_s28  ;;  %v1082_v20 = vrot.slane %v1064_v9, 6  ;;  %v1129_v24 = vld [vmem:[%s3028_s17 + $0x18] sm:$0x77]  ;;  %v1145_v37 = vrot.slane %v1138_v18, 3 }
 0x16d   : > { %v1139_v56 = vcombine.high %v1129_v24, %v1129_v24  ;;  %v1196_v9 = vld [vmem:[%s3028_s17 + $0x20] sm:$0x7] }
 0x16e   : > { %v1477_v30 = vpop.permute.xlu1 %1476  ;;  %v1475_v33 = vpop.permute.xlu0 %1474 }
 0x16f   : > { %v1490_v35 = vsel %vm3934_vm3, %v3527_v22, %v1475_v33  ;;  %v1491_v36 = vsel %vm3934_vm3, %v1475_v33, %v1477_v30  ;;  %v1147_v52 = vrot.slane %v1139_v56, 3 }
 0x170   : > { %1506 = vst [vmem:[#allocation2 + $0x1c8] sm:$0x70] %v1490_v35  ;;  %1507 = vst [vmem:[#allocation2 + $0x1d0] sm:$0x70] %v1491_v36  ;;  %955 = vrot.lane.b32.xlu1 %v941_v27, %s2976_s29  ;;  %953 = vrot.lane.b32.xlu0 %v2943_v42, %s2976_s29  ;;  %v1969_v35 = vld [vmem:[#allocation2 + $0x198] sm:$0xff]  ;;  %v1968_v42 = vld [vmem:[#allocation2 + $0x190] sm:$0xff] }
 0x172   : > { %v3544_v44 = vpop.permute.xlu1 %1538  ;;  %v3546_v45 = vpop.permute.xlu0 %1478 }
 0x173   : > { %v1492_v47 = vsel %vm3934_vm3, %v1477_v30, %v3546_v45 }
 0x174   : > { %1508 = vst [vmem:[#allocation2 + $0x1d8] sm:$0x70] %v1492_v47  ;;  %959 = vrot.lane.b32.xlu1 %v2815_v43, %s2976_s29  ;;  %957 = vrot.lane.b32.xlu0 %v931_v21, %s2976_s29  ;;  %v1081_v21 = vrot.slane %v1073_v0, 6  ;;  %v1146_v43 = vrot.slane %v1129_v24, 3 }
 0x176   : > { %v1543_v55 = vpop.permute.xlu1 %1542  ;;  %v1541_v59 = vpop.permute.xlu0 %1540 }
 0x177   : > { %v1556_v60 = vsel %vm3933_vm4, %v3544_v44, %v1541_v59  ;;  %v1557_v51 = vsel %vm3933_vm4, %v1541_v59, %v1543_v55 }
 0x178   : > { %1572 = vst [vmem:[#allocation2 + $0x208] ss:$-60 sps:$4 sm:$0x83] %v1556_v60   ;;  %1573 = vst [vmem:[#allocation2 + $0x210] ss:$-60 sps:$4 sm:$0x83] %v1557_v51   ;;  %1021 = vrot.lane.b32.xlu1 %v1006_v48, %s2977_s30  ;;  %1019 = vrot.lane.b32.xlu0 %v1005_v5, %s2977_s30 }
 0x179   : > { %v1130_v5 = vld [vmem:[%s3028_s17 + $0x20] sm:$0x7] }
 0x17a   : > { %v1207_v53 = vpop.permute.xlu1 %1206  ;;  %v3560_v25 = vpop.permute.xlu0 %1544  ;;  %v1148_v50 = vrot.slane %v1130_v5, 3 }
 0x17b   : > { %v1225_v2 = vsel %vm1224_vm15, %v1207_v53, %v3465_v11  ;;  %v1558_v62 = vsel %vm3933_vm4, %v1543_v55, %v3560_v25 }
 0x17c   : > { %1241 = vst [vmem:[#allocation2 + $0x180] sm:$0x7] %v1225_v2  ;;  %1574 = vst [vmem:[#allocation2 + $0x218] ss:$-60 sps:$4 sm:$0x83] %v1558_v62   ;;  %1025 = vrot.lane.b32.xlu1 %v1008_v61, %s2977_s30  ;;  %1023 = vrot.lane.b32.xlu0 %v1007_v63, %s2977_s30  ;;  %s3886_s30 = scalar_lea.vmem %s3932_s3, %s2607_s27 }
 0x17e   : > { %v1339_v13 = vpop.permute.xlu1 %1338  ;;  %v1273_v3 = vpop.permute.xlu0 %1272 }
 0x17f   : > { %v1357_v11 = vsel %vm3936_vm1, %v1339_v13, %v3496_v38  ;;  %v1291_v14 = vsel %vm1290_vm0, %v1273_v3, %v3480_v28  ;;  %v1975_v16 = vld [vmem:[#allocation2 + $0x1c8] sm:$0xff]  ;;  %v1976_v38 = vld [vmem:[#allocation2 + $0x1d0] sm:$0xff]  ;;  %v1252_v13 = vld [vmem:[%s3028_s17 + $0x18] sm:$0x77]  ;;  %vm3937_vm1 = vcmask 277504  }
 0x180   : > { %1373 = vst [vmem:[#allocation2 + $0x1c0] ss:$-60 sps:$4 sm:$0xc1] %v1357_v11   ;;  %1307 = vst [vmem:[#allocation2 + $0x180] sm:$0x38] %v1291_v14  ;;  %1095 = vrot.lane.b32.xlu1 %v1080_v6, %s2978_s4  ;;  %1093 = vrot.lane.b32.xlu0 %v1079_v54, %s2978_s4  ;;  %v2620_v19 = vpack.c.bf16 %v1975_v16, %v1967_v15  ;;  %v2642_v47 = vpack.c.bf16 %v1976_v38, %v1968_v42  ;;  %v1269_v16 = vrot.slane %v1252_v13, 5 }
 0x181   : > { %v2947_v6 = vld [vmem:[%s3028_s17 + $0x10] sm:$0x77]  ;;  %v1262_v18 = vcombine.high %v1252_v13, %v1252_v13 }
 0x182   : > { %v1471_v27 = vpop.permute.xlu1 %1470  ;;  %v1413_v30 = vpop.permute.xlu0 %1412  ;;  %2621 = vmatprep.subr.bf16.mxu0 %v2620_v19  ;;  %v1261_v0 = vcombine.high %v2947_v6, %v2947_v6  ;;  %v1253_v19 = vld [vmem:[%s3028_s17 + $0x20] sm:$0x7]  ;;  %v2948_v38 = vld [vmem:[%s3028_s17 + $0x14] sm:$0x77] }
 0x183   : > { %v1489_v28 = vsel %vm3934_vm3, %v1471_v27, %v3527_v22  ;;  %v1431_v33 = vsel %vm3935_vm2, %v1413_v30, %v3512_v7  ;;  %v1977_v36 = vld [vmem:[#allocation2 + $0x1d8] sm:$0xff]  ;;  %vm1751_vm3 = vcmask 293888   ;;  %v1271_v27 = vrot.slane %v1253_v19, 5 }
 0x184   : > { %1505 = vst [vmem:[#allocation2 + $0x1c0] sm:$0x70] %v1489_v28  ;;  %1447 = vst [vmem:[#allocation2 + $0x1c0] sm:$0xe] %v1431_v33  ;;  %1099 = vrot.lane.b32.xlu1 %v1082_v20, %s2978_s4  ;;  %1097 = vrot.lane.b32.xlu0 %v1081_v21, %s2978_s4  ;;  %v2640_v39 = vpack.c.bf16 %v1977_v36, %v1969_v35  ;;  %v1268_v17 = vrot.slane %v1261_v0, 5  ;;  %v1270_v30 = vrot.slane %v1262_v18, 5 }
 0x185   : > { %v1327_v28 = vcombine.high %v2948_v38, %v2948_v38  ;;  %v1318_v33 = vld [vmem:[%s3028_s17 + $0x1c] sm:$0x77]  ;;  %vm3938_vm2 = vcmask 285696   ;;  %v2827_v38 = vld [vmem:[%s3028_s17 + $0x24] ss:$0 sps:$4 sm:$0x77]  }
 0x186   : > { %v3584_v22 = vpop.permute.xlu1 %1612  ;;  %v1537_v48 = vpop.permute.xlu0 %1536  ;;  %2641 = vmatprep.subr.bf16.mxu1 %v2640_v39  ;;  %v1335_v42 = vrot.slane %v1318_v33, 2  ;;  %v1328_v56 = vcombine.high %v1318_v33, %v1318_v33 }
 0x187   : > { %v1555_v7 = vsel %vm3933_vm4, %v1537_v48, %v3544_v44  ;;  %2643 = vmatpush1.bf16.msra.mxu1 %v2642_v47  ;;  %v1195_v44 = vld [vmem:[%s3028_s17 + $0x18] sm:$0x77]  ;;  %v1966_v53 = vld [vmem:[#allocation2 + $0x180] sm:$0xff]  ;;  %vm1694_vm4 = vcmask 359424  }
 0x188   : > { %1571 = vst [vmem:[#allocation2 + $0x200] ss:$-60 sps:$4 sm:$0x83] %v1555_v7   ;;  %1161 = vrot.lane.b32.xlu1 %v1146_v43, %s2979_s5  ;;  %1159 = vrot.lane.b32.xlu0 %v1145_v37, %s2979_s5  ;;  %v1205_v62 = vcombine.high %v1195_v44, %v1195_v44  ;;  %v1334_v43 = vrot.slane %v1327_v28, 2  ;;  %v1319_v47 = vld [vmem:[%s3028_s17 + $0x24] sm:$0x7] }
 0x189   : > { %v2951_v28 = vld [vmem:[%s3028_s17 + $0x14] sm:$0x77] }
 0x18a   : > { %v1617_v55 = vpop.permute.xlu1 %1616  ;;  %v1615_v59 = vpop.permute.xlu0 %1614  ;;  %v1525_v33 = vcombine.high %v2951_v28, %v2951_v28  ;;  %v3693_v28 = vld [vmem:[%s3929_s0] sm:$0xff] }
 0x18b   : > { %v1630_v60 = vsel %vm1628_vm5, %v3584_v22, %v1615_v59  ;;  %v1631_v51 = vsel %vm1628_vm5, %v1615_v59, %v1617_v55 }
 0x18c   : > { %1646 = vst [vmem:[#allocation2 + $0x208] sm:$0x1c] %v1630_v60  ;;  %1647 = vst [vmem:[#allocation2 + $0x210] sm:$0x1c] %v1631_v51  ;;  %1165 = vrot.lane.b32.xlu1 %v1148_v50, %s2979_s5  ;;  %1163 = vrot.lane.b32.xlu0 %v1147_v52, %s2979_s5  ;;  %v1337_v50 = vrot.slane %v1319_v47, 2  ;;  %v1336_v52 = vrot.slane %v1328_v56, 2 }
 0x18d   : > { %v1392_v60 = vld [vmem:[%s3028_s17 + $0x1c] sm:$0x77] }
 0x18e   : > { %v3597_v61 = vpop.permute.xlu1 %1678  ;;  %v3599_v63 = vpop.permute.xlu0 %1618 }
 0x18f   : > { %v1632_v1 = vsel %vm1628_vm5, %v1617_v55, %v3599_v63  ;;  %v1974_v2 = vld [vmem:[#allocation2 + $0x1c0] sm:$0xff]  ;;  %v2949_v55 = vld [vmem:[%s3028_s17 + $0x14] sm:$0x77] }
 0x190   : > { %1648 = vst [vmem:[#allocation2 + $0x218] sm:$0x1c] %v1632_v1  ;;  %1218 = vrot.lane.b32.xlu1 %v1195_v44, %s2980_s6  ;;  %1216 = vrot.lane.b32.xlu0 %v1204_v31, %s2980_s6  ;;  %v2622_v54 = vpack.c.bf16 %v1974_v2, %v1966_v53  ;;  %v1401_v59 = vcombine.high %v2949_v55, %v2949_v55  ;;  %v1409_v1 = vrot.slane %v1392_v60, 7 }
 0x191   : > { %v1402_v2 = vcombine.high %v1392_v60, %v1392_v60 }
 0x192   : > { %v1683_v3 = vpop.permute.xlu1 %1682  ;;  %v1681_v11 = vpop.permute.xlu0 %1680  ;;  %2623 = vmatpush1.bf16.msra.mxu0 %v2622_v54  ;;  %v1408_v53 = vrot.slane %v1401_v59, 7 }
 0x193   : > { %v1696_v14 = vsel %vm1694_vm4, %v3597_v61, %v1681_v11  ;;  %v1697_v15 = vsel %vm1694_vm4, %v1681_v11, %v1683_v3  ;;  %v1410_v13 = vrot.slane %v1402_v2, 7  ;;  %v2952_v2 = vld [vmem:[%s3028_s17 + $0x14] sm:$0x77] }
 0x194   : > { %1712 = vst [vmem:[#allocation2 + $0x208] sm:$0xe0] %v1696_v14  ;;  %1713 = vst [vmem:[#allocation2 + $0x210] sm:$0xe0] %v1697_v15  ;;  %1222 = vrot.lane.b32.xlu1 %v1196_v9, %s2980_s6  ;;  %1220 = vrot.lane.b32.xlu0 %v1205_v62, %s2980_s6  ;;  %v1393_v62 = vld [vmem:[%s3028_s17 + $0x24] sm:$0x7] }
 0x195   : > { %v1411_v9 = vrot.slane %v1393_v62, 7  ;;  %v1599_v62 = vcombine.high %v2952_v2, %v2952_v2 }
 0x196   : > { %v3614_v20 = vpop.permute.xlu1 %1735  ;;  %v3616_v21 = vpop.permute.xlu0 %1684 }
 0x197   : > { %v1698_v24 = vsel %vm1694_vm4, %v1683_v3, %v3616_v21  ;;  %v1458_v3 = vld [vmem:[%s3028_s17 + $0x1c] sm:$0x77] }
 0x198   : > { %1714 = vst [vmem:[#allocation2 + $0x218] sm:$0xe0] %v1698_v24  ;;  %1284 = vrot.lane.b32.xlu1 %v1269_v16, %s2981_s7  ;;  %1282 = vrot.lane.b32.xlu0 %v1268_v17, %s2981_s7  ;;  %v1468_v17 = vcombine.low %v1458_v3, %v1458_v3 }
 0x19a   : > { %v1740_v35 = vpop.permute.xlu1 %1739  ;;  %v1738_v36 = vpop.permute.xlu0 %1737 }
 0x19b   : > { %v1753_v37 = vsel %vm1751_vm3, %v3614_v20, %v1738_v36  ;;  %v1754_v39 = vsel %vm1751_vm3, %v1738_v36, %v1740_v35 }
 0x19c   : > { %1769 = vst [vmem:[#allocation2 + $0x248] sm:$0x7] %v1753_v37  ;;  %1770 = vst [vmem:[#allocation2 + $0x250] sm:$0x7] %v1754_v39  ;;  %1288 = vrot.lane.b32.xlu1 %v1271_v27, %s2981_s7  ;;  %1286 = vrot.lane.b32.xlu0 %v1270_v30, %s2981_s7  ;;  %v2950_v30 = vld [vmem:[%s3028_s17 + $0x14] sm:$0x77] }
 0x19e   : > { %v3630_v5 = vpop.permute.xlu1 %1801  ;;  %v3632_v48 = vpop.permute.xlu0 %1741 }
 0x19f   : > { %v1755_v7 = vsel %vm1751_vm3, %v1740_v35, %v3632_v48  ;;  %v1516_v35 = vld [vmem:[%s3028_s17 + $0x1c] sm:$0x77] }
 0x1a0   : > { %1771 = vst [vmem:[#allocation2 + $0x258] sm:$0x7] %v1755_v7  ;;  %1350 = vrot.lane.b32.xlu1 %v1335_v42, %s2982_s8  ;;  %1348 = vrot.lane.b32.xlu0 %v1334_v43, %s2982_s8  ;;  %v1983_v42 = vld [vmem:[#allocation2 + $0x208] sm:$0xff]  ;;  %v1533_v47 = vrot.slane %v1516_v35, 1  ;;  %v1532_v7 = vrot.slane %v1525_v33, 1  ;;  %v1924_v33 = vld [vmem:[#allocation2 + $0x30] sm:$0xff] }
 0x1a2   : > { %v1806_v51 = vpop.permute.xlu1 %1805  ;;  %v1804_v10 = vpop.permute.xlu0 %1803 }
 0x1a3   : > { %v1819_v31 = vsel %vm3938_vm2, %v3630_v5, %v1804_v10  ;;  %v1820_v44 = vsel %vm3938_vm2, %v1804_v10, %v1806_v51 }
 0x1a4   : > { %1835 = vst [vmem:[#allocation2 + $0x248] sm:$0x38] %v1819_v31  ;;  %1836 = vst [vmem:[#allocation2 + $0x250] sm:$0x38] %v1820_v44  ;;  %1354 = vrot.lane.b32.xlu1 %v1337_v50, %s2982_s8  ;;  %1352 = vrot.lane.b32.xlu0 %v1336_v52, %s2982_s8  ;;  %v1526_v50 = vcombine.high %v1516_v35, %v1516_v35  ;;  %v1517_v52 = vld [vmem:[%s3028_s17 + $0x24] sm:$0x7] }
 0x1a5   : > { %v1984_v44 = vld [vmem:[#allocation2 + $0x210] sm:$0xff] }
 0x1a6   : > { %v1868_v54 = vpop.permute.xlu1 %1867  ;;  %v3646_v6 = vpop.permute.xlu0 %1807 }
 0x1a7   : > { %v1821_v0 = vsel %vm3938_vm2, %v1806_v51, %v3646_v6  ;;  %v1985_v51 = vld [vmem:[#allocation2 + $0x218] sm:$0xff] }
 0x1a8   : > { %1837 = vst [vmem:[#allocation2 + $0x258] sm:$0x38] %v1821_v0  ;;  %1424 = vrot.lane.b32.xlu1 %v1409_v1, %s2983_s9  ;;  %1422 = vrot.lane.b32.xlu0 %v1408_v53, %s2983_s9  ;;  %v1535_v1 = vrot.slane %v1517_v52, 1  ;;  %v1534_v53 = vrot.slane %v1526_v50, 1  ;;  %v1656_v52 = vld [vmem:[%s3028_s17 + $0x1c] sm:$0x77] }
 0x1aa   : > { %v1872_v11 = vpop.permute.xlu1 %1871  ;;  %v1870_v14 = vpop.permute.xlu0 %1869 }
 0x1ab   : > { %v1885_v15 = vsel %vm3937_vm1, %v1868_v54, %v1870_v14  ;;  %v1886_v16 = vsel %vm3937_vm1, %v1870_v14, %v1872_v11 }
 0x1ac   : > { %1901 = vst [vmem:[#allocation2 + $0x288] ss:$-60 sps:$4 sm:$0xc1] %v1885_v15   ;;  %1902 = vst [vmem:[#allocation2 + $0x290] ss:$-60 sps:$4 sm:$0xc1] %v1886_v16   ;;  %1428 = vrot.lane.b32.xlu1 %v1411_v9, %s2983_s9  ;;  %1426 = vrot.lane.b32.xlu0 %v1410_v13, %s2983_s9 }
 0x1ad   : > { %v1590_v9 = vld [vmem:[%s3028_s17 + $0x1c] sm:$0x77]  ;;  %v1606_v15 = vrot.slane %v1599_v62, 6 }
 0x1ae   : > { %v1611_v18 = vpop.permute.xlu1 %1610  ;;  %v3657_v19 = vpop.permute.xlu0 %1873  ;;  %v1607_v14 = vrot.slane %v1590_v9, 6  ;;  %v1933_v16 = vld [vmem:[#allocation2 + $0x78] sm:$0xff] }
 0x1af   : > { %v1629_v24 = vsel %vm1628_vm5, %v1611_v18, %v3584_v22  ;;  %v1887_v27 = vsel %vm3937_vm1, %v1872_v11, %v3657_v19  ;;  %v1600_v18 = vcombine.high %v1590_v9, %v1590_v9 }
 0x1b0   : > { %1645 = vst [vmem:[#allocation2 + $0x200] sm:$0x1c] %v1629_v24  ;;  %1903 = vst [vmem:[#allocation2 + $0x298] ss:$-60 sps:$4 sm:$0xc1] %v1887_v27   ;;  %1482 = vrot.lane.b32.xlu1 %v1468_v17, %s2984_s10  ;;  %1480 = vrot.lane.b32.xlu0 %v2950_v30, %s2984_s10  ;;  %v1932_v17 = vld [vmem:[#allocation2 + $0x70] sm:$0xff] }
 0x1b1   : > { %v1925_v24 = vld [vmem:[#allocation2 + $0x38] sm:$0xff]  ;;  %v1591_v27 = vld [vmem:[%s3028_s17 + $0x24] sm:$0x7] }
 0x1b2   : > { %v1734_v36 = vpop.permute.xlu1 %1733  ;;  %v1677_v37 = vpop.permute.xlu0 %1676 }
 0x1b3   : > { %v1752_v22 = vsel %vm1751_vm3, %v1734_v36, %v3614_v20  ;;  %v1695_v39 = vsel %vm1694_vm4, %v1677_v37, %v3597_v61  ;;  %v1991_v43 = vld [vmem:[#allocation2 + $0x248] sm:$0xff]  ;;  %v1992_v20 = vld [vmem:[#allocation2 + $0x250] sm:$0xff]  ;;  %v2668_v37 = vpack.c.bf16 %v1933_v16, %v1925_v24 }
 0x1b4   : > { %1768 = vst [vmem:[#allocation2 + $0x240] sm:$0x7] %v1752_v22  ;;  %1711 = vst [vmem:[#allocation2 + $0x200] sm:$0xe0] %v1695_v39  ;;  %1486 = vrot.lane.b32.xlu1 %v2827_v38, %s2984_s10  ;;  %1484 = vrot.lane.b32.xlu0 %v1458_v3, %s2984_s10  ;;  %v2624_v56 = vpack.c.bf16 %v1991_v43, %v1983_v42  ;;  %v2646_v0 = vpack.c.bf16 %v1992_v20, %v1984_v44  ;;  %v2000_v38 = vld [vmem:[#allocation2 + $0x290] sm:$0x1] }
 0x1b5   : > { %v2670_v22 = vpack.c.bf16 %v1932_v17, %v1924_v33  ;;  %v1999_v20 = vld [vmem:[#allocation2 + $0x288] sm:$0x1]  ;;  %v2954_v24 = vld [vmem:[%s3028_s17 + $0x14] sm:$0x77] }
 0x1b6   : > { %v1866_v55 = vpop.permute.xlu1 %1865  ;;  %v1800_v59 = vpop.permute.xlu0 %1799  ;;  %2625 = vmatprep.subr.bf16.mxu0 %v2624_v56  ;;  %v1609_v56 = vrot.slane %v1591_v27, 6  ;;  %v1731_v27 = vcombine.high %v2954_v24, %v2954_v24 }
 0x1b7   : > { %v1884_v61 = vsel %vm3937_vm1, %v1866_v55, %v1868_v54  ;;  %v1818_v60 = vsel %vm3938_vm2, %v1800_v59, %v3630_v5  ;;  %v1993_v10 = vld [vmem:[#allocation2 + $0x258] sm:$0xff]  ;;  %vm2025_vm1 = vcmask 1040384   ;;  %vm2018_vm2 = vcmask 662528  }
 0x1b8   : > { %1900 = vst [vmem:[#allocation2 + $0x280] ss:$-60 sps:$4 sm:$0xc1] %v1884_v61   ;;  %1834 = vst [vmem:[#allocation2 + $0x240] sm:$0x38] %v1818_v60  ;;  %1548 = vrot.lane.b32.xlu1 %v1533_v47, %s2985_s11  ;;  %1546 = vrot.lane.b32.xlu0 %v1532_v7, %s2985_s11  ;;  %v2644_v31 = vpack.c.bf16 %v1993_v10, %v1985_v51  ;;  %v1608_v47 = vrot.slane %v1600_v18, 6 }
 0x1b9   : > { %v2001_v11 = vld [vmem:[#allocation2 + $0x298] sm:$0x1]  ;;  %v1931_v61 = vld [vmem:[#allocation2 + $0x68] sm:$0xff] }
 0x1ba   : > { %v635_v54 = vpop.permute.xlu1 %634  ;;  %v633_v13 = vpop.permute.xlu0 %632  ;;  %2645 = vmatprep.subr.bf16.mxu1 %v2644_v31  ;;  %v2953_v7 = vld [vmem:[%s3028_s17 + $0x14] sm:$0x77]  ;;  %v1923_v10 = vld [vmem:[#allocation2 + $0x28] sm:$0xff]  ;;  %v1673_v31 = vrot.slane %v1656_v52, 3 }
 0x1bb   : > { %v645_v5 = vsel %vm640_vm6, %v3295_v32, %v633_v13  ;;  %v646_v3 = vsel %vm640_vm6, %v633_v13, %v635_v54  ;;  %2647 = vmatpush1.bf16.msra.mxu1 %v2646_v0  ;;  %v1982_v39 = vld [vmem:[#allocation2 + $0x200] sm:$0xff]  ;;  %v1665_v50 = vcombine.high %v2953_v7, %v2953_v7  ;;  %v2648_v62 = vpack.c.bf16 %v1931_v61, %v1923_v10 }
 0x1bc   : > { %661 = vst [vmem:[#allocation2 + $0xa0] sm:$0xe0] %v645_v5  ;;  %662 = vst [vmem:[#allocation2 + $0xa8] sm:$0xe0] %v646_v3  ;;  %1552 = vrot.lane.b32.xlu1 %v1535_v1, %s2985_s11  ;;  %1550 = vrot.lane.b32.xlu0 %v1534_v53, %s2985_s11  ;;  %v1930_v1 = vld [vmem:[#allocation2 + $0x60] sm:$0xff]  ;;  %v1666_v53 = vcombine.high %v1656_v52, %v1656_v52 }
 0x1bd   : > { %2577 = vmatprep.subr.msk.mxu1 %vm2025_vm1, %v2001_v11  ;;  %v1672_v44 = vrot.slane %v1665_v50, 3  ;;  %v1845_v10 = vld [vmem:[%s3028_s17 + $0x1c] sm:$0x77] }
 0x1be   : > { %v639_v32 = vpop.permute.xlu1 %638  ;;  %v637_v30 = vpop.permute.xlu0 %636 }
 0x1bf   : > { %v647_v35 = vsel %vm640_vm6, %v635_v54, %v637_v30  ;;  %v648_v36 = vsel %vm640_vm6, %v637_v30, %v639_v32  ;;  %2578 = vmatpush1.msk.msra.mxu1 %vm2025_vm1, %v2000_v38  ;;  %v1990_v42 = vld [vmem:[#allocation2 + $0x240] sm:$0xff]  ;;  %vm3939_vm6 = vcmask 457728  }
 0x1c0   : > { %663 = vst [vmem:[#allocation2 + $0xb0] sm:$0xe0] %v647_v35  ;;  %664 = vst [vmem:[#allocation2 + $0xb8] sm:$0xe0] %v648_v36  ;;  %1622 = vrot.lane.b32.xlu1 %v1607_v14, %s2986_s14  ;;  %1620 = vrot.lane.b32.xlu0 %v1606_v15, %s2986_s14  ;;  %v2626_v43 = vpack.c.bf16 %v1990_v42, %v1982_v39  ;;  %v1998_v2 = vld [vmem:[#allocation2 + $0x280] sm:$0x1] }
 0x1c1   : > { %2669 = vmatprep.subr.bf16.mxu1 %v2668_v37  ;;  %2579 = vmatmul.mubr.msk.f32.vlgmr.msra.gmra.mrb[0].mxu1 %vm2018_vm2, %v3693_v28  ;;  %v1922_v54 = vld [vmem:[#allocation2 + $0x20] sm:$0xff]  ;;  %v1674_v14 = vrot.slane %v1666_v53, 3  ;;  %v2955_v36 = vld [vmem:[%s3028_s17 + $0x14] sm:$0x77] }
 0x1c2   : > { %2671 = vmatpush1.bf16.msra.mxu1 %v2670_v22  ;;  %v692_v55 = vpop.permute.xlu1 %691  ;;  %v690_v59 = vpop.permute.xlu0 %689  ;;  %2627 = vmatpush1.bf16.msra.mxu0 %v2626_v43  ;;  %v2650_v3 = vpack.c.bf16 %v1930_v1, %v1922_v54  ;;  %v1722_v32 = vld [vmem:[%s3028_s17 + $0x1c] sm:$0x77]  ;;  %v1788_v37 = vcombine.high %v2955_v36, %v2955_v36  ;;  %v1723_v22 = vld [vmem:[%s3028_s17 + $0x24] sm:$0x7] }
 0x1c3   : > { %v702_v60 = vsel %vm697_vm7, %v3307_v46, %v690_v59  ;;  %v703_v51 = vsel %vm697_vm7, %v690_v59, %v692_v55  ;;  %2573 = vmatprep.subr.msk.mxu0 %vm2025_vm1, %v1999_v20  ;;  %2197 = vmatprep.mubr.f32.mxu1 %v2991_v49  ;;  %v1657_v46 = vld [vmem:[%s3028_s17 + $0x24] sm:$0x7]  ;;  %v1732_v35 = vcombine.high %v1722_v32, %v1722_v32  ;;  %v1779_v39 = vld [vmem:[%s3028_s17 + $0x1c] sm:$0x77] }
 0x1c4   : > { %718 = vst [vmem:[#allocation2 + $0xe0] sm:$0x7] %v702_v60  ;;  %719 = vst [vmem:[#allocation2 + $0xe8] sm:$0x7] %v703_v51  ;;  %1626 = vrot.lane.b32.xlu1 %v1609_v56, %s2986_s14  ;;  %1624 = vrot.lane.b32.xlu0 %v1608_v47, %s2986_s14  ;;  %v1675_v11 = vrot.slane %v1657_v46, 3  ;;  %v1796_v7 = vrot.slane %v1779_v39, 5  ;;  %v1789_v52 = vcombine.high %v1779_v39, %v1779_v39 }
 0x1c5   : > { %v1795_v50 = vrot.slane %v1788_v37, 5 }
 0x1c6   : > { %v696_v0 = vpop.permute.xlu1 %695  ;;  %v694_v9 = vpop.permute.xlu0 %693  ;;  %2574 = vmatpush1.msk.msra.mxu0 %vm2025_vm1, %v1998_v2  ;;  %v1797_v51 = vrot.slane %v1789_v52, 5  ;;  %v1939_v2 = vld [vmem:[#allocation2 + $0xa8] sm:$0xff] }
 0x1c7   : > { %v704_v13 = vsel %vm697_vm7, %v692_v55, %v694_v9  ;;  %v705_v5 = vsel %vm697_vm7, %v694_v9, %v696_v0  ;;  %2649 = vmatprep.subr.bf16.mxu0 %v2648_v62  ;;  %2575 = vmatmul.mubr.msk.f32.vlgmr.msra.gmra.mrb[0].mxu0 %vm2018_vm2, %v3693_v28  ;;  %v1780_v55 = vld [vmem:[%s3028_s17 + $0x24] sm:$0x7]  ;;  %vm3940_vm7 = vmmov %vm3939_vm6 }
 0x1c8   : > { %720 = vst [vmem:[#allocation2 + $0xf0] sm:$0x7] %v704_v13  ;;  %721 = vst [vmem:[#allocation2 + $0xf8] sm:$0x7] %v705_v5  ;;  %1688 = vrot.lane.b32.xlu1 %v1673_v31, %s2987_s15  ;;  %1686 = vrot.lane.b32.xlu0 %v1672_v44, %s2987_s15  ;;  %v1798_v60 = vrot.slane %v1780_v55, 5  ;;  %v1938_v9 = vld [vmem:[#allocation2 + $0xa0] sm:$0xff] }
 0x1c9   : > { %2651 = vmatpush1.bf16.msra.mxu0 %v2650_v3  ;;  %2120 = vmatprep.mubr.f32.mxu0 %v2991_v49  ;;  %v2956_v31 = vld [vmem:[%s3028_s17 + $0x14] sm:$0x77]  ;;  %v1862_v13 = vrot.slane %v1845_v10, 2 }
 0x1ca   : > { %v758_v15 = vpop.permute.xlu1 %757  ;;  %v756_v16 = vpop.permute.xlu0 %755  ;;  %v1854_v44 = vcombine.high %v2956_v31, %v2956_v31 }
 0x1cb   : > { %v768_v17 = vsel %vm763_vm8, %v3323_v58, %v756_v16  ;;  %v769_v18 = vsel %vm763_vm8, %v756_v16, %v758_v15 }
 0x1cc   : > { %784 = vst [vmem:[#allocation2 + $0xe0] sm:$0x38] %v768_v17  ;;  %785 = vst [vmem:[#allocation2 + $0xe8] sm:$0x38] %v769_v18  ;;  %1692 = vrot.lane.b32.xlu1 %v1675_v11, %s2987_s15  ;;  %1690 = vrot.lane.b32.xlu0 %v1674_v14, %s2987_s15  ;;  %v1861_v11 = vrot.slane %v1854_v44, 2  ;;  %v1855_v14 = vcombine.high %v1845_v10, %v1845_v10  ;;  %v2993_v44 = vmov 1  }
 0x1ce   : > { %v762_v30 = vpop.permute.xlu1 %761  ;;  %v760_v38 = vpop.permute.xlu0 %759 }
 0x1cf   : > { %v770_v33 = vsel %vm763_vm8, %v758_v15, %v760_v38  ;;  %v771_v58 = vsel %vm763_vm8, %v760_v38, %v762_v30  ;;  %v1846_v15 = vld [vmem:[%s3028_s17 + $0x24] sm:$0x7]  ;;  %vm3941_vm8 = vmmov %vm3939_vm6 }
 0x1d0   : > { %786 = vst [vmem:[#allocation2 + $0xf0] sm:$0x38] %v770_v33  ;;  %787 = vst [vmem:[#allocation2 + $0xf8] sm:$0x38] %v771_v58  ;;  %1745 = vrot.lane.b32.xlu1 %v1722_v32, %s2988_s16  ;;  %1743 = vrot.lane.b32.xlu0 %v1731_v27, %s2988_s16  ;;  %v1940_v32 = vld [vmem:[#allocation2 + $0xb0] sm:$0xff]  ;;  %v1864_v58 = vrot.slane %v1846_v15, 2 }
 0x1d2   : > { %v824_v42 = vpop.permute.xlu1 %823  ;;  %v822_v43 = vpop.permute.xlu0 %821 }
 0x1d3   : > { %v834_v56 = vsel %vm829_vm9, %v3343_v34, %v822_v43  ;;  %v835_v47 = vsel %vm829_vm9, %v822_v43, %v824_v42 }
 0x1d4   : > { %850 = vst [vmem:[#allocation2 + $0x120] ss:$-60 sps:$4 sm:$0xc1] %v834_v56   ;;  %851 = vst [vmem:[#allocation2 + $0x128] ss:$-60 sps:$4 sm:$0xc1] %v835_v47   ;;  %1749 = vrot.lane.b32.xlu1 %v1723_v22, %s2988_s16  ;;  %1747 = vrot.lane.b32.xlu0 %v1732_v35, %s2988_s16 }
 0x1d5   : > { %v1863_v35 = vrot.slane %v1855_v14, 2  ;;  %v3759_v22 = vld [vmem:[%s3929_s0 + $0x8] sm:$0xff] }
 0x1d6   : > { %v828_v59 = vpop.permute.xlu1 %827  ;;  %v826_v20 = vpop.permute.xlu0 %825  ;;  %2576 = vmatmul.mubr.msk.f32.gmra.mrb[2].mxu0 %vm2018_vm2, %v3759_v22  ;;  %2580 = vmatmul.mubr.msk.f32.gmra.mrb[2].mxu1 %vm2018_vm2, %v3759_v22 }
 0x1d7   : > { %v836_v61 = vsel %vm829_vm9, %v824_v42, %v826_v20  ;;  %v837_v34 = vsel %vm829_vm9, %v826_v20, %v828_v59  ;;  %2268 = vmatprep.mubr.f32.mxu0 %v2991_v49  ;;  %2345 = vmatprep.mubr.f32.mxu1 %v2991_v49  ;;  %v2006_v59 = vld [vmem:[%s3931_s2] sm:$0xff]  ;;  %v2007_v20 = vld [vmem:[%s3931_s2 + $0x8] sm:$0xff]  ;;  %vm3942_vm9 = vmmov %vm3939_vm6 }
 0x1d8   : > { %852 = vst [vmem:[#allocation2 + $0x130] ss:$-60 sps:$4 sm:$0xc1] %v836_v61   ;;  %853 = vst [vmem:[#allocation2 + $0x138] ss:$-60 sps:$4 sm:$0xc1] %v837_v34   ;;  %1811 = vrot.lane.b32.xlu1 %v1796_v7, %s2989_s18  ;;  %1809 = vrot.lane.b32.xlu0 %v1795_v50, %s2989_s18 }
 0x1d9   : > { %v2992_v61 = vmov 0  }
 0x1da   : > { %v898_v1 = vpop.permute.xlu1 %897  ;;  %v896_v53 = vpop.permute.xlu0 %895  ;;  %2726 = vset.pattern.permute.xlu0 %v2992_v61  ;;  %2727 = vset.pattern.permute.xlu1 %v2992_v61 }
 0x1db   : > { %v908_v62 = vsel %vm903_vm10, %v3369_v40, %v896_v53  ;;  %v909_v46 = vsel %vm903_vm10, %v896_v53, %v898_v1  ;;  %v1947_v0 = vld [vmem:[#allocation2 + $0xe8] sm:$0xff]  ;;  %v1946_v54 = vld [vmem:[#allocation2 + $0xe0] sm:$0xff]  ;;  %v1941_v40 = vld [vmem:[#allocation2 + $0xb8] sm:$0xff] }
 0x1dc   : > { %924 = vst [vmem:[#allocation2 + $0x120] sm:$0xe] %v908_v62  ;;  %925 = vst [vmem:[#allocation2 + $0x128] sm:$0xe] %v909_v46  ;;  %1815 = vrot.lane.b32.xlu1 %v1798_v60, %s2989_s18  ;;  %1813 = vrot.lane.b32.xlu0 %v1797_v51, %s2989_s18  ;;  %v2652_v5 = vpack.c.bf16 %v1947_v0, %v1939_v2  ;;  %v2654_v3 = vpack.c.bf16 %v1946_v54, %v1938_v9 }
 0x1de   : > { %v902_v16 = vpop.permute.xlu1 %901  ;;  %v900_v17 = vpop.permute.xlu0 %899  ;;  %2653 = vmatprep.subr.bf16.mxu0 %v2652_v5 }
 0x1df   : > { %v910_v18 = vsel %vm903_vm10, %v898_v1, %v900_v17  ;;  %v911_v24 = vsel %vm903_vm10, %v900_v17, %v902_v16  ;;  %2655 = vmatpush1.bf16.msra.mxu0 %v2654_v3  ;;  %v1949_v27 = vld [vmem:[#allocation2 + $0xf8] sm:$0xff]  ;;  %v1948_v30 = vld [vmem:[#allocation2 + $0xf0] sm:$0xff]  ;;  %vm3943_vm10 = vcmask 449536  }
 0x1e0   : > { %926 = vst [vmem:[#allocation2 + $0x130] sm:$0xe] %v910_v18  ;;  %927 = vst [vmem:[#allocation2 + $0x138] sm:$0xe] %v911_v24  ;;  %1877 = vrot.lane.b32.xlu1 %v1862_v13, %s2990_s19  ;;  %1875 = vrot.lane.b32.xlu0 %v1861_v11, %s2990_s19  ;;  %v2672_v38 = vpack.c.bf16 %v1949_v27, %v1941_v40  ;;  %v2674_v33 = vpack.c.bf16 %v1948_v30, %v1940_v32 }
 0x1e2   : > { %v956_v36 = vpop.permute.xlu1 %955  ;;  %v954_v37 = vpop.permute.xlu0 %953  ;;  %2673 = vmatprep.subr.bf16.mxu1 %v2672_v38 }
 0x1e3   : > { %v966_v39 = vsel %vm961_vm11, %v3391_v4, %v954_v37  ;;  %v967_v42 = vsel %vm961_vm11, %v954_v37, %v956_v36  ;;  %2675 = vmatpush1.bf16.msra.mxu1 %v2674_v33 }
 0x1e4   : > { %982 = vst [vmem:[#allocation2 + $0x120] sm:$0x70] %v966_v39  ;;  %983 = vst [vmem:[#allocation2 + $0x128] sm:$0x70] %v967_v42  ;;  %1881 = vrot.lane.b32.xlu1 %v1864_v58, %s2990_s19  ;;  %1879 = vrot.lane.b32.xlu0 %v1863_v35, %s2990_s19 }
 0x1e6   : > { %v960_v43 = vpop.permute.xlu1 %959  ;;  %v958_v56 = vpop.permute.xlu0 %957 }
 0x1e7   : > { %v968_v4 = vsel %vm961_vm11, %v956_v36, %v958_v56  ;;  %v969_v47 = vsel %vm961_vm11, %v958_v56, %v960_v43  ;;  %vm3944_vm11 = vmmov %vm3943_vm10 }
 0x1e8   : > { %984 = vst [vmem:[#allocation2 + $0x130] sm:$0x70] %v968_v4  ;;  %985 = vst [vmem:[#allocation2 + $0x138] sm:$0x70] %v969_v47  ;;  %2010 = vperm.xlu0 %2726, %v2006_v59   ;;  %2015 = vperm.xlu1 %2727, %v2007_v20  }
 0x1ea   : > { %v1022_v7 = vpop.permute.xlu1 %1021  ;;  %v1020_v50 = vpop.permute.xlu0 %1019 }
 0x1eb   : > { %v1032_v52 = vsel %vm1027_vm12, %v3412_v12, %v1020_v50  ;;  %v1033_v55 = vsel %vm1027_vm12, %v1020_v50, %v1022_v7 }
 0x1ec   : > { %1048 = vst [vmem:[#allocation2 + $0x160] ss:$-60 sps:$4 sm:$0x83] %v1032_v52   ;;  %1049 = vst [vmem:[#allocation2 + $0x168] ss:$-60 sps:$4 sm:$0x83] %v1033_v55   ;;  %2728 = vset.pattern.permute.xlu1 %v2993_v44  ;;  %2729 = vset.pattern.permute.xlu0 %v2993_v44 }
 0x1ed   : > { %2375 = vperm.xlu1 %2728, %v2006_v59   ;;  %2379 = vperm.xlu0 %2729, %v2007_v20  }
 0x1ee   : > { %v1026_v34 = vpop.permute.xlu1 %1025  ;;  %v1024_v60 = vpop.permute.xlu0 %1023 }
 0x1ef   : > { %v1034_v12 = vsel %vm1027_vm12, %v1022_v7, %v1024_v60  ;;  %v1035_v51 = vsel %vm1027_vm12, %v1024_v60, %v1026_v34  ;;  %vm3945_vm12 = vmmov %vm3943_vm10 }
 0x1f0   : > { %1050 = vst [vmem:[#allocation2 + $0x170] ss:$-60 sps:$4 sm:$0x83] %v1034_v12   ;;  %1051 = vst [vmem:[#allocation2 + $0x178] ss:$-60 sps:$4 sm:$0x83] %v1035_v51  }
 0x1f2   : > { %v1096_v10 = vpop.permute.xlu1 %1095  ;;  %v1094_v31 = vpop.permute.xlu0 %1093 }
 0x1f3   : > { %v1106_v1 = vsel %vm1101_vm13, %v3426_v26, %v1094_v31  ;;  %v1107_v53 = vsel %vm1101_vm13, %v1094_v31, %v1096_v10  ;;  %v1955_v17 = vld [vmem:[#allocation2 + $0x128] sm:$0xff]  ;;  %v1954_v24 = vld [vmem:[#allocation2 + $0x120] sm:$0xff] }
 0x1f4   : > { %1122 = vst [vmem:[#allocation2 + $0x160] sm:$0x1c] %v1106_v1  ;;  %1123 = vst [vmem:[#allocation2 + $0x168] sm:$0x1c] %v1107_v53 }
 0x1f6   : > { %v1100_v2 = vpop.permute.xlu1 %1099  ;;  %v1098_v62 = vpop.permute.xlu0 %1097 }
 0x1f7   : > { %v1108_v46 = vsel %vm1101_vm13, %v1096_v10, %v1098_v62  ;;  %v1109_v0 = vsel %vm1101_vm13, %v1098_v62, %v1100_v2  ;;  %v1957_v58 = vld [vmem:[#allocation2 + $0x138] sm:$0xff]  ;;  %vm3946_vm13 = vmmov %vm3943_vm10 }
 0x1f8   : > { %1124 = vst [vmem:[#allocation2 + $0x170] sm:$0x1c] %v1108_v46  ;;  %1125 = vst [vmem:[#allocation2 + $0x178] sm:$0x1c] %v1109_v0 }
 0x1fa   : > { %v1162_v9 = vpop.permute.xlu1 %1161  ;;  %v1160_v54 = vpop.permute.xlu0 %1159 }
 0x1fb   : > { %v1172_v13 = vsel %vm1167_vm14, %v3438_v41, %v1160_v54  ;;  %v1173_v26 = vsel %vm1167_vm14, %v1160_v54, %v1162_v9 }
 0x1fc   : > { %1188 = vst [vmem:[#allocation2 + $0x160] sm:$0xe0] %v1172_v13  ;;  %1189 = vst [vmem:[#allocation2 + $0x168] sm:$0xe0] %v1173_v26 }
 0x1fe   : > { %v1166_v5 = vpop.permute.xlu1 %1165  ;;  %v1164_v3 = vpop.permute.xlu0 %1163 }
 0x1ff   : > { %v1174_v11 = vsel %vm1167_vm14, %v1162_v9, %v1164_v3  ;;  %v1175_v14 = vsel %vm1167_vm14, %v1164_v3, %v1166_v5  ;;  %vm3947_vm14 = vcmask 441344  }
 0x200   : > { %1190 = vst [vmem:[#allocation2 + $0x170] sm:$0xe0] %v1174_v11  ;;  %1191 = vst [vmem:[#allocation2 + $0x178] sm:$0xe0] %v1175_v14 }
 0x202   : > { %v1219_v15 = vpop.permute.xlu1 %1218  ;;  %v1217_v16 = vpop.permute.xlu0 %1216 }
 0x203   : > { %v1229_v40 = vsel %vm1224_vm15, %v3482_v29, %v1217_v16  ;;  %v1230_v41 = vsel %vm1224_vm15, %v1217_v16, %v1219_v15  ;;  %v1963_v18 = vld [vmem:[#allocation2 + $0x168] sm:$0xff]  ;;  %v1962_v27 = vld [vmem:[#allocation2 + $0x160] sm:$0xff]  ;;  %v1956_v29 = vld [vmem:[#allocation2 + $0x130] sm:$0xff] }
 0x204   : > { %1245 = vst [vmem:[#allocation2 + $0x1a0] sm:$0x7] %v1229_v40  ;;  %1246 = vst [vmem:[#allocation2 + $0x1a8] sm:$0x7] %v1230_v41  ;;  %v2656_v32 = vpack.c.bf16 %v1963_v18, %v1955_v17  ;;  %v2658_v30 = vpack.c.bf16 %v1962_v27, %v1954_v24 }
 0x206   : > { %v1223_v38 = vpop.permute.xlu1 %1222  ;;  %v1221_v33 = vpop.permute.xlu0 %1220  ;;  %2657 = vmatprep.subr.bf16.mxu0 %v2656_v32 }
 0x207   : > { %v1231_v35 = vsel %vm1224_vm15, %v1219_v15, %v1221_v33  ;;  %v1232_v36 = vsel %vm1224_vm15, %v1221_v33, %v1223_v38  ;;  %2659 = vmatpush1.bf16.msra.mxu0 %v2658_v30  ;;  %v1965_v37 = vld [vmem:[#allocation2 + $0x178] sm:$0xff]  ;;  %v1964_v39 = vld [vmem:[#allocation2 + $0x170] sm:$0xff]  ;;  %vm3948_vm15 = vmmov %vm3947_vm14 }
 0x208   : > { %1247 = vst [vmem:[#allocation2 + $0x1b0] sm:$0x7] %v1231_v35  ;;  %1248 = vst [vmem:[#allocation2 + $0x1b8] sm:$0x7] %v1232_v36  ;;  %v2676_v42 = vpack.c.bf16 %v1965_v37, %v1957_v58  ;;  %v2678_v43 = vpack.c.bf16 %v1964_v39, %v1956_v29 }
 0x20a   : > { %v1285_v56 = vpop.permute.xlu1 %1284  ;;  %v1283_v4 = vpop.permute.xlu0 %1282  ;;  %2677 = vmatprep.subr.bf16.mxu1 %v2676_v42 }
 0x20b   : > { %v1295_v47 = vsel %vm1290_vm0, %v3498_v57, %v1283_v4  ;;  %v1296_v7 = vsel %vm1290_vm0, %v1283_v4, %v1285_v56  ;;  %2679 = vmatpush1.bf16.msra.mxu1 %v2678_v43 }
 0x20c   : > { %1311 = vst [vmem:[#allocation2 + $0x1a0] sm:$0x38] %v1295_v47  ;;  %1312 = vst [vmem:[#allocation2 + $0x1a8] sm:$0x38] %v1296_v7 }
 0x20e   : > { %v1289_v50 = vpop.permute.xlu1 %1288  ;;  %v1287_v52 = vpop.permute.xlu0 %1286 }
 0x20f   : > { %v1297_v55 = vsel %vm1290_vm0, %v1285_v56, %v1287_v52  ;;  %v1298_v59 = vsel %vm1290_vm0, %v1287_v52, %v1289_v50  ;;  %vm3949_vm0 = vmmov %vm3947_vm14 }
 0x210   : > { %1313 = vst [vmem:[#allocation2 + $0x1b0] sm:$0x38] %v1297_v55  ;;  %1314 = vst [vmem:[#allocation2 + $0x1b8] sm:$0x38] %v1298_v59 }
 0x212   : > { %v1351_v20 = vpop.permute.xlu1 %1350  ;;  %v1349_v61 = vpop.permute.xlu0 %1348 }
 0x213   : > { %v1361_v34 = vsel %vm3939_vm6, %v3514_v8, %v1349_v61  ;;  %v1362_v57 = vsel %vm3940_vm7, %v1349_v61, %v1351_v20  ;;  %vm3950_vm6 = vmmov %vm3949_vm0  ;;  %vm3951_vm7 = vcmask 375808  }
 0x214   : > { %1377 = vst [vmem:[#allocation2 + $0x1e0] ss:$-60 sps:$4 sm:$0xc1] %v1361_v34   ;;  %1378 = vst [vmem:[#allocation2 + $0x1e8] ss:$-60 sps:$4 sm:$0xc1] %v1362_v57  }
 0x216   : > { %v1355_v60 = vpop.permute.xlu1 %1354  ;;  %v1353_v12 = vpop.permute.xlu0 %1352 }
 0x217   : > { %v1363_v51 = vsel %vm3941_vm8, %v1351_v20, %v1353_v12  ;;  %v1364_v10 = vsel %vm3942_vm9, %v1353_v12, %v1355_v60  ;;  %vm3952_vm8 = vmmov %vm3951_vm7 }
 0x218   : > { %1379 = vst [vmem:[#allocation2 + $0x1f0] ss:$-60 sps:$4 sm:$0xc1] %v1363_v51   ;;  %1380 = vst [vmem:[#allocation2 + $0x1f8] ss:$-60 sps:$4 sm:$0xc1] %v1364_v10  }
 0x219   : > { %vm3953_vm9 = vmmov %vm3951_vm7 }
 0x21a   : > { %v1425_v31 = vpop.permute.xlu1 %1424  ;;  %v1423_v44 = vpop.permute.xlu0 %1422 }
 0x21b   : > { %v1435_v1 = vsel %vm3943_vm10, %v3529_v23, %v1423_v44  ;;  %v1436_v53 = vsel %vm3944_vm11, %v1423_v44, %v1425_v31  ;;  %vm3954_vm10 = vmmov %vm3951_vm7  ;;  %v1971_v27 = vld [vmem:[#allocation2 + $0x1a8] sm:$0xff]  ;;  %v1970_v38 = vld [vmem:[#allocation2 + $0x1a0] sm:$0xff] }
 0x21c   : > { %1451 = vst [vmem:[#allocation2 + $0x1e0] sm:$0xe] %v1435_v1  ;;  %1452 = vst [vmem:[#allocation2 + $0x1e8] sm:$0xe] %v1436_v53 }
 0x21e   : > { %v1429_v8 = vpop.permute.xlu1 %1428  ;;  %v1427_v2 = vpop.permute.xlu0 %1426 }
 0x21f   : > { %v1437_v62 = vsel %vm3945_vm12, %v1425_v31, %v1427_v2  ;;  %v1438_v46 = vsel %vm3946_vm13, %v1427_v2, %v1429_v8  ;;  %v1973_v29 = vld [vmem:[#allocation2 + $0x1b8] sm:$0xff] }
 0x220   : > { %1453 = vst [vmem:[#allocation2 + $0x1f0] sm:$0xe] %v1437_v62  ;;  %1454 = vst [vmem:[#allocation2 + $0x1f8] sm:$0xe] %v1438_v46 }
 0x222   : > { %v1483_v0 = vpop.permute.xlu1 %1482  ;;  %v1481_v9 = vpop.permute.xlu0 %1480 }
 0x223   : > { %v1493_v54 = vsel %vm3947_vm14, %v3546_v45, %v1481_v9  ;;  %v1494_v13 = vsel %vm3948_vm15, %v1481_v9, %v1483_v0 }
 0x224   : > { %1509 = vst [vmem:[#allocation2 + $0x1e0] sm:$0x70] %v1493_v54  ;;  %1510 = vst [vmem:[#allocation2 + $0x1e8] sm:$0x70] %v1494_v13 }
 0x226   : > { %v1487_v23 = vpop.permute.xlu1 %1486  ;;  %v1485_v26 = vpop.permute.xlu0 %1484 }
 0x227   : > { %v1495_v5 = vsel %vm3949_vm0, %v1483_v0, %v1485_v26  ;;  %v1496_v3 = vsel %vm3950_vm6, %v1485_v26, %v1487_v23 }
 0x228   : > { %1511 = vst [vmem:[#allocation2 + $0x1f0] sm:$0x70] %v1495_v5  ;;  %1512 = vst [vmem:[#allocation2 + $0x1f8] sm:$0x70] %v1496_v3 }
 0x22a   : > { %v1549_v11 = vpop.permute.xlu1 %1548  ;;  %v1547_v14 = vpop.permute.xlu0 %1546 }
 0x22b   : > { %v1559_v15 = vsel %vm3951_vm7, %v3560_v25, %v1547_v14  ;;  %v1560_v16 = vsel %vm3952_vm8, %v1547_v14, %v1549_v11 }
 0x22c   : > { %1575 = vst [vmem:[#allocation2 + $0x220] ss:$-60 sps:$4 sm:$0x83] %v1559_v15   ;;  %1576 = vst [vmem:[#allocation2 + $0x228] ss:$-60 sps:$4 sm:$0x83] %v1560_v16  }
 0x22e   : > { %v1553_v45 = vpop.permute.xlu1 %1552  ;;  %v1551_v17 = vpop.permute.xlu0 %1550 }
 0x22f   : > { %v1561_v40 = vsel %vm3953_vm9, %v1549_v11, %v1551_v17  ;;  %v1562_v41 = vsel %vm3954_vm10, %v1551_v17, %v1553_v45 }
 0x230   : > { %1577 = vst [vmem:[#allocation2 + $0x230] ss:$-60 sps:$4 sm:$0x83] %v1561_v40   ;;  %1578 = vst [vmem:[#allocation2 + $0x238] ss:$-60 sps:$4 sm:$0x83] %v1562_v41  }
 0x232   : > { %v1623_v18 = vpop.permute.xlu1 %1622  ;;  %v1621_v24 = vpop.permute.xlu0 %1620 }
 0x233   : > { %v1633_v32 = vsel %vm1628_vm5, %v3599_v63, %v1621_v24  ;;  %v1634_v25 = vsel %vm1628_vm5, %v1621_v24, %v1623_v18  ;;  %v1979_v30 = vld [vmem:[#allocation2 + $0x1e8] sm:$0xff]  ;;  %v1978_v33 = vld [vmem:[#allocation2 + $0x1e0] sm:$0xff]  ;;  %v1972_v63 = vld [vmem:[#allocation2 + $0x1b0] sm:$0xff] }
 0x234   : > { %1649 = vst [vmem:[#allocation2 + $0x220] sm:$0x1c] %v1633_v32  ;;  %1650 = vst [vmem:[#allocation2 + $0x228] sm:$0x1c] %v1634_v25  ;;  %v2660_v58 = vpack.c.bf16 %v1979_v30, %v1971_v27  ;;  %v2662_v35 = vpack.c.bf16 %v1978_v33, %v1970_v38 }
 0x236   : > { %v1627_v36 = vpop.permute.xlu1 %1626  ;;  %v1625_v37 = vpop.permute.xlu0 %1624  ;;  %2661 = vmatprep.subr.bf16.mxu0 %v2660_v58 }
 0x237   : > { %v1635_v39 = vsel %vm1628_vm5, %v1623_v18, %v1625_v37  ;;  %v1636_v42 = vsel %vm1628_vm5, %v1625_v37, %v1627_v36  ;;  %2663 = vmatpush1.bf16.msra.mxu0 %v2662_v35  ;;  %v1981_v43 = vld [vmem:[#allocation2 + $0x1f8] sm:$0xff]  ;;  %v1980_v56 = vld [vmem:[#allocation2 + $0x1f0] sm:$0xff] }
 0x238   : > { %1651 = vst [vmem:[#allocation2 + $0x230] sm:$0x1c] %v1635_v39  ;;  %1652 = vst [vmem:[#allocation2 + $0x238] sm:$0x1c] %v1636_v42  ;;  %v2680_v4 = vpack.c.bf16 %v1981_v43, %v1973_v29  ;;  %v2682_v47 = vpack.c.bf16 %v1980_v56, %v1972_v63 }
 0x23a   : > { %v1689_v7 = vpop.permute.xlu1 %1688  ;;  %v1687_v50 = vpop.permute.xlu0 %1686  ;;  %2681 = vmatprep.subr.bf16.mxu1 %v2680_v4 }
 0x23b   : > { %v1699_v52 = vsel %vm1694_vm4, %v3616_v21, %v1687_v50  ;;  %v1700_v55 = vsel %vm1694_vm4, %v1687_v50, %v1689_v7  ;;  %2683 = vmatpush1.bf16.msra.mxu1 %v2682_v47 }
 0x23c   : > { %1715 = vst [vmem:[#allocation2 + $0x220] sm:$0xe0] %v1699_v52  ;;  %1716 = vst [vmem:[#allocation2 + $0x228] sm:$0xe0] %v1700_v55 }
 0x23e   : > { %v1693_v59 = vpop.permute.xlu1 %1692  ;;  %v1691_v20 = vpop.permute.xlu0 %1690 }
 0x23f   : > { %v1701_v61 = vsel %vm1694_vm4, %v1689_v7, %v1691_v20  ;;  %v1702_v34 = vsel %vm1694_vm4, %v1691_v20, %v1693_v59  ;;  %vm3955_vm4 = vcmask 285696  }
 0x240   : > { %1717 = vst [vmem:[#allocation2 + $0x230] sm:$0xe0] %v1701_v61  ;;  %1718 = vst [vmem:[#allocation2 + $0x238] sm:$0xe0] %v1702_v34 }
 0x241   : > { %vm3956_vm5 = vmmov %vm3955_vm4 }
 0x242   : > { %v1746_v57 = vpop.permute.xlu1 %1745  ;;  %v1744_v60 = vpop.permute.xlu0 %1743  ;;  %vm3957_vm11 = vmmov %vm3955_vm4 }
 0x243   : > { %v1756_v12 = vsel %vm1751_vm3, %v3632_v48, %v1744_v60  ;;  %v1757_v21 = vsel %vm1751_vm3, %v1744_v60, %v1746_v57  ;;  %vm3958_vm12 = vmmov %vm3955_vm4  ;;  %v1987_v11 = vld [vmem:[#allocation2 + $0x228] sm:$0xff]  ;;  %v1986_v15 = vld [vmem:[#allocation2 + $0x220] sm:$0xff] }
 0x244   : > { %1772 = vst [vmem:[#allocation2 + $0x260] sm:$0x7] %v1756_v12  ;;  %1773 = vst [vmem:[#allocation2 + $0x268] sm:$0x7] %v1757_v21 }
 0x246   : > { %v1750_v51 = vpop.permute.xlu1 %1749  ;;  %v1748_v10 = vpop.permute.xlu0 %1747 }
 0x247   : > { %v1758_v31 = vsel %vm1751_vm3, %v1746_v57, %v1748_v10  ;;  %v1759_v44 = vsel %vm1751_vm3, %v1748_v10, %v1750_v51  ;;  %vm3959_vm3 = vcmask 277504   ;;  %v1988_v40 = vld [vmem:[#allocation2 + $0x230] sm:$0xff] }
 0x248   : > { %1774 = vst [vmem:[#allocation2 + $0x270] sm:$0x7] %v1758_v31  ;;  %1775 = vst [vmem:[#allocation2 + $0x278] sm:$0x7] %v1759_v44 }
 0x249   : > { %vm3960_vm13 = vmmov %vm3959_vm3 }
 0x24a   : > { %v1812_v1 = vpop.permute.xlu1 %1811  ;;  %v1810_v53 = vpop.permute.xlu0 %1809  ;;  %vm3961_vm14 = vmmov %vm3959_vm3 }
 0x24b   : > { %v1822_v8 = vsel %vm3955_vm4, %v3646_v6, %v1810_v53  ;;  %v1823_v2 = vsel %vm3956_vm5, %v1810_v53, %v1812_v1  ;;  %vm3962_vm15 = vmmov %vm3959_vm3 }
 0x24c   : > { %1838 = vst [vmem:[#allocation2 + $0x260] sm:$0x38] %v1822_v8  ;;  %1839 = vst [vmem:[#allocation2 + $0x268] sm:$0x38] %v1823_v2 }
 0x24e   : > { %v1816_v48 = vpop.permute.xlu1 %1815  ;;  %v1814_v62 = vpop.permute.xlu0 %1813 }
 0x24f   : > { %v1824_v46 = vsel %vm3957_vm11, %v1812_v1, %v1814_v62  ;;  %v1825_v0 = vsel %vm3958_vm12, %v1814_v62, %v1816_v48 }
 0x250   : > { %1840 = vst [vmem:[#allocation2 + $0x270] sm:$0x38] %v1824_v46  ;;  %1841 = vst [vmem:[#allocation2 + $0x278] sm:$0x38] %v1825_v0 }
 0x252   : > { %v1878_v9 = vpop.permute.xlu1 %1877  ;;  %v1876_v54 = vpop.permute.xlu0 %1875 }
 0x253   : > { %v1888_v13 = vsel %vm3959_vm3, %v3657_v19, %v1876_v54  ;;  %v1889_v23 = vsel %vm3960_vm13, %v1876_v54, %v1878_v9  ;;  %v1989_v19 = vld [vmem:[#allocation2 + $0x238] sm:$0xff] }
 0x254   : > { %1904 = vst [vmem:[#allocation2 + $0x2a0] ss:$-60 sps:$4 sm:$0xc1] %v1888_v13   ;;  %1905 = vst [vmem:[#allocation2 + $0x2a8] ss:$-60 sps:$4 sm:$0xc1] %v1889_v23  }
 0x256   : > { %v1882_v6 = vpop.permute.xlu1 %1881  ;;  %v1880_v26 = vpop.permute.xlu0 %1879 }
 0x257   : > { %v1890_v5 = vsel %vm3961_vm14, %v1878_v9, %v1880_v26  ;;  %v1891_v3 = vsel %vm3962_vm15, %v1880_v26, %v1882_v6 }
 0x258   : > { %1906 = vst [vmem:[#allocation2 + $0x2b0] ss:$-60 sps:$4 sm:$0xc1] %v1890_v5   ;;  %1907 = vst [vmem:[#allocation2 + $0x2b8] ss:$-60 sps:$4 sm:$0xc1] %v1891_v3  }
 0x25b   : > { %v1995_v14 = vld [vmem:[#allocation2 + $0x268] sm:$0xff]  ;;  %v1994_v16 = vld [vmem:[#allocation2 + $0x260] sm:$0xff] }
 0x25c   : > { %v2664_v45 = vpack.c.bf16 %v1995_v14, %v1987_v11  ;;  %v2666_v17 = vpack.c.bf16 %v1994_v16, %v1986_v15  ;;  %v2003_v41 = vld [vmem:[#allocation2 + $0x2a8] sm:$0x1]  ;;  %v2002_v25 = vld [vmem:[#allocation2 + $0x2a0] sm:$0x1] }
 0x25e   : > { %2665 = vmatprep.subr.bf16.mxu0 %v2664_v45 }
 0x25f   : > { %2667 = vmatpush1.bf16.msra.mxu0 %v2666_v17  ;;  %v1997_v18 = vld [vmem:[#allocation2 + $0x278] sm:$0xff]  ;;  %v1996_v24 = vld [vmem:[#allocation2 + $0x270] sm:$0xff] }
 0x260   : > { %2581 = vmatprep.subr.msk.mxu0 %vm2025_vm1, %v2003_v41  ;;  %v2684_v27 = vpack.c.bf16 %v1997_v18, %v1989_v19  ;;  %v2686_v32 = vpack.c.bf16 %v1996_v24, %v1988_v40  ;;  %v2005_v30 = vld [vmem:[#allocation2 + $0x2b8] sm:$0x1]  ;;  %v2004_v38 = vld [vmem:[#allocation2 + $0x2b0] sm:$0x1] }
 0x262   : > { %2685 = vmatprep.subr.bf16.mxu1 %v2684_v27 }
 0x263   : > { %2582 = vmatpush1.msk.msra.mxu0 %vm2025_vm1, %v2002_v25  ;;  %2687 = vmatpush1.bf16.msra.mxu1 %v2686_v32 }
 0x264   : > { %2585 = vmatprep.subr.msk.mxu1 %vm2025_vm1, %v2005_v30  ;;  %2583 = vmatmul.mubr.msk.f32.vlgmr.msra.gmra.mrb[4].mxu0 %vm2018_vm2, %v3693_v28 }
 0x265   : > { %2274 = vmatprep.mubr.f32.mxu0 %v2991_v49 }
 0x267   : > { %2586 = vmatpush1.msk.msra.mxu1 %vm2025_vm1, %v2004_v38  ;;  %v3864_v33 = vpop.permute.xlu0 %2010  ;;  %v3868_v29 = vpop.permute.xlu1 %2015 }
 0x268   : > { %2587 = vmatmul.mubr.msk.f32.vlgmr.msra.gmra.mrb[4].mxu1 %vm2018_vm2, %v3693_v28  ;;  %2584 = vmatmul.mubr.msk.f32.gmra.mrb[6].mxu0 %vm2018_vm2, %v3759_v22 }
 0x269   : > { %2351 = vmatprep.mubr.f32.mxu1 %v2991_v49 }
 0x26c   : > { %2588 = vmatmul.mubr.msk.f32.gmra.mrb[6].mxu1 %vm2018_vm2, %v3759_v22  ;;  %v3872_v22 = vpop.permute.xlu1 %2375  ;;  %v3892_v6 = vpop.permute.xlu0 %2379 }
 0x294   : > { %v2193_v58 = vpop.f32.mrb[0].mxu1 }
 0x295   : > { %v2194_v35 = vadd.f32 %v2193_v58, %v3864_v33  ;;  %v2195_v36 = vpop.f32.mrb[1].mxu1 }
 0x296   : > { %v2196_v37 = vadd.f32 %v2195_v36, %v3864_v33 }
 0x297   : > { %2841 = vtanh.f32 %v2194_v35 }
 0x298   : > { %2843 = vtanh.f32 %v2196_v37 }
 0x29a   : > { %v2116_v28 = vpop.f32.mrb[0].mxu0 }
 0x29b   : > { %v2117_v39 = vadd.f32 %v2116_v28, %v3864_v33  ;;  %v2118_v42 = vpop.f32.mrb[1].mxu0 }
 0x29c   : > { %v2119_v49 = vadd.f32 %v2118_v42, %v3864_v33 }
 0x29d   : > { %2845 = vtanh.f32 %v2117_v39 }
 0x29e   : > { %2847 = vtanh.f32 %v2119_v49 }
 0x2a1   : > { %v2842_v43 = vpop.eup %2841 }
 0x2a2   : > { %v2844_v63 = vpop.eup %2843  ;;  %v2384_v56 = vmul.f32 %v2842_v43, %v3872_v22 }
 0x2a3   : > { %v2385_v4 = vmul.f32 %v2844_v63, %v3872_v22 }
 0x2a4   : > { %v2591_v47 = vmul.f32 -1.442695, %v2384_v56 }
 0x2a5   : > { %v2592_v7 = vmul.f32 -1.442695, %v2385_v4 }
 0x2a6   : > { %2849 = vpow2.f32 %v2591_v47 }
 0x2a7   : > { %v2846_v50 = vpop.eup %2845  ;;  %2851 = vpow2.f32 %v2592_v7 }
 0x2a8   : > { %v2848_v52 = vpop.eup %2847  ;;  %v2382_v55 = vmul.f32 %v2846_v50, %v3872_v22 }
 0x2a9   : > { %v2383_v59 = vmul.f32 %v2848_v52, %v3872_v22  ;;  %v2122_v51 = vpop.f32.mrb[2].mxu0  ;;  %v2199_v8 = vpop.f32.mrb[2].mxu1 }
 0x2aa   : > { %v2589_v20 = vmul.f32 -1.442695, %v2382_v55  ;;  %v2123_v44 = vadd.f32 %v2122_v51, %v3868_v29  ;;  %v2124_v1 = vpop.f32.mrb[3].mxu0  ;;  %v2200_v2 = vadd.f32 %v2199_v8, %v3868_v29  ;;  %v2201_v62 = vpop.f32.mrb[3].mxu1 }
 0x2ab   : > { %v2590_v61 = vmul.f32 -1.442695, %v2383_v59  ;;  %v2125_v48 = vadd.f32 %v2124_v1, %v3868_v29  ;;  %v2202_v46 = vadd.f32 %v2201_v62, %v3868_v29 }
 0x2ac   : > { %2853 = vpow2.f32 %v2589_v20 }
 0x2ad   : > { %2855 = vpow2.f32 %v2590_v61 }
 0x2b0   : > { %v2850_v34 = vpop.eup %2849 }
 0x2b1   : > { %v2852_v57 = vpop.eup %2851  ;;  %v2448_v60 = vadd.f32 1.0, %v2850_v34 }
 0x2b2   : > { %v2449_v12 = vadd.f32 1.0, %v2852_v57 }
 0x2b3   : > { %2857 = vrcp.f32 %v2448_v60 }
 0x2b4   : > { %2859 = vrcp.f32 %v2449_v12 }
 0x2b6   : > { %v2854_v21 = vpop.eup %2853 }
 0x2b7   : > { %v2856_v10 = vpop.eup %2855  ;;  %v2446_v31 = vadd.f32 1.0, %v2854_v21 }
 0x2b8   : > { %v2447_v53 = vadd.f32 1.0, %v2856_v10 }
 0x2b9   : > { %2861 = vrcp.f32 %v2446_v31 }
 0x2ba   : > { %2863 = vrcp.f32 %v2447_v53 }
 0x2bb   : > { %2865 = vtanh.f32 %v2123_v44 }
 0x2bc   : > { %2867 = vtanh.f32 %v2200_v2 }
 0x2bd   : > { %v2858_v0 = vpop.eup %2857  ;;  %2869 = vtanh.f32 %v2125_v48 }
 0x2be   : > { %v2860_v9 = vpop.eup %2859  ;;  %2496 = vst [vmem:[%s3886_s30 + $0x10] sm:$0xff] %v2858_v0  ;;  %2871 = vtanh.f32 %v2202_v46 }
 0x2bf   : > { %2497 = vst [vmem:[%s3886_s30 + $0x18] sm:$0xff] %v2860_v9 }
 0x2c3   : > { %v2862_v54 = vpop.eup %2861 }
 0x2c4   : > { %v2864_v13 = vpop.eup %2863  ;;  %2494 = vst [vmem:[%s3886_s30] sm:$0xff] %v2862_v54 }
 0x2c5   : > { %v2866_v23 = vpop.eup %2865  ;;  %2495 = vst [vmem:[%s3886_s30 + $0x8] sm:$0xff] %v2864_v13 }
 0x2c6   : > { %v2868_v26 = vpop.eup %2867  ;;  %v2390_v5 = vmul.f32 %v2866_v23, %v3892_v6 }
 0x2c7   : > { %v2870_v3 = vpop.eup %2869  ;;  %v2392_v11 = vmul.f32 %v2868_v26, %v3892_v6 }
 0x2c8   : > { %v2872_v14 = vpop.eup %2871  ;;  %v2391_v15 = vmul.f32 %v2870_v3, %v3892_v6  ;;  %v2597_v16 = vmul.f32 -1.442695, %v2390_v5 }
 0x2c9   : > { %v2393_v45 = vmul.f32 %v2872_v14, %v3892_v6  ;;  %v2599_v17 = vmul.f32 -1.442695, %v2392_v11 }
 0x2ca   : > { %2873 = vpow2.f32 %v2597_v16  ;;  %v2598_v19 = vmul.f32 -1.442695, %v2391_v15 }
 0x2cb   : > { %2875 = vpow2.f32 %v2599_v17  ;;  %v2600_v40 = vmul.f32 -1.442695, %v2393_v45 }
 0x2cc   : > { %2877 = vpow2.f32 %v2598_v19 }
 0x2cd   : > { %2879 = vpow2.f32 %v2600_v40 }
 0x2d4   : > { %v2874_v41 = vpop.eup %2873 }
 0x2d5   : > { %v2876_v18 = vpop.eup %2875  ;;  %v2454_v24 = vadd.f32 1.0, %v2874_v41 }
 0x2d6   : > { %v2878_v27 = vpop.eup %2877  ;;  %v2456_v32 = vadd.f32 1.0, %v2876_v18 }
 0x2d7   : > { %v2880_v25 = vpop.eup %2879  ;;  %v2455_v30 = vadd.f32 1.0, %v2878_v27  ;;  %2881 = vrcp.f32 %v2454_v24 }
 0x2d8   : > { %v2457_v38 = vadd.f32 1.0, %v2880_v25  ;;  %2883 = vrcp.f32 %v2456_v32 }
 0x2d9   : > { %2885 = vrcp.f32 %v2455_v30 }
 0x2da   : > { %2887 = vrcp.f32 %v2457_v38 }
 0x2e1   : > { %v2882_v58 = vpop.eup %2881 }
 0x2e2   : > { %v2884_v35 = vpop.eup %2883  ;;  %2502 = vst [vmem:[%s3886_s30 + $0x40] sm:$0xff] %v2882_v58 }
 0x2e3   : > { %v2886_v36 = vpop.eup %2885  ;;  %2504 = vst [vmem:[%s3886_s30 + $0x50] sm:$0xff] %v2884_v35 }
 0x2e4   : > { %v2888_v37 = vpop.eup %2887  ;;  %2503 = vst [vmem:[%s3886_s30 + $0x48] sm:$0xff] %v2886_v36 }
 0x2e5   : > { %2505 = vst [vmem:[%s3886_s30 + $0x58] sm:$0xff] %v2888_v37 }
 0x337   : > { %v2270_v28 = vpop.f32.mrb[4].mxu0 }
 0x338   : > { %v2271_v39 = vadd.f32 %v2270_v28, %v3864_v33  ;;  %v2272_v42 = vpop.f32.mrb[5].mxu0 }
 0x339   : > { %v2273_v49 = vadd.f32 %v2272_v42, %v3864_v33 }
 0x33a   : > { %2889 = vtanh.f32 %v2271_v39 }
 0x33b   : > { %2891 = vtanh.f32 %v2273_v49  ;;  %v2347_v43 = vpop.f32.mrb[4].mxu1  ;;  %v2276_v63 = vpop.f32.mrb[6].mxu0 }
 0x33c   : > { %v2348_v56 = vadd.f32 %v2347_v43, %v3864_v33  ;;  %v2349_v4 = vpop.f32.mrb[5].mxu1  ;;  %v2277_v47 = vadd.f32 %v2276_v63, %v3868_v29  ;;  %v2278_v7 = vpop.f32.mrb[7].mxu0 }
 0x33d   : > { %v2350_v50 = vadd.f32 %v2349_v4, %v3864_v33  ;;  %v2279_v52 = vadd.f32 %v2278_v7, %v3868_v29 }
 0x33e   : > { %2893 = vtanh.f32 %v2348_v56 }
 0x33f   : > { %2895 = vtanh.f32 %v2350_v50  ;;  %v2353_v55 = vpop.f32.mrb[6].mxu1 }
 0x340   : > { %2897 = vtanh.f32 %v2277_v47  ;;  %v2354_v59 = vadd.f32 %v2353_v55, %v3868_v29  ;;  %v2355_v20 = vpop.f32.mrb[7].mxu1 }
 0x341   : > { %2899 = vtanh.f32 %v2279_v52  ;;  %v2356_v61 = vadd.f32 %v2355_v20, %v3868_v29 }
 0x342   : > { %2901 = vtanh.f32 %v2354_v59 }
 0x343   : > { %2903 = vtanh.f32 %v2356_v61 }
 0x344   : > { %v2890_v34 = vpop.eup %2889 }
 0x345   : > { %v2892_v57 = vpop.eup %2891  ;;  %v2386_v60 = vmul.f32 %v2890_v34, %v3872_v22 }
 0x346   : > { %v2387_v33 = vmul.f32 %v2892_v57, %v3872_v22 }
 0x347   : > { %v2593_v12 = vmul.f32 -1.442695, %v2386_v60 }
 0x348   : > { %v2894_v21 = vpop.eup %2893  ;;  %v2594_v51 = vmul.f32 -1.442695, %v2387_v33 }
 0x349   : > { %v2896_v10 = vpop.eup %2895  ;;  %2905 = vpow2.f32 %v2593_v12  ;;  %v2388_v31 = vmul.f32 %v2894_v21, %v3872_v22 }
 0x34a   : > { %v2898_v44 = vpop.eup %2897  ;;  %2907 = vpow2.f32 %v2594_v51  ;;  %v2389_v1 = vmul.f32 %v2896_v10, %v3872_v22 }
 0x34b   : > { %v2900_v29 = vpop.eup %2899  ;;  %v2595_v53 = vmul.f32 -1.442695, %v2388_v31  ;;  %v2394_v8 = vmul.f32 %v2898_v44, %v3892_v6 }
 0x34c   : > { %v2902_v2 = vpop.eup %2901  ;;  %v2596_v48 = vmul.f32 -1.442695, %v2389_v1  ;;  %v2395_v62 = vmul.f32 %v2900_v29, %v3892_v6 }
 0x34d   : > { %v2904_v46 = vpop.eup %2903  ;;  %2909 = vpow2.f32 %v2595_v53  ;;  %v2396_v0 = vmul.f32 %v2902_v2, %v3892_v6  ;;  %v2601_v9 = vmul.f32 -1.442695, %v2394_v8 }
 0x34e   : > { %2911 = vpow2.f32 %v2596_v48  ;;  %v2397_v54 = vmul.f32 %v2904_v46, %v3892_v6  ;;  %v2602_v13 = vmul.f32 -1.442695, %v2395_v62 }
 0x34f   : > { %2913 = vpow2.f32 %v2601_v9  ;;  %v2603_v23 = vmul.f32 -1.442695, %v2396_v0 }
 0x350   : > { %2915 = vpow2.f32 %v2602_v13  ;;  %v2604_v22 = vmul.f32 -1.442695, %v2397_v54 }
 0x351   : > { %2917 = vpow2.f32 %v2603_v23 }
 0x352   : > { %2919 = vpow2.f32 %v2604_v22 }
 0x353   : > { %v2906_v26 = vpop.eup %2905 }
 0x354   : > { %v2908_v5 = vpop.eup %2907  ;;  %v2450_v3 = vadd.f32 1.0, %v2906_v26 }
 0x355   : > { %v2451_v11 = vadd.f32 1.0, %v2908_v5 }
 0x356   : > { %2921 = vrcp.f32 %v2450_v3 }
 0x357   : > { %v2910_v14 = vpop.eup %2909  ;;  %2923 = vrcp.f32 %v2451_v11 }
 0x358   : > { %v2912_v15 = vpop.eup %2911  ;;  %v2452_v16 = vadd.f32 1.0, %v2910_v14 }
 0x359   : > { %v2914_v45 = vpop.eup %2913  ;;  %v2453_v17 = vadd.f32 1.0, %v2912_v15 }
 0x35a   : > { %v2916_v6 = vpop.eup %2915  ;;  %2925 = vrcp.f32 %v2452_v16  ;;  %v2458_v19 = vadd.f32 1.0, %v2914_v45 }
 0x35b   : > { %v2918_v40 = vpop.eup %2917  ;;  %2927 = vrcp.f32 %v2453_v17  ;;  %v2459_v41 = vadd.f32 1.0, %v2916_v6 }
 0x35c   : > { %v2920_v18 = vpop.eup %2919  ;;  %v2460_v24 = vadd.f32 1.0, %v2918_v40  ;;  %2929 = vrcp.f32 %v2458_v19 }
 0x35d   : > { %v2461_v27 = vadd.f32 1.0, %v2920_v18  ;;  %2931 = vrcp.f32 %v2459_v41 }
 0x35e   : > { %2933 = vrcp.f32 %v2460_v24 }
 0x35f   : > { %2935 = vrcp.f32 %v2461_v27 }
 0x360   : > { %v2922_v32 = vpop.eup %2921 }
 0x361   : > { %v2924_v25 = vpop.eup %2923  ;;  %2498 = vst [vmem:[%s3886_s30 + $0x20] sm:$0xff] %v2922_v32 }
 0x362   : > { %2499 = vst [vmem:[%s3886_s30 + $0x28] sm:$0xff] %v2924_v25 }
 0x364   : > { %v2926_v30 = vpop.eup %2925 }
 0x365   : > { %v2928_v38 = vpop.eup %2927  ;;  %2500 = vst [vmem:[%s3886_s30 + $0x30] sm:$0xff] %v2926_v30 }
 0x366   : > { %v2930_v58 = vpop.eup %2929  ;;  %2501 = vst [vmem:[%s3886_s30 + $0x38] sm:$0xff] %v2928_v38 }
 0x367   : > { %v2932_v35 = vpop.eup %2931  ;;  %2506 = vst [vmem:[%s3886_s30 + $0x60] sm:$0xff] %v2930_v58 }
 0x368   : > { %v2934_v36 = vpop.eup %2933  ;;  %2507 = vst [vmem:[%s3886_s30 + $0x68] sm:$0xff] %v2932_v35 }
 0x369   : > { %v2936_v37 = vpop.eup %2935  ;;  %2508 = vst [vmem:[%s3886_s30 + $0x70] sm:$0xff] %v2934_v36 }
 0x36a   : > { %2509 = vst [vmem:[%s3886_s30 + $0x78] sm:$0xff] %v2936_v37 }
 0x36b PF: > { %s13_s12 = sadd.s32 1, %s2963_s12  }
 0x36c   : > { %p10_p4 = scmp.ge.s32.totalorder %s13_s12, 4  }
 0x36e   :  { %12 = sbr.rel (!%p10_p4) target bundleno = 1 (0x1), region = 62 }

</bundles_post_ra>
